<compile_context>
chip_gen: v6e
topology: v6e:2x2x1
jax: 0.10.0
libtpu: 0.0.40
codegen_flags: <defaults>
</compile_context>

<pallas_src>
import numpy as np
import jax
import jax.numpy as jnp
from jax import lax
from jax.experimental import pallas as pl
from jax.experimental.pallas import tpu as pltpu

_EPS = 1e-5


def _round_up(n, m):
    return (n + m - 1) // m * m


# ----------------------------------------------------------------------------
# In-kernel helpers
# ----------------------------------------------------------------------------
def _sigmoid(x):
    # sigmoid(x) = 0.5 * tanh(0.5 * x) + 0.5 -> one EUP op per gate (no exp + reciprocal).
    return 0.5 * jnp.tanh(0.5 * x) + 0.5


def _gates(z, c, ch):
    """LSTM gates on z = relu(combined_conv), [4*ch, P] layout.

    Slices of z are consumed one at a time to keep live ranges short."""
    i = _sigmoid(z[0 * ch:1 * ch])
    f = _sigmoid(z[1 * ch:2 * ch])
    g = jnp.tanh(z[3 * ch:4 * ch])
    c_next = f * c + i * g
    o = _sigmoid(z[2 * ch:3 * ch])
    h_next = o * jnp.tanh(c_next)
    return h_next, c_next


# ----------------------------------------------------------------------------
# Parameters (PyTorch layout, deterministic init, eval mode)
# ----------------------------------------------------------------------------
def init_params(key, input_channels, hidden_channels, output_channels):
    hid = hidden_channels
    half = hid // 2

    def u(k, shape):
        return (jax.random.uniform(k, shape, jnp.float32) - 0.5) * 0.2

    ks = iter(jax.random.split(key, 20))

    def cell_p(cin, ch):
        # nn.Conv2d(cin+ch, 4*ch, 1) weight split column-wise into Wx / Wh, plus bias.
        return (u(next(ks), (4 * ch, cin)),
                u(next(ks), (4 * ch, ch)),
                u(next(ks), (4 * ch, 1)))

    e1wx, e1wh, e1b = cell_p(input_channels, hid)
    e2wx, e2wh, e2b = cell_p(hid, half)
    d1wx, d1wh, d1b = cell_p(half, half)
    d2wx, d2wh, d2b = cell_p(half, half)

    # Eval-mode BatchNorm2d with PyTorch default running stats (mean=0, var=1, gamma=1,
    # beta=0) folded into per-channel scale/shift.
    bn_scale = jnp.full((half, 1), 1.0 / (1.0 + _EPS) ** 0.5, jnp.float32)
    bn_shift = jnp.zeros((half, 1), jnp.float32)

    return {
        "enc1_wx": e1wx, "enc1_wh": e1wh, "enc1_b": e1b,
        "enc2_wx": e2wx, "enc2_wh": e2wh, "enc2_b": e2b,
        "enc_bn_scale": bn_scale, "enc_bn_shift": bn_shift,
        "dec1_wx": d1wx, "dec1_wh": d1wh, "dec1_b": d1b,
        "dec2_wx": d2wx, "dec2_wh": d2wh, "dec2_b": d2b,
        "dec_bn_scale": bn_scale, "dec_bn_shift": bn_shift,
        "dec_conv_w": u(next(ks), (output_channels, half)),
        "dec_conv_b": u(next(ks), (output_channels, 1)),
    }


def pack_params(params, input_channels, hidden_channels, output_channels):
    """Pack all weights/biases/BN params into ONE 2D slab (single DMA, 8-aligned rows).

    Encoder cells get a fused weight [Wx | b | 0-pad | Wh] that acts on a persistent
    VMEM state buffer laid out as [x ; 1 ; 0 ; h].  Decoder cells take input == hidden
    in the reference, so Wx + Wh is pre-summed host-side."""
    cin, hid = input_channels, hidden_channels
    half, cout = hid // 2, output_channels

    X1H = _round_up(cin + 1, 8)      # h1 row offset inside the cell-1 state buffer
    X2H = _round_up(hid + 1, 8)      # h2 row offset inside the cell-2 state buffer
    K1 = X1H + hid
    K2 = X2H + half
    width = _round_up(max(K1, K2, half, 1), 8)

    np_p = {k: np.asarray(v, np.float32) for k, v in params.items()}
    blocks, offs, cur = [], {}, 0

    def add(name, mat):
        nonlocal cur
        r, c = mat.shape
        blk = np.zeros((_round_up(r, 8), width), np.float32)
        blk[:r, :c] = mat
        offs[name] = cur
        cur += blk.shape[0]
        blocks.append(blk)

    w1 = np.zeros((4 * hid, K1), np.float32)
    w1[:, :cin] = np_p["enc1_wx"]
    w1[:, cin:cin + 1] = np_p["enc1_b"]          # bias column hits the "ones" row of xh1
    w1[:, X1H:X1H + hid] = np_p["enc1_wh"]
    add("w1", w1)

    w2 = np.zeros((4 * half, K2), np.float32)
    w2[:, :hid] = np_p["enc2_wx"]
    w2[:, hid:hid + 1] = np_p["enc2_b"]
    w2[:, X2H:X2H + half] = np_p["enc2_wh"]
    add("w2", w2)

    add("wd1", np_p["dec1_wx"] + np_p["dec1_wh"])
    add("wd2", np_p["dec2_wx"] + np_p["dec2_wh"])
    add("wout", np_p["dec_conv_w"])
    add("bd1", np_p["dec1_b"])
    add("bd2", np_p["dec2_b"])
    add("bout", np_p["dec_conv_b"])
    add("ebn_s", np_p["enc_bn_scale"])
    add("ebn_b", np_p["enc_bn_shift"])
    add("dbn_s", np_p["dec_bn_scale"])
    add("dbn_b", np_p["dec_bn_shift"])

    slab = jnp.asarray(np.concatenate(blocks, axis=0))
    meta = {"K1": K1, "K2": K2, "X1H": X1H, "X2H": X2H, "offs": offs}
    return slab, meta


# ----------------------------------------------------------------------------
# Fused kernel + pallas_call wrapper
# ----------------------------------------------------------------------------
def make_forward(input_channels, hidden_channels, output_channels, meta):
    cin = input_channels
    hid = hidden_channels
    half = hid // 2
    cout = output_channels
    K1, K2 = meta["K1"], meta["K2"]
    X1H, X2H = meta["X1H"], meta["X2H"]
    offs = meta["offs"]

    def kernel(x_ref, p_ref, out_ref, xh1_ref, c1_ref, xh2_ref, c2_ref):
        T = x_ref.shape[0]
        Pb = x_ref.shape[2]

        # ---- Unpack the parameter slab with static slices (loop-invariant values). ----
        w1 = p_ref[offs["w1"]:offs["w1"] + 4 * hid, 0:K1]        # fused [Wx | b | 0 | Wh]
        w2 = p_ref[offs["w2"]:offs["w2"] + 4 * half, 0:K2]
        wd1 = p_ref[offs["wd1"]:offs["wd1"] + 4 * half, 0:half]  # Wx + Wh (input == hidden)
        wd2 = p_ref[offs["wd2"]:offs["wd2"] + 4 * half, 0:half]
        wout = p_ref[offs["wout"]:offs["wout"] + cout, 0:half]
        bd1 = p_ref[offs["bd1"]:offs["bd1"] + 4 * half, 0:1]
        bd2 = p_ref[offs["bd2"]:offs["bd2"] + 4 * half, 0:1]
        bout = p_ref[offs["bout"]:offs["bout"] + cout, 0:1]
        # Encoder BN (eval) scale/shift: lane-broadcast hoisted out of the time loop.
        ebn_s = jnp.broadcast_to(p_ref[offs["ebn_s"]:offs["ebn_s"] + half, 0:1], (half, Pb))
        ebn_b = jnp.broadcast_to(p_ref[offs["ebn_b"]:offs["ebn_b"] + half, 0:1], (half, Pb))
        dbn_s = p_ref[offs["dbn_s"]:offs["dbn_s"] + half, 0:1]
        dbn_b = p_ref[offs["dbn_b"]:offs["dbn_b"] + half, 0:1]

        # ---- Init recurrent state.  Each grid step owns an independent P block, so the
        #      init runs unconditionally (grid axis is "parallel"). ----
        xh1_ref[...] = jnp.zeros_like(xh1_ref)
        xh1_ref[cin:cin + 1, :] = jnp.ones((1, Pb), jnp.float32)   # ones row -> bias column
        c1_ref[...] = jnp.zeros_like(c1_ref)
        xh2_ref[...] = jnp.zeros_like(xh2_ref)
        xh2_ref[hid:hid + 1, :] = jnp.ones((1, Pb), jnp.float32)
        c2_ref[...] = jnp.zeros_like(c2_ref)

        # ---- Encoder recurrence: fully in-kernel, unrolled. ----
        def enc_step(t, carry):
            # cell 1: z = relu(W1 @ [x_t ; 1 ; 0 ; h1])   (Wx, Wh and bias in one dot)
            xh1_ref[0:cin, :] = x_ref[t]
            z1 = jnp.maximum(
                jnp.dot(w1, xh1_ref[...], preferred_element_type=jnp.float32), 0.0)
            h1, c1n = _gates(z1, c1_ref[...], hid)
            xh1_ref[X1H:X1H + hid, :] = h1
            c1_ref[...] = c1n

            # cell 2 + eval BatchNorm; the *normalized* h2 is the carried hidden state,
            # matching the PyTorch encoder loop.
            xh2_ref[0:hid, :] = h1
            z2 = jnp.maximum(
                jnp.dot(w2, xh2_ref[...], preferred_element_type=jnp.float32), 0.0)
            h2, c2n = _gates(z2, c2_ref[...], half)
            h2 = h2 * ebn_s + ebn_b
            xh2_ref[X2H:X2H + half, :] = h2
            c2_ref[...] = c2n
            return carry

        lax.fori_loop(0, T, enc_step, 0, unroll=True)

        # ---- Decoder (seq_len == 1) + final 1x1 conv (straight-line epilogue). ----
        enc_last = xh2_ref[X2H:X2H + half, :]          # encoder_last_state (post-BN h2)
        c = c2_ref[...]
        z = jnp.maximum(
            jnp.dot(wd1, enc_last, preferred_element_type=jnp.float32) + bd1, 0.0)
        h, c = _gates(z, c, half)
        z = jnp.maximum(
            jnp.dot(wd2, h, preferred_element_type=jnp.float32) + bd2, 0.0)
        h, c = _gates(z, c, half)
        h = h * dbn_s + dbn_b                          # decoder BatchNorm (eval)
        h = h + enc_last                               # residual add at decoder t == 0
        out = jnp.dot(wout, h, preferred_element_type=jnp.float32) + bout
        out_ref[...] = out.astype(out_ref.dtype)

    @jax.jit
    def forward(x, slab):
        # x: (B, T, Cin, H, W) -- PyTorch layout.
        B, T, cin_, H, W = x.shape
        P = B * H * W
        assert cin_ == cin and P % 128 == 0, (cin_, P)

        # (B, T, Cin, H, W) -> (T, Cin, P): channels on sublanes, pixels on lanes.
        x_tcp = jnp.transpose(x, (1, 2, 0, 3, 4)).reshape(T, cin, P).astype(jnp.float32)

        # Split the (fully pixel-independent) P axis into two "parallel" blocks when
        # possible so v7x's two TensorCores each take half; single block otherwise.
        num_blk = 2 if P % 256 == 0 else 1
        p_blk = P // num_blk

        out_cp = pl.pallas_call(
            kernel,
            out_shape=jax.ShapeDtypeStruct((cout, P), jnp.float32),
            grid=(num_blk,),
            in_specs=[
                pl.BlockSpec((T, cin, p_blk), lambda p: (0, 0, p)),
                pl.BlockSpec(slab.shape, lambda p: (0, 0)),   # single resident param slab
            ],
            out_specs=pl.BlockSpec((cout, p_blk), lambda p: (0, p)),
            scratch_shapes=[
                pltpu.VMEM((K1, p_blk), jnp.float32),    # [x ; 1 ; 0 ; h1]
                pltpu.VMEM((hid, p_blk), jnp.float32),   # c1
                pltpu.VMEM((K2, p_blk), jnp.float32),    # [h1 ; 1 ; 0 ; h2]
                pltpu.VMEM((half, p_blk), jnp.float32),  # c2
            ],
            compiler_params=pltpu.CompilerParams(
                dimension_semantics=("parallel",)),
        )(x_tcp, slab)

        out = out_cp.reshape(cout, B, H, W).transpose(1, 0, 2, 3)  # (B, Cout, H, W)
        return out[:, None]                                        # (B, 1, Cout, H, W)

    return forward


# ----------------------------------------------------------------------------
if __name__ == "__main__":
    key = jax.random.PRNGKey(0)
    k_in, k_par = jax.random.split(key)

    # Small shapes consistent with the module (hidden even; P = B*H*W multiple of 128).
    B, T, Cin, H, W = 2, 5, 1, 16, 16
    hidden_channels = 16
    output_channels = 1

    x = jax.random.uniform(k_in, (B, T, Cin, H, W), jnp.float32)
    params = init_params(k_par, Cin, hidden_channels, output_channels)
    slab, meta = pack_params(params, Cin, hidden_channels, output_channels)
    forward = make_forward(Cin, hidden_channels, output_channels, meta)

    out = forward(x, slab)
    jax.block_until_ready(out)

    assert out.shape == (B, 1, output_channels, H, W), out.shape
    assert out.dtype == jnp.float32
    assert bool(jnp.all(jnp.isfinite(out)))
    print("KERNEL_OK")
</pallas_src>

<mosaic_0001>
module attributes {stable_mosaic.version = 11 : i64} {
  func.func @kernel(%arg0: i32, %arg1: memref<5x1x256xf32, #tpu.memory_space<vmem>>, %arg2: memref<272x32xf32, #tpu.memory_space<vmem>>, %arg3: memref<1x256xf32, #tpu.memory_space<vmem>>, %arg4: memref<24x256xf32, #tpu.memory_space<vmem>>, %arg5: memref<16x256xf32, #tpu.memory_space<vmem>>, %arg6: memref<32x256xf32, #tpu.memory_space<vmem>>, %arg7: memref<8x256xf32, #tpu.memory_space<vmem>>) attributes {dimension_semantics = [#tpu.dimension_semantics<parallel>], iteration_bounds = array<i64: 2>, scalar_prefetch = 0 : i64, scratch_operands = 4 : i64, tpu.core_type = #tpu.core_type<tc>, window_params = [{transform_indices = @transform_0, window_bounds = array<i64: 5, 1, 256>}, {pipeline_mode = #tpu.pipeline_mode<synchronous>, transform_indices = @transform_1, window_bounds = array<i64: 272, 32>}, {transform_indices = @transform_2, window_bounds = array<i64: 1, 256>}]} {
    %c0 = arith.constant 0 : index
    %c0_0 = arith.constant 0 : index
    %0 = vector.load %arg2[%c0, %c0_0] : memref<272x32xf32, #tpu.memory_space<vmem>>, vector<64x24xf32>
    %c64 = arith.constant 64 : index
    %c0_1 = arith.constant 0 : index
    %1 = vector.load %arg2[%c64, %c0_1] : memref<272x32xf32, #tpu.memory_space<vmem>>, vector<32x32xf32>
    %c96 = arith.constant 96 : index
    %c0_2 = arith.constant 0 : index
    %2 = vector.load %arg2[%c96, %c0_2] : memref<272x32xf32, #tpu.memory_space<vmem>>, vector<32x8xf32>
    %c128 = arith.constant 128 : index
    %c0_3 = arith.constant 0 : index
    %3 = vector.load %arg2[%c128, %c0_3] : memref<272x32xf32, #tpu.memory_space<vmem>>, vector<32x8xf32>
    %c160 = arith.constant 160 : index
    %c0_4 = arith.constant 0 : index
    %4 = vector.load %arg2[%c160, %c0_4] : memref<272x32xf32, #tpu.memory_space<vmem>>, vector<1x8xf32>
    %c168 = arith.constant 168 : index
    %c0_5 = arith.constant 0 : index
    %5 = vector.load %arg2[%c168, %c0_5] : memref<272x32xf32, #tpu.memory_space<vmem>>, vector<32x1xf32>
    %c200 = arith.constant 200 : index
    %c0_6 = arith.constant 0 : index
    %6 = vector.load %arg2[%c200, %c0_6] : memref<272x32xf32, #tpu.memory_space<vmem>>, vector<32x1xf32>
    %c232 = arith.constant 232 : index
    %c0_7 = arith.constant 0 : index
    %7 = vector.load %arg2[%c232, %c0_7] : memref<272x32xf32, #tpu.memory_space<vmem>>, vector<1x1xf32>
    %c240 = arith.constant 240 : index
    %c0_8 = arith.constant 0 : index
    %8 = vector.load %arg2[%c240, %c0_8] : memref<272x32xf32, #tpu.memory_space<vmem>>, vector<8x1xf32>
    %9 = vector.shape_cast %8 : vector<8x1xf32> to vector<8x1xf32>
    %10 = vector.broadcast %9 : vector<8x1xf32> to vector<8x256xf32>
    %c248 = arith.constant 248 : index
    %c0_9 = arith.constant 0 : index
    %11 = vector.load %arg2[%c248, %c0_9] : memref<272x32xf32, #tpu.memory_space<vmem>>, vector<8x1xf32>
    %12 = vector.shape_cast %11 : vector<8x1xf32> to vector<8x1xf32>
    %13 = vector.broadcast %12 : vector<8x1xf32> to vector<8x256xf32>
    %c256 = arith.constant 256 : index
    %c0_10 = arith.constant 0 : index
    %14 = vector.load %arg2[%c256, %c0_10] : memref<272x32xf32, #tpu.memory_space<vmem>>, vector<8x1xf32>
    %c264 = arith.constant 264 : index
    %c0_11 = arith.constant 0 : index
    %15 = vector.load %arg2[%c264, %c0_11] : memref<272x32xf32, #tpu.memory_space<vmem>>, vector<8x1xf32>
    %cst = arith.constant 0.000000e+00 : f32
    %16 = vector.broadcast %cst : f32 to vector<24x256xf32>
    %c0_12 = arith.constant 0 : index
    %c0_13 = arith.constant 0 : index
    %17 = vector.load %arg4[%c0_12, %c0_13] : memref<24x256xf32, #tpu.memory_space<vmem>>, vector<24x256xf32>
    tpu.vector_store %arg4[%c0_12, %c0_13], %16 {strides = array<i32>} : memref<24x256xf32, #tpu.memory_space<vmem>>, vector<24x256xf32>,
    %cst_14 = arith.constant 1.000000e+00 : f32
    %18 = vector.broadcast %cst_14 : f32 to vector<1x256xf32>
    %c1 = arith.constant 1 : index
    %c0_15 = arith.constant 0 : index
    %19 = vector.load %arg4[%c1, %c0_15] : memref<24x256xf32, #tpu.memory_space<vmem>>, vector<1x256xf32>
    tpu.vector_store %arg4[%c1, %c0_15], %18 {strides = array<i32>} : memref<24x256xf32, #tpu.memory_space<vmem>>, vector<1x256xf32>,
    %cst_16 = arith.constant 0.000000e+00 : f32
    %20 = vector.broadcast %cst_16 : f32 to vector<16x256xf32>
    %c0_17 = arith.constant 0 : index
    %c0_18 = arith.constant 0 : index
    %21 = vector.load %arg5[%c0_17, %c0_18] : memref<16x256xf32, #tpu.memory_space<vmem>>, vector<16x256xf32>
    tpu.vector_store %arg5[%c0_17, %c0_18], %20 {strides = array<i32>} : memref<16x256xf32, #tpu.memory_space<vmem>>, vector<16x256xf32>,
    %cst_19 = arith.constant 0.000000e+00 : f32
    %22 = vector.broadcast %cst_19 : f32 to vector<32x256xf32>
    %c0_20 = arith.constant 0 : index
    %c0_21 = arith.constant 0 : index
    %23 = vector.load %arg6[%c0_20, %c0_21] : memref<32x256xf32, #tpu.memory_space<vmem>>, vector<32x256xf32>
    tpu.vector_store %arg6[%c0_20, %c0_21], %22 {strides = array<i32>} : memref<32x256xf32, #tpu.memory_space<vmem>>, vector<32x256xf32>,
    %cst_22 = arith.constant 1.000000e+00 : f32
    %24 = vector.broadcast %cst_22 : f32 to vector<1x256xf32>
    %c16 = arith.constant 16 : index
    %c0_23 = arith.constant 0 : index
    %25 = vector.load %arg6[%c16, %c0_23] : memref<32x256xf32, #tpu.memory_space<vmem>>, vector<1x256xf32>
    tpu.vector_store %arg6[%c16, %c0_23], %24 {strides = array<i32>} : memref<32x256xf32, #tpu.memory_space<vmem>>, vector<1x256xf32>,
    %cst_24 = arith.constant 0.000000e+00 : f32
    %26 = vector.broadcast %cst_24 : f32 to vector<8x256xf32>
    %c0_25 = arith.constant 0 : index
    %c0_26 = arith.constant 0 : index
    %27 = vector.load %arg7[%c0_25, %c0_26] : memref<8x256xf32, #tpu.memory_space<vmem>>, vector<8x256xf32>
    tpu.vector_store %arg7[%c0_25, %c0_26], %26 {strides = array<i32>} : memref<8x256xf32, #tpu.memory_space<vmem>>, vector<8x256xf32>,
    %c0_i32 = arith.constant 0 : i32
    %28 = arith.index_cast %c0_i32 : i32 to index
    %c0_27 = arith.constant 0 : index
    %c0_28 = arith.constant 0 : index
    %29 = vector.load %arg1[%28, %c0_27, %c0_28] : memref<5x1x256xf32, #tpu.memory_space<vmem>>, vector<1x1x256xf32>
    %30 = vector.shape_cast %29 : vector<1x1x256xf32> to vector<1x256xf32>
    %c0_29 = arith.constant 0 : index
    %c0_30 = arith.constant 0 : index
    %31 = vector.load %arg4[%c0_29, %c0_30] : memref<24x256xf32, #tpu.memory_space<vmem>>, vector<1x256xf32>
    tpu.vector_store %arg4[%c0_29, %c0_30], %30 {strides = array<i32>} : memref<24x256xf32, #tpu.memory_space<vmem>>, vector<1x256xf32>,
    %c0_31 = arith.constant 0 : index
    %c0_32 = arith.constant 0 : index
    %32 = vector.load %arg4[%c0_31, %c0_32] : memref<24x256xf32, #tpu.memory_space<vmem>>, vector<24x256xf32>
    %cst_33 = arith.constant dense<0.000000e+00> : vector<64x256xf32>
    %33 = tpu.matmul %0, %32, %cst_33 {dimension_numbers = #tpu.dot_dimension_numbers<[1], [0], [0], [1], [0, 0, 1, 1], [], []>} : vector<64x24xf32>, vector<24x256xf32>, vector<64x256xf32> -> vector<64x256xf32>
    %cst_34 = arith.constant 0.000000e+00 : f32
    %34 = vector.broadcast %cst_34 : f32 to vector<64x256xf32>
    %35 = arith.maximumf %33, %34 : vector<64x256xf32>
    %c0_35 = arith.constant 0 : index
    %c0_36 = arith.constant 0 : index
    %36 = vector.load %arg5[%c0_35, %c0_36] : memref<16x256xf32, #tpu.memory_space<vmem>>, vector<16x256xf32>
    %37 = vector.extract_strided_slice %35 {offsets = [0, 0], sizes = [16, 256], strides = [1, 1]} : vector<64x256xf32> to vector<16x256xf32>
    %cst_37 = arith.constant 5.000000e-01 : f32
    %38 = vector.broadcast %cst_37 : f32 to vector<16x256xf32>
    %39 = arith.mulf %38, %37 : vector<16x256xf32>
    %40 = math.tanh %39 : vector<16x256xf32>
    %cst_38 = arith.constant 5.000000e-01 : f32
    %41 = vector.broadcast %cst_38 : f32 to vector<16x256xf32>
    %42 = arith.mulf %41, %40 : vector<16x256xf32>
    %cst_39 = arith.constant 5.000000e-01 : f32
    %43 = vector.broadcast %cst_39 : f32 to vector<16x256xf32>
    %44 = arith.addf %42, %43 : vector<16x256xf32>
    %45 = vector.extract_strided_slice %35 {offsets = [16, 0], sizes = [16, 256], strides = [1, 1]} : vector<64x256xf32> to vector<16x256xf32>
    %cst_40 = arith.constant 5.000000e-01 : f32
    %46 = vector.broadcast %cst_40 : f32 to vector<16x256xf32>
    %47 = arith.mulf %46, %45 : vector<16x256xf32>
    %48 = math.tanh %47 : vector<16x256xf32>
    %cst_41 = arith.constant 5.000000e-01 : f32
    %49 = vector.broadcast %cst_41 : f32 to vector<16x256xf32>
    %50 = arith.mulf %49, %48 : vector<16x256xf32>
    %cst_42 = arith.constant 5.000000e-01 : f32
    %51 = vector.broadcast %cst_42 : f32 to vector<16x256xf32>
    %52 = arith.addf %50, %51 : vector<16x256xf32>
    %53 = vector.extract_strided_slice %35 {offsets = [48, 0], sizes = [16, 256], strides = [1, 1]} : vector<64x256xf32> to vector<16x256xf32>
    %54 = math.tanh %53 : vector<16x256xf32>
    %55 = arith.mulf %52, %36 : vector<16x256xf32>
    %56 = arith.mulf %44, %54 : vector<16x256xf32>
    %57 = arith.addf %55, %56 : vector<16x256xf32>
    %58 = vector.extract_strided_slice %35 {offsets = [32, 0], sizes = [16, 256], strides = [1, 1]} : vector<64x256xf32> to vector<16x256xf32>
    %cst_43 = arith.constant 5.000000e-01 : f32
    %59 = vector.broadcast %cst_43 : f32 to vector<16x256xf32>
    %60 = arith.mulf %59, %58 : vector<16x256xf32>
    %61 = math.tanh %60 : vector<16x256xf32>
    %cst_44 = arith.constant 5.000000e-01 : f32
    %62 = vector.broadcast %cst_44 : f32 to vector<16x256xf32>
    %63 = arith.mulf %62, %61 : vector<16x256xf32>
    %cst_45 = arith.constant 5.000000e-01 : f32
    %64 = vector.broadcast %cst_45 : f32 to vector<16x256xf32>
    %65 = arith.addf %63, %64 : vector<16x256xf32>
    %66 = math.tanh %57 : vector<16x256xf32>
    %67 = arith.mulf %65, %66 : vector<16x256xf32>
    %c8 = arith.constant 8 : index
    %c0_46 = arith.constant 0 : index
    %68 = vector.load %arg4[%c8, %c0_46] : memref<24x256xf32, #tpu.memory_space<vmem>>, vector<16x256xf32>
    tpu.vector_store %arg4[%c8, %c0_46], %67 {strides = array<i32>} : memref<24x256xf32, #tpu.memory_space<vmem>>, vector<16x256xf32>,
    %c0_47 = arith.constant 0 : index
    %c0_48 = arith.constant 0 : index
    %69 = vector.load %arg5[%c0_47, %c0_48] : memref<16x256xf32, #tpu.memory_space<vmem>>, vector<16x256xf32>
    tpu.vector_store %arg5[%c0_47, %c0_48], %57 {strides = array<i32>} : memref<16x256xf32, #tpu.memory_space<vmem>>, vector<16x256xf32>,
    %c0_49 = arith.constant 0 : index
    %c0_50 = arith.constant 0 : index
    %70 = vector.load %arg6[%c0_49, %c0_50] : memref<32x256xf32, #tpu.memory_space<vmem>>, vector<16x256xf32>
    tpu.vector_store %arg6[%c0_49, %c0_50], %67 {strides = array<i32>} : memref<32x256xf32, #tpu.memory_space<vmem>>, vector<16x256xf32>,
    %c0_51 = arith.constant 0 : index
    %c0_52 = arith.constant 0 : index
    %71 = vector.load %arg6[%c0_51, %c0_52] : memref<32x256xf32, #tpu.memory_space<vmem>>, vector<32x256xf32>
    %cst_53 = arith.constant dense<0.000000e+00> : vector<32x256xf32>
    %72 = tpu.matmul %1, %71, %cst_53 {dimension_numbers = #tpu.dot_dimension_numbers<[1], [0], [0], [1], [0, 0, 1, 1], [], []>} : vector<32x32xf32>, vector<32x256xf32>, vector<32x256xf32> -> vector<32x256xf32>
    %cst_54 = arith.constant 0.000000e+00 : f32
    %73 = vector.broadcast %cst_54 : f32 to vector<32x256xf32>
    %74 = arith.maximumf %72, %73 : vector<32x256xf32>
    %c0_55 = arith.constant 0 : index
    %c0_56 = arith.constant 0 : index
    %75 = vector.load %arg7[%c0_55, %c0_56] : memref<8x256xf32, #tpu.memory_space<vmem>>, vector<8x256xf32>
    %76 = vector.extract_strided_slice %74 {offsets = [0, 0], sizes = [8, 256], strides = [1, 1]} : vector<32x256xf32> to vector<8x256xf32>
    %cst_57 = arith.constant 5.000000e-01 : f32
    %77 = vector.broadcast %cst_57 : f32 to vector<8x256xf32>
    %78 = arith.mulf %77, %76 : vector<8x256xf32>
    %79 = math.tanh %78 : vector<8x256xf32>
    %cst_58 = arith.constant 5.000000e-01 : f32
    %80 = vector.broadcast %cst_58 : f32 to vector<8x256xf32>
    %81 = arith.mulf %80, %79 : vector<8x256xf32>
    %cst_59 = arith.constant 5.000000e-01 : f32
    %82 = vector.broadcast %cst_59 : f32 to vector<8x256xf32>
    %83 = arith.addf %81, %82 : vector<8x256xf32>
    %84 = vector.extract_strided_slice %74 {offsets = [8, 0], sizes = [8, 256], strides = [1, 1]} : vector<32x256xf32> to vector<8x256xf32>
    %cst_60 = arith.constant 5.000000e-01 : f32
    %85 = vector.broadcast %cst_60 : f32 to vector<8x256xf32>
    %86 = arith.mulf %85, %84 : vector<8x256xf32>
    %87 = math.tanh %86 : vector<8x256xf32>
    %cst_61 = arith.constant 5.000000e-01 : f32
    %88 = vector.broadcast %cst_61 : f32 to vector<8x256xf32>
    %89 = arith.mulf %88, %87 : vector<8x256xf32>
    %cst_62 = arith.constant 5.000000e-01 : f32
    %90 = vector.broadcast %cst_62 : f32 to vector<8x256xf32>
    %91 = arith.addf %89, %90 : vector<8x256xf32>
    %92 = vector.extract_strided_slice %74 {offsets = [24, 0], sizes = [8, 256], strides = [1, 1]} : vector<32x256xf32> to vector<8x256xf32>
    %93 = math.tanh %92 : vector<8x256xf32>
    %94 = arith.mulf %91, %75 : vector<8x256xf32>
    %95 = arith.mulf %83, %93 : vector<8x256xf32>
    %96 = arith.addf %94, %95 : vector<8x256xf32>
    %97 = vector.extract_strided_slice %74 {offsets = [16, 0], sizes = [8, 256], strides = [1, 1]} : vector<32x256xf32> to vector<8x256xf32>
    %cst_63 = arith.constant 5.000000e-01 : f32
    %98 = vector.broadcast %cst_63 : f32 to vector<8x256xf32>
    %99 = arith.mulf %98, %97 : vector<8x256xf32>
    %100 = math.tanh %99 : vector<8x256xf32>
    %cst_64 = arith.constant 5.000000e-01 : f32
    %101 = vector.broadcast %cst_64 : f32 to vector<8x256xf32>
    %102 = arith.mulf %101, %100 : vector<8x256xf32>
    %cst_65 = arith.constant 5.000000e-01 : f32
    %103 = vector.broadcast %cst_65 : f32 to vector<8x256xf32>
    %104 = arith.addf %102, %103 : vector<8x256xf32>
    %105 = math.tanh %96 : vector<8x256xf32>
    %106 = arith.mulf %104, %105 : vector<8x256xf32>
    %107 = arith.mulf %106, %10 : vector<8x256xf32>
    %108 = arith.addf %107, %13 : vector<8x256xf32>
    %c24 = arith.constant 24 : index
    %c0_66 = arith.constant 0 : index
    %109 = vector.load %arg6[%c24, %c0_66] : memref<32x256xf32, #tpu.memory_space<vmem>>, vector<8x256xf32>
    tpu.vector_store %arg6[%c24, %c0_66], %108 {strides = array<i32>} : memref<32x256xf32, #tpu.memory_space<vmem>>, vector<8x256xf32>,
    %c0_67 = arith.constant 0 : index
    %c0_68 = arith.constant 0 : index
    %110 = vector.load %arg7[%c0_67, %c0_68] : memref<8x256xf32, #tpu.memory_space<vmem>>, vector<8x256xf32>
    tpu.vector_store %arg7[%c0_67, %c0_68], %96 {strides = array<i32>} : memref<8x256xf32, #tpu.memory_space<vmem>>, vector<8x256xf32>,
    %c1_i32 = arith.constant 1 : i32
    %111 = arith.index_cast %c1_i32 : i32 to index
    %c0_69 = arith.constant 0 : index
    %c0_70 = arith.constant 0 : index
    %112 = vector.load %arg1[%111, %c0_69, %c0_70] : memref<5x1x256xf32, #tpu.memory_space<vmem>>, vector<1x1x256xf32>
    %113 = vector.shape_cast %112 : vector<1x1x256xf32> to vector<1x256xf32>
    %c0_71 = arith.constant 0 : index
    %c0_72 = arith.constant 0 : index
    %114 = vector.load %arg4[%c0_71, %c0_72] : memref<24x256xf32, #tpu.memory_space<vmem>>, vector<1x256xf32>
    tpu.vector_store %arg4[%c0_71, %c0_72], %113 {strides = array<i32>} : memref<24x256xf32, #tpu.memory_space<vmem>>, vector<1x256xf32>,
    %c0_73 = arith.constant 0 : index
    %c0_74 = arith.constant 0 : index
    %115 = vector.load %arg4[%c0_73, %c0_74] : memref<24x256xf32, #tpu.memory_space<vmem>>, vector<24x256xf32>
    %cst_75 = arith.constant dense<0.000000e+00> : vector<64x256xf32>
    %116 = tpu.matmul %0, %115, %cst_75 {dimension_numbers = #tpu.dot_dimension_numbers<[1], [0], [0], [1], [0, 0, 1, 1], [], []>} : vector<64x24xf32>, vector<24x256xf32>, vector<64x256xf32> -> vector<64x256xf32>
    %cst_76 = arith.constant 0.000000e+00 : f32
    %117 = vector.broadcast %cst_76 : f32 to vector<64x256xf32>
    %118 = arith.maximumf %116, %117 : vector<64x256xf32>
    %c0_77 = arith.constant 0 : index
    %c0_78 = arith.constant 0 : index
    %119 = vector.load %arg5[%c0_77, %c0_78] : memref<16x256xf32, #tpu.memory_space<vmem>>, vector<16x256xf32>
    %120 = vector.extract_strided_slice %118 {offsets = [0, 0], sizes = [16, 256], strides = [1, 1]} : vector<64x256xf32> to vector<16x256xf32>
    %cst_79 = arith.constant 5.000000e-01 : f32
    %121 = vector.broadcast %cst_79 : f32 to vector<16x256xf32>
    %122 = arith.mulf %121, %120 : vector<16x256xf32>
    %123 = math.tanh %122 : vector<16x256xf32>
    %cst_80 = arith.constant 5.000000e-01 : f32
    %124 = vector.broadcast %cst_80 : f32 to vector<16x256xf32>
    %125 = arith.mulf %124, %123 : vector<16x256xf32>
    %cst_81 = arith.constant 5.000000e-01 : f32
    %126 = vector.broadcast %cst_81 : f32 to vector<16x256xf32>
    %127 = arith.addf %125, %126 : vector<16x256xf32>
    %128 = vector.extract_strided_slice %118 {offsets = [16, 0], sizes = [16, 256], strides = [1, 1]} : vector<64x256xf32> to vector<16x256xf32>
    %cst_82 = arith.constant 5.000000e-01 : f32
    %129 = vector.broadcast %cst_82 : f32 to vector<16x256xf32>
    %130 = arith.mulf %129, %128 : vector<16x256xf32>
    %131 = math.tanh %130 : vector<16x256xf32>
    %cst_83 = arith.constant 5.000000e-01 : f32
    %132 = vector.broadcast %cst_83 : f32 to vector<16x256xf32>
    %133 = arith.mulf %132, %131 : vector<16x256xf32>
    %cst_84 = arith.constant 5.000000e-01 : f32
    %134 = vector.broadcast %cst_84 : f32 to vector<16x256xf32>
    %135 = arith.addf %133, %134 : vector<16x256xf32>
    %136 = vector.extract_strided_slice %118 {offsets = [48, 0], sizes = [16, 256], strides = [1, 1]} : vector<64x256xf32> to vector<16x256xf32>
    %137 = math.tanh %136 : vector<16x256xf32>
    %138 = arith.mulf %135, %119 : vector<16x256xf32>
    %139 = arith.mulf %127, %137 : vector<16x256xf32>
    %140 = arith.addf %138, %139 : vector<16x256xf32>
    %141 = vector.extract_strided_slice %118 {offsets = [32, 0], sizes = [16, 256], strides = [1, 1]} : vector<64x256xf32> to vector<16x256xf32>
    %cst_85 = arith.constant 5.000000e-01 : f32
    %142 = vector.broadcast %cst_85 : f32 to vector<16x256xf32>
    %143 = arith.mulf %142, %141 : vector<16x256xf32>
    %144 = math.tanh %143 : vector<16x256xf32>
    %cst_86 = arith.constant 5.000000e-01 : f32
    %145 = vector.broadcast %cst_86 : f32 to vector<16x256xf32>
    %146 = arith.mulf %145, %144 : vector<16x256xf32>
    %cst_87 = arith.constant 5.000000e-01 : f32
    %147 = vector.broadcast %cst_87 : f32 to vector<16x256xf32>
    %148 = arith.addf %146, %147 : vector<16x256xf32>
    %149 = math.tanh %140 : vector<16x256xf32>
    %150 = arith.mulf %148, %149 : vector<16x256xf32>
    %c8_88 = arith.constant 8 : index
    %c0_89 = arith.constant 0 : index
    %151 = vector.load %arg4[%c8_88, %c0_89] : memref<24x256xf32, #tpu.memory_space<vmem>>, vector<16x256xf32>
    tpu.vector_store %arg4[%c8_88, %c0_89], %150 {strides = array<i32>} : memref<24x256xf32, #tpu.memory_space<vmem>>, vector<16x256xf32>,
    %c0_90 = arith.constant 0 : index
    %c0_91 = arith.constant 0 : index
    %152 = vector.load %arg5[%c0_90, %c0_91] : memref<16x256xf32, #tpu.memory_space<vmem>>, vector<16x256xf32>
    tpu.vector_store %arg5[%c0_90, %c0_91], %140 {strides = array<i32>} : memref<16x256xf32, #tpu.memory_space<vmem>>, vector<16x256xf32>,
    %c0_92 = arith.constant 0 : index
    %c0_93 = arith.constant 0 : index
    %153 = vector.load %arg6[%c0_92, %c0_93] : memref<32x256xf32, #tpu.memory_space<vmem>>, vector<16x256xf32>
    tpu.vector_store %arg6[%c0_92, %c0_93], %150 {strides = array<i32>} : memref<32x256xf32, #tpu.memory_space<vmem>>, vector<16x256xf32>,
    %c0_94 = arith.constant 0 : index
    %c0_95 = arith.constant 0 : index
    %154 = vector.load %arg6[%c0_94, %c0_95] : memref<32x256xf32, #tpu.memory_space<vmem>>, vector<32x256xf32>
    %cst_96 = arith.constant dense<0.000000e+00> : vector<32x256xf32>
    %155 = tpu.matmul %1, %154, %cst_96 {dimension_numbers = #tpu.dot_dimension_numbers<[1], [0], [0], [1], [0, 0, 1, 1], [], []>} : vector<32x32xf32>, vector<32x256xf32>, vector<32x256xf32> -> vector<32x256xf32>
    %cst_97 = arith.constant 0.000000e+00 : f32
    %156 = vector.broadcast %cst_97 : f32 to vector<32x256xf32>
    %157 = arith.maximumf %155, %156 : vector<32x256xf32>
    %c0_98 = arith.constant 0 : index
    %c0_99 = arith.constant 0 : index
    %158 = vector.load %arg7[%c0_98, %c0_99] : memref<8x256xf32, #tpu.memory_space<vmem>>, vector<8x256xf32>
    %159 = vector.extract_strided_slice %157 {offsets = [0, 0], sizes = [8, 256], strides = [1, 1]} : vector<32x256xf32> to vector<8x256xf32>
    %cst_100 = arith.constant 5.000000e-01 : f32
    %160 = vector.broadcast %cst_100 : f32 to vector<8x256xf32>
    %161 = arith.mulf %160, %159 : vector<8x256xf32>
    %162 = math.tanh %161 : vector<8x256xf32>
    %cst_101 = arith.constant 5.000000e-01 : f32
    %163 = vector.broadcast %cst_101 : f32 to vector<8x256xf32>
    %164 = arith.mulf %163, %162 : vector<8x256xf32>
    %cst_102 = arith.constant 5.000000e-01 : f32
    %165 = vector.broadcast %cst_102 : f32 to vector<8x256xf32>
    %166 = arith.addf %164, %165 : vector<8x256xf32>
    %167 = vector.extract_strided_slice %157 {offsets = [8, 0], sizes = [8, 256], strides = [1, 1]} : vector<32x256xf32> to vector<8x256xf32>
    %cst_103 = arith.constant 5.000000e-01 : f32
    %168 = vector.broadcast %cst_103 : f32 to vector<8x256xf32>
    %169 = arith.mulf %168, %167 : vector<8x256xf32>
    %170 = math.tanh %169 : vector<8x256xf32>
    %cst_104 = arith.constant 5.000000e-01 : f32
    %171 = vector.broadcast %cst_104 : f32 to vector<8x256xf32>
    %172 = arith.mulf %171, %170 : vector<8x256xf32>
    %cst_105 = arith.constant 5.000000e-01 : f32
    %173 = vector.broadcast %cst_105 : f32 to vector<8x256xf32>
    %174 = arith.addf %172, %173 : vector<8x256xf32>
    %175 = vector.extract_strided_slice %157 {offsets = [24, 0], sizes = [8, 256], strides = [1, 1]} : vector<32x256xf32> to vector<8x256xf32>
    %176 = math.tanh %175 : vector<8x256xf32>
    %177 = arith.mulf %174, %158 : vector<8x256xf32>
    %178 = arith.mulf %166, %176 : vector<8x256xf32>
    %179 = arith.addf %177, %178 : vector<8x256xf32>
    %180 = vector.extract_strided_slice %157 {offsets = [16, 0], sizes = [8, 256], strides = [1, 1]} : vector<32x256xf32> to vector<8x256xf32>
    %cst_106 = arith.constant 5.000000e-01 : f32
    %181 = vector.broadcast %cst_106 : f32 to vector<8x256xf32>
    %182 = arith.mulf %181, %180 : vector<8x256xf32>
    %183 = math.tanh %182 : vector<8x256xf32>
    %cst_107 = arith.constant 5.000000e-01 : f32
    %184 = vector.broadcast %cst_107 : f32 to vector<8x256xf32>
    %185 = arith.mulf %184, %183 : vector<8x256xf32>
    %cst_108 = arith.constant 5.000000e-01 : f32
    %186 = vector.broadcast %cst_108 : f32 to vector<8x256xf32>
    %187 = arith.addf %185, %186 : vector<8x256xf32>
    %188 = math.tanh %179 : vector<8x256xf32>
    %189 = arith.mulf %187, %188 : vector<8x256xf32>
    %190 = arith.mulf %189, %10 : vector<8x256xf32>
    %191 = arith.addf %190, %13 : vector<8x256xf32>
    %c24_109 = arith.constant 24 : index
    %c0_110 = arith.constant 0 : index
    %192 = vector.load %arg6[%c24_109, %c0_110] : memref<32x256xf32, #tpu.memory_space<vmem>>, vector<8x256xf32>
    tpu.vector_store %arg6[%c24_109, %c0_110], %191 {strides = array<i32>} : memref<32x256xf32, #tpu.memory_space<vmem>>, vector<8x256xf32>,
    %c0_111 = arith.constant 0 : index
    %c0_112 = arith.constant 0 : index
    %193 = vector.load %arg7[%c0_111, %c0_112] : memref<8x256xf32, #tpu.memory_space<vmem>>, vector<8x256xf32>
    tpu.vector_store %arg7[%c0_111, %c0_112], %179 {strides = array<i32>} : memref<8x256xf32, #tpu.memory_space<vmem>>, vector<8x256xf32>,
    %c2_i32 = arith.constant 2 : i32
    %194 = arith.index_cast %c2_i32 : i32 to index
    %c0_113 = arith.constant 0 : index
    %c0_114 = arith.constant 0 : index
    %195 = vector.load %arg1[%194, %c0_113, %c0_114] : memref<5x1x256xf32, #tpu.memory_space<vmem>>, vector<1x1x256xf32>
    %196 = vector.shape_cast %195 : vector<1x1x256xf32> to vector<1x256xf32>
    %c0_115 = arith.constant 0 : index
    %c0_116 = arith.constant 0 : index
    %197 = vector.load %arg4[%c0_115, %c0_116] : memref<24x256xf32, #tpu.memory_space<vmem>>, vector<1x256xf32>
    tpu.vector_store %arg4[%c0_115, %c0_116], %196 {strides = array<i32>} : memref<24x256xf32, #tpu.memory_space<vmem>>, vector<1x256xf32>,
    %c0_117 = arith.constant 0 : index
    %c0_118 = arith.constant 0 : index
    %198 = vector.load %arg4[%c0_117, %c0_118] : memref<24x256xf32, #tpu.memory_space<vmem>>, vector<24x256xf32>
    %cst_119 = arith.constant dense<0.000000e+00> : vector<64x256xf32>
    %199 = tpu.matmul %0, %198, %cst_119 {dimension_numbers = #tpu.dot_dimension_numbers<[1], [0], [0], [1], [0, 0, 1, 1], [], []>} : vector<64x24xf32>, vector<24x256xf32>, vector<64x256xf32> -> vector<64x256xf32>
    %cst_120 = arith.constant 0.000000e+00 : f32
    %200 = vector.broadcast %cst_120 : f32 to vector<64x256xf32>
    %201 = arith.maximumf %199, %200 : vector<64x256xf32>
    %c0_121 = arith.constant 0 : index
    %c0_122 = arith.constant 0 : index
    %202 = vector.load %arg5[%c0_121, %c0_122] : memref<16x256xf32, #tpu.memory_space<vmem>>, vector<16x256xf32>
    %203 = vector.extract_strided_slice %201 {offsets = [0, 0], sizes = [16, 256], strides = [1, 1]} : vector<64x256xf32> to vector<16x256xf32>
    %cst_123 = arith.constant 5.000000e-01 : f32
    %204 = vector.broadcast %cst_123 : f32 to vector<16x256xf32>
    %205 = arith.mulf %204, %203 : vector<16x256xf32>
    %206 = math.tanh %205 : vector<16x256xf32>
    %cst_124 = arith.constant 5.000000e-01 : f32
    %207 = vector.broadcast %cst_124 : f32 to vector<16x256xf32>
    %208 = arith.mulf %207, %206 : vector<16x256xf32>
    %cst_125 = arith.constant 5.000000e-01 : f32
    %209 = vector.broadcast %cst_125 : f32 to vector<16x256xf32>
    %210 = arith.addf %208, %209 : vector<16x256xf32>
    %211 = vector.extract_strided_slice %201 {offsets = [16, 0], sizes = [16, 256], strides = [1, 1]} : vector<64x256xf32> to vector<16x256xf32>
    %cst_126 = arith.constant 5.000000e-01 : f32
    %212 = vector.broadcast %cst_126 : f32 to vector<16x256xf32>
    %213 = arith.mulf %212, %211 : vector<16x256xf32>
    %214 = math.tanh %213 : vector<16x256xf32>
    %cst_127 = arith.constant 5.000000e-01 : f32
    %215 = vector.broadcast %cst_127 : f32 to vector<16x256xf32>
    %216 = arith.mulf %215, %214 : vector<16x256xf32>
    %cst_128 = arith.constant 5.000000e-01 : f32
    %217 = vector.broadcast %cst_128 : f32 to vector<16x256xf32>
    %218 = arith.addf %216, %217 : vector<16x256xf32>
    %219 = vector.extract_strided_slice %201 {offsets = [48, 0], sizes = [16, 256], strides = [1, 1]} : vector<64x256xf32> to vector<16x256xf32>
    %220 = math.tanh %219 : vector<16x256xf32>
    %221 = arith.mulf %218, %202 : vector<16x256xf32>
    %222 = arith.mulf %210, %220 : vector<16x256xf32>
    %223 = arith.addf %221, %222 : vector<16x256xf32>
    %224 = vector.extract_strided_slice %201 {offsets = [32, 0], sizes = [16, 256], strides = [1, 1]} : vector<64x256xf32> to vector<16x256xf32>
    %cst_129 = arith.constant 5.000000e-01 : f32
    %225 = vector.broadcast %cst_129 : f32 to vector<16x256xf32>
    %226 = arith.mulf %225, %224 : vector<16x256xf32>
    %227 = math.tanh %226 : vector<16x256xf32>
    %cst_130 = arith.constant 5.000000e-01 : f32
    %228 = vector.broadcast %cst_130 : f32 to vector<16x256xf32>
    %229 = arith.mulf %228, %227 : vector<16x256xf32>
    %cst_131 = arith.constant 5.000000e-01 : f32
    %230 = vector.broadcast %cst_131 : f32 to vector<16x256xf32>
    %231 = arith.addf %229, %230 : vector<16x256xf32>
    %232 = math.tanh %223 : vector<16x256xf32>
    %233 = arith.mulf %231, %232 : vector<16x256xf32>
    %c8_132 = arith.constant 8 : index
    %c0_133 = arith.constant 0 : index
    %234 = vector.load %arg4[%c8_132, %c0_133] : memref<24x256xf32, #tpu.memory_space<vmem>>, vector<16x256xf32>
    tpu.vector_store %arg4[%c8_132, %c0_133], %233 {strides = array<i32>} : memref<24x256xf32, #tpu.memory_space<vmem>>, vector<16x256xf32>,
    %c0_134 = arith.constant 0 : index
    %c0_135 = arith.constant 0 : index
    %235 = vector.load %arg5[%c0_134, %c0_135] : memref<16x256xf32, #tpu.memory_space<vmem>>, vector<16x256xf32>
    tpu.vector_store %arg5[%c0_134, %c0_135], %223 {strides = array<i32>} : memref<16x256xf32, #tpu.memory_space<vmem>>, vector<16x256xf32>,
    %c0_136 = arith.constant 0 : index
    %c0_137 = arith.constant 0 : index
    %236 = vector.load %arg6[%c0_136, %c0_137] : memref<32x256xf32, #tpu.memory_space<vmem>>, vector<16x256xf32>
    tpu.vector_store %arg6[%c0_136, %c0_137], %233 {strides = array<i32>} : memref<32x256xf32, #tpu.memory_space<vmem>>, vector<16x256xf32>,
    %c0_138 = arith.constant 0 : index
    %c0_139 = arith.constant 0 : index
    %237 = vector.load %arg6[%c0_138, %c0_139] : memref<32x256xf32, #tpu.memory_space<vmem>>, vector<32x256xf32>
    %cst_140 = arith.constant dense<0.000000e+00> : vector<32x256xf32>
    %238 = tpu.matmul %1, %237, %cst_140 {dimension_numbers = #tpu.dot_dimension_numbers<[1], [0], [0], [1], [0, 0, 1, 1], [], []>} : vector<32x32xf32>, vector<32x256xf32>, vector<32x256xf32> -> vector<32x256xf32>
    %cst_141 = arith.constant 0.000000e+00 : f32
    %239 = vector.broadcast %cst_141 : f32 to vector<32x256xf32>
    %240 = arith.maximumf %238, %239 : vector<32x256xf32>
    %c0_142 = arith.constant 0 : index
    %c0_143 = arith.constant 0 : index
    %241 = vector.load %arg7[%c0_142, %c0_143] : memref<8x256xf32, #tpu.memory_space<vmem>>, vector<8x256xf32>
    %242 = vector.extract_strided_slice %240 {offsets = [0, 0], sizes = [8, 256], strides = [1, 1]} : vector<32x256xf32> to vector<8x256xf32>
    %cst_144 = arith.constant 5.000000e-01 : f32
    %243 = vector.broadcast %cst_144 : f32 to vector<8x256xf32>
    %244 = arith.mulf %243, %242 : vector<8x256xf32>
    %245 = math.tanh %244 : vector<8x256xf32>
    %cst_145 = arith.constant 5.000000e-01 : f32
    %246 = vector.broadcast %cst_145 : f32 to vector<8x256xf32>
    %247 = arith.mulf %246, %245 : vector<8x256xf32>
    %cst_146 = arith.constant 5.000000e-01 : f32
    %248 = vector.broadcast %cst_146 : f32 to vector<8x256xf32>
    %249 = arith.addf %247, %248 : vector<8x256xf32>
    %250 = vector.extract_strided_slice %240 {offsets = [8, 0], sizes = [8, 256], strides = [1, 1]} : vector<32x256xf32> to vector<8x256xf32>
    %cst_147 = arith.constant 5.000000e-01 : f32
    %251 = vector.broadcast %cst_147 : f32 to vector<8x256xf32>
    %252 = arith.mulf %251, %250 : vector<8x256xf32>
    %253 = math.tanh %252 : vector<8x256xf32>
    %cst_148 = arith.constant 5.000000e-01 : f32
    %254 = vector.broadcast %cst_148 : f32 to vector<8x256xf32>
    %255 = arith.mulf %254, %253 : vector<8x256xf32>
    %cst_149 = arith.constant 5.000000e-01 : f32
    %256 = vector.broadcast %cst_149 : f32 to vector<8x256xf32>
    %257 = arith.addf %255, %256 : vector<8x256xf32>
    %258 = vector.extract_strided_slice %240 {offsets = [24, 0], sizes = [8, 256], strides = [1, 1]} : vector<32x256xf32> to vector<8x256xf32>
    %259 = math.tanh %258 : vector<8x256xf32>
    %260 = arith.mulf %257, %241 : vector<8x256xf32>
    %261 = arith.mulf %249, %259 : vector<8x256xf32>
    %262 = arith.addf %260, %261 : vector<8x256xf32>
    %263 = vector.extract_strided_slice %240 {offsets = [16, 0], sizes = [8, 256], strides = [1, 1]} : vector<32x256xf32> to vector<8x256xf32>
    %cst_150 = arith.constant 5.000000e-01 : f32
    %264 = vector.broadcast %cst_150 : f32 to vector<8x256xf32>
    %265 = arith.mulf %264, %263 : vector<8x256xf32>
    %266 = math.tanh %265 : vector<8x256xf32>
    %cst_151 = arith.constant 5.000000e-01 : f32
    %267 = vector.broadcast %cst_151 : f32 to vector<8x256xf32>
    %268 = arith.mulf %267, %266 : vector<8x256xf32>
    %cst_152 = arith.constant 5.000000e-01 : f32
    %269 = vector.broadcast %cst_152 : f32 to vector<8x256xf32>
    %270 = arith.addf %268, %269 : vector<8x256xf32>
    %271 = math.tanh %262 : vector<8x256xf32>
    %272 = arith.mulf %270, %271 : vector<8x256xf32>
    %273 = arith.mulf %272, %10 : vector<8x256xf32>
    %274 = arith.addf %273, %13 : vector<8x256xf32>
    %c24_153 = arith.constant 24 : index
    %c0_154 = arith.constant 0 : index
    %275 = vector.load %arg6[%c24_153, %c0_154] : memref<32x256xf32, #tpu.memory_space<vmem>>, vector<8x256xf32>
    tpu.vector_store %arg6[%c24_153, %c0_154], %274 {strides = array<i32>} : memref<32x256xf32, #tpu.memory_space<vmem>>, vector<8x256xf32>,
    %c0_155 = arith.constant 0 : index
    %c0_156 = arith.constant 0 : index
    %276 = vector.load %arg7[%c0_155, %c0_156] : memref<8x256xf32, #tpu.memory_space<vmem>>, vector<8x256xf32>
    tpu.vector_store %arg7[%c0_155, %c0_156], %262 {strides = array<i32>} : memref<8x256xf32, #tpu.memory_space<vmem>>, vector<8x256xf32>,
    %c3_i32 = arith.constant 3 : i32
    %277 = arith.index_cast %c3_i32 : i32 to index
    %c0_157 = arith.constant 0 : index
    %c0_158 = arith.constant 0 : index
    %278 = vector.load %arg1[%277, %c0_157, %c0_158] : memref<5x1x256xf32, #tpu.memory_space<vmem>>, vector<1x1x256xf32>
    %279 = vector.shape_cast %278 : vector<1x1x256xf32> to vector<1x256xf32>
    %c0_159 = arith.constant 0 : index
    %c0_160 = arith.constant 0 : index
    %280 = vector.load %arg4[%c0_159, %c0_160] : memref<24x256xf32, #tpu.memory_space<vmem>>, vector<1x256xf32>
    tpu.vector_store %arg4[%c0_159, %c0_160], %279 {strides = array<i32>} : memref<24x256xf32, #tpu.memory_space<vmem>>, vector<1x256xf32>,
    %c0_161 = arith.constant 0 : index
    %c0_162 = arith.constant 0 : index
    %281 = vector.load %arg4[%c0_161, %c0_162] : memref<24x256xf32, #tpu.memory_space<vmem>>, vector<24x256xf32>
    %cst_163 = arith.constant dense<0.000000e+00> : vector<64x256xf32>
    %282 = tpu.matmul %0, %281, %cst_163 {dimension_numbers = #tpu.dot_dimension_numbers<[1], [0], [0], [1], [0, 0, 1, 1], [], []>} : vector<64x24xf32>, vector<24x256xf32>, vector<64x256xf32> -> vector<64x256xf32>
    %cst_164 = arith.constant 0.000000e+00 : f32
    %283 = vector.broadcast %cst_164 : f32 to vector<64x256xf32>
    %284 = arith.maximumf %282, %283 : vector<64x256xf32>
    %c0_165 = arith.constant 0 : index
    %c0_166 = arith.constant 0 : index
    %285 = vector.load %arg5[%c0_165, %c0_166] : memref<16x256xf32, #tpu.memory_space<vmem>>, vector<16x256xf32>
    %286 = vector.extract_strided_slice %284 {offsets = [0, 0], sizes = [16, 256], strides = [1, 1]} : vector<64x256xf32> to vector<16x256xf32>
    %cst_167 = arith.constant 5.000000e-01 : f32
    %287 = vector.broadcast %cst_167 : f32 to vector<16x256xf32>
    %288 = arith.mulf %287, %286 : vector<16x256xf32>
    %289 = math.tanh %288 : vector<16x256xf32>
    %cst_168 = arith.constant 5.000000e-01 : f32
    %290 = vector.broadcast %cst_168 : f32 to vector<16x256xf32>
    %291 = arith.mulf %290, %289 : vector<16x256xf32>
    %cst_169 = arith.constant 5.000000e-01 : f32
    %292 = vector.broadcast %cst_169 : f32 to vector<16x256xf32>
    %293 = arith.addf %291, %292 : vector<16x256xf32>
    %294 = vector.extract_strided_slice %284 {offsets = [16, 0], sizes = [16, 256], strides = [1, 1]} : vector<64x256xf32> to vector<16x256xf32>
    %cst_170 = arith.constant 5.000000e-01 : f32
    %295 = vector.broadcast %cst_170 : f32 to vector<16x256xf32>
    %296 = arith.mulf %295, %294 : vector<16x256xf32>
    %297 = math.tanh %296 : vector<16x256xf32>
    %cst_171 = arith.constant 5.000000e-01 : f32
    %298 = vector.broadcast %cst_171 : f32 to vector<16x256xf32>
    %299 = arith.mulf %298, %297 : vector<16x256xf32>
    %cst_172 = arith.constant 5.000000e-01 : f32
    %300 = vector.broadcast %cst_172 : f32 to vector<16x256xf32>
    %301 = arith.addf %299, %300 : vector<16x256xf32>
    %302 = vector.extract_strided_slice %284 {offsets = [48, 0], sizes = [16, 256], strides = [1, 1]} : vector<64x256xf32> to vector<16x256xf32>
    %303 = math.tanh %302 : vector<16x256xf32>
    %304 = arith.mulf %301, %285 : vector<16x256xf32>
    %305 = arith.mulf %293, %303 : vector<16x256xf32>
    %306 = arith.addf %304, %305 : vector<16x256xf32>
    %307 = vector.extract_strided_slice %284 {offsets = [32, 0], sizes = [16, 256], strides = [1, 1]} : vector<64x256xf32> to vector<16x256xf32>
    %cst_173 = arith.constant 5.000000e-01 : f32
    %308 = vector.broadcast %cst_173 : f32 to vector<16x256xf32>
    %309 = arith.mulf %308, %307 : vector<16x256xf32>
    %310 = math.tanh %309 : vector<16x256xf32>
    %cst_174 = arith.constant 5.000000e-01 : f32
    %311 = vector.broadcast %cst_174 : f32 to vector<16x256xf32>
    %312 = arith.mulf %311, %310 : vector<16x256xf32>
    %cst_175 = arith.constant 5.000000e-01 : f32
    %313 = vector.broadcast %cst_175 : f32 to vector<16x256xf32>
    %314 = arith.addf %312, %313 : vector<16x256xf32>
    %315 = math.tanh %306 : vector<16x256xf32>
    %316 = arith.mulf %314, %315 : vector<16x256xf32>
    %c8_176 = arith.constant 8 : index
    %c0_177 = arith.constant 0 : index
    %317 = vector.load %arg4[%c8_176, %c0_177] : memref<24x256xf32, #tpu.memory_space<vmem>>, vector<16x256xf32>
    tpu.vector_store %arg4[%c8_176, %c0_177], %316 {strides = array<i32>} : memref<24x256xf32, #tpu.memory_space<vmem>>, vector<16x256xf32>,
    %c0_178 = arith.constant 0 : index
    %c0_179 = arith.constant 0 : index
    %318 = vector.load %arg5[%c0_178, %c0_179] : memref<16x256xf32, #tpu.memory_space<vmem>>, vector<16x256xf32>
    tpu.vector_store %arg5[%c0_178, %c0_179], %306 {strides = array<i32>} : memref<16x256xf32, #tpu.memory_space<vmem>>, vector<16x256xf32>,
    %c0_180 = arith.constant 0 : index
    %c0_181 = arith.constant 0 : index
    %319 = vector.load %arg6[%c0_180, %c0_181] : memref<32x256xf32, #tpu.memory_space<vmem>>, vector<16x256xf32>
    tpu.vector_store %arg6[%c0_180, %c0_181], %316 {strides = array<i32>} : memref<32x256xf32, #tpu.memory_space<vmem>>, vector<16x256xf32>,
    %c0_182 = arith.constant 0 : index
    %c0_183 = arith.constant 0 : index
    %320 = vector.load %arg6[%c0_182, %c0_183] : memref<32x256xf32, #tpu.memory_space<vmem>>, vector<32x256xf32>
    %cst_184 = arith.constant dense<0.000000e+00> : vector<32x256xf32>
    %321 = tpu.matmul %1, %320, %cst_184 {dimension_numbers = #tpu.dot_dimension_numbers<[1], [0], [0], [1], [0, 0, 1, 1], [], []>} : vector<32x32xf32>, vector<32x256xf32>, vector<32x256xf32> -> vector<32x256xf32>
    %cst_185 = arith.constant 0.000000e+00 : f32
    %322 = vector.broadcast %cst_185 : f32 to vector<32x256xf32>
    %323 = arith.maximumf %321, %322 : vector<32x256xf32>
    %c0_186 = arith.constant 0 : index
    %c0_187 = arith.constant 0 : index
    %324 = vector.load %arg7[%c0_186, %c0_187] : memref<8x256xf32, #tpu.memory_space<vmem>>, vector<8x256xf32>
    %325 = vector.extract_strided_slice %323 {offsets = [0, 0], sizes = [8, 256], strides = [1, 1]} : vector<32x256xf32> to vector<8x256xf32>
    %cst_188 = arith.constant 5.000000e-01 : f32
    %326 = vector.broadcast %cst_188 : f32 to vector<8x256xf32>
    %327 = arith.mulf %326, %325 : vector<8x256xf32>
    %328 = math.tanh %327 : vector<8x256xf32>
    %cst_189 = arith.constant 5.000000e-01 : f32
    %329 = vector.broadcast %cst_189 : f32 to vector<8x256xf32>
    %330 = arith.mulf %329, %328 : vector<8x256xf32>
    %cst_190 = arith.constant 5.000000e-01 : f32
    %331 = vector.broadcast %cst_190 : f32 to vector<8x256xf32>
    %332 = arith.addf %330, %331 : vector<8x256xf32>
    %333 = vector.extract_strided_slice %323 {offsets = [8, 0], sizes = [8, 256], strides = [1, 1]} : vector<32x256xf32> to vector<8x256xf32>
    %cst_191 = arith.constant 5.000000e-01 : f32
    %334 = vector.broadcast %cst_191 : f32 to vector<8x256xf32>
    %335 = arith.mulf %334, %333 : vector<8x256xf32>
    %336 = math.tanh %335 : vector<8x256xf32>
    %cst_192 = arith.constant 5.000000e-01 : f32
    %337 = vector.broadcast %cst_192 : f32 to vector<8x256xf32>
    %338 = arith.mulf %337, %336 : vector<8x256xf32>
    %cst_193 = arith.constant 5.000000e-01 : f32
    %339 = vector.broadcast %cst_193 : f32 to vector<8x256xf32>
    %340 = arith.addf %338, %339 : vector<8x256xf32>
    %341 = vector.extract_strided_slice %323 {offsets = [24, 0], sizes = [8, 256], strides = [1, 1]} : vector<32x256xf32> to vector<8x256xf32>
    %342 = math.tanh %341 : vector<8x256xf32>
    %343 = arith.mulf %340, %324 : vector<8x256xf32>
    %344 = arith.mulf %332, %342 : vector<8x256xf32>
    %345 = arith.addf %343, %344 : vector<8x256xf32>
    %346 = vector.extract_strided_slice %323 {offsets = [16, 0], sizes = [8, 256], strides = [1, 1]} : vector<32x256xf32> to vector<8x256xf32>
    %cst_194 = arith.constant 5.000000e-01 : f32
    %347 = vector.broadcast %cst_194 : f32 to vector<8x256xf32>
    %348 = arith.mulf %347, %346 : vector<8x256xf32>
    %349 = math.tanh %348 : vector<8x256xf32>
    %cst_195 = arith.constant 5.000000e-01 : f32
    %350 = vector.broadcast %cst_195 : f32 to vector<8x256xf32>
    %351 = arith.mulf %350, %349 : vector<8x256xf32>
    %cst_196 = arith.constant 5.000000e-01 : f32
    %352 = vector.broadcast %cst_196 : f32 to vector<8x256xf32>
    %353 = arith.addf %351, %352 : vector<8x256xf32>
    %354 = math.tanh %345 : vector<8x256xf32>
    %355 = arith.mulf %353, %354 : vector<8x256xf32>
    %356 = arith.mulf %355, %10 : vector<8x256xf32>
    %357 = arith.addf %356, %13 : vector<8x256xf32>
    %c24_197 = arith.constant 24 : index
    %c0_198 = arith.constant 0 : index
    %358 = vector.load %arg6[%c24_197, %c0_198] : memref<32x256xf32, #tpu.memory_space<vmem>>, vector<8x256xf32>
    tpu.vector_store %arg6[%c24_197, %c0_198], %357 {strides = array<i32>} : memref<32x256xf32, #tpu.memory_space<vmem>>, vector<8x256xf32>,
    %c0_199 = arith.constant 0 : index
    %c0_200 = arith.constant 0 : index
    %359 = vector.load %arg7[%c0_199, %c0_200] : memref<8x256xf32, #tpu.memory_space<vmem>>, vector<8x256xf32>
    tpu.vector_store %arg7[%c0_199, %c0_200], %345 {strides = array<i32>} : memref<8x256xf32, #tpu.memory_space<vmem>>, vector<8x256xf32>,
    %c4_i32 = arith.constant 4 : i32
    %360 = arith.index_cast %c4_i32 : i32 to index
    %c0_201 = arith.constant 0 : index
    %c0_202 = arith.constant 0 : index
    %361 = vector.load %arg1[%360, %c0_201, %c0_202] : memref<5x1x256xf32, #tpu.memory_space<vmem>>, vector<1x1x256xf32>
    %362 = vector.shape_cast %361 : vector<1x1x256xf32> to vector<1x256xf32>
    %c0_203 = arith.constant 0 : index
    %c0_204 = arith.constant 0 : index
    %363 = vector.load %arg4[%c0_203, %c0_204] : memref<24x256xf32, #tpu.memory_space<vmem>>, vector<1x256xf32>
    tpu.vector_store %arg4[%c0_203, %c0_204], %362 {strides = array<i32>} : memref<24x256xf32, #tpu.memory_space<vmem>>, vector<1x256xf32>,
    %c0_205 = arith.constant 0 : index
    %c0_206 = arith.constant 0 : index
    %364 = vector.load %arg4[%c0_205, %c0_206] : memref<24x256xf32, #tpu.memory_space<vmem>>, vector<24x256xf32>
    %cst_207 = arith.constant dense<0.000000e+00> : vector<64x256xf32>
    %365 = tpu.matmul %0, %364, %cst_207 {dimension_numbers = #tpu.dot_dimension_numbers<[1], [0], [0], [1], [0, 0, 1, 1], [], []>} : vector<64x24xf32>, vector<24x256xf32>, vector<64x256xf32> -> vector<64x256xf32>
    %cst_208 = arith.constant 0.000000e+00 : f32
    %366 = vector.broadcast %cst_208 : f32 to vector<64x256xf32>
    %367 = arith.maximumf %365, %366 : vector<64x256xf32>
    %c0_209 = arith.constant 0 : index
    %c0_210 = arith.constant 0 : index
    %368 = vector.load %arg5[%c0_209, %c0_210] : memref<16x256xf32, #tpu.memory_space<vmem>>, vector<16x256xf32>
    %369 = vector.extract_strided_slice %367 {offsets = [0, 0], sizes = [16, 256], strides = [1, 1]} : vector<64x256xf32> to vector<16x256xf32>
    %cst_211 = arith.constant 5.000000e-01 : f32
    %370 = vector.broadcast %cst_211 : f32 to vector<16x256xf32>
    %371 = arith.mulf %370, %369 : vector<16x256xf32>
    %372 = math.tanh %371 : vector<16x256xf32>
    %cst_212 = arith.constant 5.000000e-01 : f32
    %373 = vector.broadcast %cst_212 : f32 to vector<16x256xf32>
    %374 = arith.mulf %373, %372 : vector<16x256xf32>
    %cst_213 = arith.constant 5.000000e-01 : f32
    %375 = vector.broadcast %cst_213 : f32 to vector<16x256xf32>
    %376 = arith.addf %374, %375 : vector<16x256xf32>
    %377 = vector.extract_strided_slice %367 {offsets = [16, 0], sizes = [16, 256], strides = [1, 1]} : vector<64x256xf32> to vector<16x256xf32>
    %cst_214 = arith.constant 5.000000e-01 : f32
    %378 = vector.broadcast %cst_214 : f32 to vector<16x256xf32>
    %379 = arith.mulf %378, %377 : vector<16x256xf32>
    %380 = math.tanh %379 : vector<16x256xf32>
    %cst_215 = arith.constant 5.000000e-01 : f32
    %381 = vector.broadcast %cst_215 : f32 to vector<16x256xf32>
    %382 = arith.mulf %381, %380 : vector<16x256xf32>
    %cst_216 = arith.constant 5.000000e-01 : f32
    %383 = vector.broadcast %cst_216 : f32 to vector<16x256xf32>
    %384 = arith.addf %382, %383 : vector<16x256xf32>
    %385 = vector.extract_strided_slice %367 {offsets = [48, 0], sizes = [16, 256], strides = [1, 1]} : vector<64x256xf32> to vector<16x256xf32>
    %386 = math.tanh %385 : vector<16x256xf32>
    %387 = arith.mulf %384, %368 : vector<16x256xf32>
    %388 = arith.mulf %376, %386 : vector<16x256xf32>
    %389 = arith.addf %387, %388 : vector<16x256xf32>
    %390 = vector.extract_strided_slice %367 {offsets = [32, 0], sizes = [16, 256], strides = [1, 1]} : vector<64x256xf32> to vector<16x256xf32>
    %cst_217 = arith.constant 5.000000e-01 : f32
    %391 = vector.broadcast %cst_217 : f32 to vector<16x256xf32>
    %392 = arith.mulf %391, %390 : vector<16x256xf32>
    %393 = math.tanh %392 : vector<16x256xf32>
    %cst_218 = arith.constant 5.000000e-01 : f32
    %394 = vector.broadcast %cst_218 : f32 to vector<16x256xf32>
    %395 = arith.mulf %394, %393 : vector<16x256xf32>
    %cst_219 = arith.constant 5.000000e-01 : f32
    %396 = vector.broadcast %cst_219 : f32 to vector<16x256xf32>
    %397 = arith.addf %395, %396 : vector<16x256xf32>
    %398 = math.tanh %389 : vector<16x256xf32>
    %399 = arith.mulf %397, %398 : vector<16x256xf32>
    %c8_220 = arith.constant 8 : index
    %c0_221 = arith.constant 0 : index
    %400 = vector.load %arg4[%c8_220, %c0_221] : memref<24x256xf32, #tpu.memory_space<vmem>>, vector<16x256xf32>
    tpu.vector_store %arg4[%c8_220, %c0_221], %399 {strides = array<i32>} : memref<24x256xf32, #tpu.memory_space<vmem>>, vector<16x256xf32>,
    %c0_222 = arith.constant 0 : index
    %c0_223 = arith.constant 0 : index
    %401 = vector.load %arg5[%c0_222, %c0_223] : memref<16x256xf32, #tpu.memory_space<vmem>>, vector<16x256xf32>
    tpu.vector_store %arg5[%c0_222, %c0_223], %389 {strides = array<i32>} : memref<16x256xf32, #tpu.memory_space<vmem>>, vector<16x256xf32>,
    %c0_224 = arith.constant 0 : index
    %c0_225 = arith.constant 0 : index
    %402 = vector.load %arg6[%c0_224, %c0_225] : memref<32x256xf32, #tpu.memory_space<vmem>>, vector<16x256xf32>
    tpu.vector_store %arg6[%c0_224, %c0_225], %399 {strides = array<i32>} : memref<32x256xf32, #tpu.memory_space<vmem>>, vector<16x256xf32>,
    %c0_226 = arith.constant 0 : index
    %c0_227 = arith.constant 0 : index
    %403 = vector.load %arg6[%c0_226, %c0_227] : memref<32x256xf32, #tpu.memory_space<vmem>>, vector<32x256xf32>
    %cst_228 = arith.constant dense<0.000000e+00> : vector<32x256xf32>
    %404 = tpu.matmul %1, %403, %cst_228 {dimension_numbers = #tpu.dot_dimension_numbers<[1], [0], [0], [1], [0, 0, 1, 1], [], []>} : vector<32x32xf32>, vector<32x256xf32>, vector<32x256xf32> -> vector<32x256xf32>
    %cst_229 = arith.constant 0.000000e+00 : f32
    %405 = vector.broadcast %cst_229 : f32 to vector<32x256xf32>
    %406 = arith.maximumf %404, %405 : vector<32x256xf32>
    %c0_230 = arith.constant 0 : index
    %c0_231 = arith.constant 0 : index
    %407 = vector.load %arg7[%c0_230, %c0_231] : memref<8x256xf32, #tpu.memory_space<vmem>>, vector<8x256xf32>
    %408 = vector.extract_strided_slice %406 {offsets = [0, 0], sizes = [8, 256], strides = [1, 1]} : vector<32x256xf32> to vector<8x256xf32>
    %cst_232 = arith.constant 5.000000e-01 : f32
    %409 = vector.broadcast %cst_232 : f32 to vector<8x256xf32>
    %410 = arith.mulf %409, %408 : vector<8x256xf32>
    %411 = math.tanh %410 : vector<8x256xf32>
    %cst_233 = arith.constant 5.000000e-01 : f32
    %412 = vector.broadcast %cst_233 : f32 to vector<8x256xf32>
    %413 = arith.mulf %412, %411 : vector<8x256xf32>
    %cst_234 = arith.constant 5.000000e-01 : f32
    %414 = vector.broadcast %cst_234 : f32 to vector<8x256xf32>
    %415 = arith.addf %413, %414 : vector<8x256xf32>
    %416 = vector.extract_strided_slice %406 {offsets = [8, 0], sizes = [8, 256], strides = [1, 1]} : vector<32x256xf32> to vector<8x256xf32>
    %cst_235 = arith.constant 5.000000e-01 : f32
    %417 = vector.broadcast %cst_235 : f32 to vector<8x256xf32>
    %418 = arith.mulf %417, %416 : vector<8x256xf32>
    %419 = math.tanh %418 : vector<8x256xf32>
    %cst_236 = arith.constant 5.000000e-01 : f32
    %420 = vector.broadcast %cst_236 : f32 to vector<8x256xf32>
    %421 = arith.mulf %420, %419 : vector<8x256xf32>
    %cst_237 = arith.constant 5.000000e-01 : f32
    %422 = vector.broadcast %cst_237 : f32 to vector<8x256xf32>
    %423 = arith.addf %421, %422 : vector<8x256xf32>
    %424 = vector.extract_strided_slice %406 {offsets = [24, 0], sizes = [8, 256], strides = [1, 1]} : vector<32x256xf32> to vector<8x256xf32>
    %425 = math.tanh %424 : vector<8x256xf32>
    %426 = arith.mulf %423, %407 : vector<8x256xf32>
    %427 = arith.mulf %415, %425 : vector<8x256xf32>
    %428 = arith.addf %426, %427 : vector<8x256xf32>
    %429 = vector.extract_strided_slice %406 {offsets = [16, 0], sizes = [8, 256], strides = [1, 1]} : vector<32x256xf32> to vector<8x256xf32>
    %cst_238 = arith.constant 5.000000e-01 : f32
    %430 = vector.broadcast %cst_238 : f32 to vector<8x256xf32>
    %431 = arith.mulf %430, %429 : vector<8x256xf32>
    %432 = math.tanh %431 : vector<8x256xf32>
    %cst_239 = arith.constant 5.000000e-01 : f32
    %433 = vector.broadcast %cst_239 : f32 to vector<8x256xf32>
    %434 = arith.mulf %433, %432 : vector<8x256xf32>
    %cst_240 = arith.constant 5.000000e-01 : f32
    %435 = vector.broadcast %cst_240 : f32 to vector<8x256xf32>
    %436 = arith.addf %434, %435 : vector<8x256xf32>
    %437 = math.tanh %428 : vector<8x256xf32>
    %438 = arith.mulf %436, %437 : vector<8x256xf32>
    %439 = arith.mulf %438, %10 : vector<8x256xf32>
    %440 = arith.addf %439, %13 : vector<8x256xf32>
    %c24_241 = arith.constant 24 : index
    %c0_242 = arith.constant 0 : index
    %441 = vector.load %arg6[%c24_241, %c0_242] : memref<32x256xf32, #tpu.memory_space<vmem>>, vector<8x256xf32>
    tpu.vector_store %arg6[%c24_241, %c0_242], %440 {strides = array<i32>} : memref<32x256xf32, #tpu.memory_space<vmem>>, vector<8x256xf32>,
    %c0_243 = arith.constant 0 : index
    %c0_244 = arith.constant 0 : index
    %442 = vector.load %arg7[%c0_243, %c0_244] : memref<8x256xf32, #tpu.memory_space<vmem>>, vector<8x256xf32>
    tpu.vector_store %arg7[%c0_243, %c0_244], %428 {strides = array<i32>} : memref<8x256xf32, #tpu.memory_space<vmem>>, vector<8x256xf32>,
    %c5_i32 = arith.constant 5 : i32
    %c24_245 = arith.constant 24 : index
    %c0_246 = arith.constant 0 : index
    %443 = vector.load %arg6[%c24_245, %c0_246] : memref<32x256xf32, #tpu.memory_space<vmem>>, vector<8x256xf32>
    %c0_247 = arith.constant 0 : index
    %c0_248 = arith.constant 0 : index
    %444 = vector.load %arg7[%c0_247, %c0_248] : memref<8x256xf32, #tpu.memory_space<vmem>>, vector<8x256xf32>
    %cst_249 = arith.constant dense<0.000000e+00> : vector<32x256xf32>
    %445 = tpu.matmul %2, %443, %cst_249 {dimension_numbers = #tpu.dot_dimension_numbers<[1], [0], [0], [1], [0, 0, 1, 1], [], []>} : vector<32x8xf32>, vector<8x256xf32>, vector<32x256xf32> -> vector<32x256xf32>
    %446 = vector.broadcast %5 : vector<32x1xf32> to vector<32x256xf32>
    %447 = arith.addf %445, %446 : vector<32x256xf32>
    %cst_250 = arith.constant 0.000000e+00 : f32
    %448 = vector.broadcast %cst_250 : f32 to vector<32x256xf32>
    %449 = arith.maximumf %447, %448 : vector<32x256xf32>
    %450 = vector.extract_strided_slice %449 {offsets = [0, 0], sizes = [8, 256], strides = [1, 1]} : vector<32x256xf32> to vector<8x256xf32>
    %cst_251 = arith.constant 5.000000e-01 : f32
    %451 = vector.broadcast %cst_251 : f32 to vector<8x256xf32>
    %452 = arith.mulf %451, %450 : vector<8x256xf32>
    %453 = math.tanh %452 : vector<8x256xf32>
    %cst_252 = arith.constant 5.000000e-01 : f32
    %454 = vector.broadcast %cst_252 : f32 to vector<8x256xf32>
    %455 = arith.mulf %454, %453 : vector<8x256xf32>
    %cst_253 = arith.constant 5.000000e-01 : f32
    %456 = vector.broadcast %cst_253 : f32 to vector<8x256xf32>
    %457 = arith.addf %455, %456 : vector<8x256xf32>
    %458 = vector.extract_strided_slice %449 {offsets = [8, 0], sizes = [8, 256], strides = [1, 1]} : vector<32x256xf32> to vector<8x256xf32>
    %cst_254 = arith.constant 5.000000e-01 : f32
    %459 = vector.broadcast %cst_254 : f32 to vector<8x256xf32>
    %460 = arith.mulf %459, %458 : vector<8x256xf32>
    %461 = math.tanh %460 : vector<8x256xf32>
    %cst_255 = arith.constant 5.000000e-01 : f32
    %462 = vector.broadcast %cst_255 : f32 to vector<8x256xf32>
    %463 = arith.mulf %462, %461 : vector<8x256xf32>
    %cst_256 = arith.constant 5.000000e-01 : f32
    %464 = vector.broadcast %cst_256 : f32 to vector<8x256xf32>
    %465 = arith.addf %463, %464 : vector<8x256xf32>
    %466 = vector.extract_strided_slice %449 {offsets = [24, 0], sizes = [8, 256], strides = [1, 1]} : vector<32x256xf32> to vector<8x256xf32>
    %467 = math.tanh %466 : vector<8x256xf32>
    %468 = arith.mulf %465, %444 : vector<8x256xf32>
    %469 = arith.mulf %457, %467 : vector<8x256xf32>
    %470 = arith.addf %468, %469 : vector<8x256xf32>
    %471 = vector.extract_strided_slice %449 {offsets = [16, 0], sizes = [8, 256], strides = [1, 1]} : vector<32x256xf32> to vector<8x256xf32>
    %cst_257 = arith.constant 5.000000e-01 : f32
    %472 = vector.broadcast %cst_257 : f32 to vector<8x256xf32>
    %473 = arith.mulf %472, %471 : vector<8x256xf32>
    %474 = math.tanh %473 : vector<8x256xf32>
    %cst_258 = arith.constant 5.000000e-01 : f32
    %475 = vector.broadcast %cst_258 : f32 to vector<8x256xf32>
    %476 = arith.mulf %475, %474 : vector<8x256xf32>
    %cst_259 = arith.constant 5.000000e-01 : f32
    %477 = vector.broadcast %cst_259 : f32 to vector<8x256xf32>
    %478 = arith.addf %476, %477 : vector<8x256xf32>
    %479 = math.tanh %470 : vector<8x256xf32>
    %480 = arith.mulf %478, %479 : vector<8x256xf32>
    %cst_260 = arith.constant dense<0.000000e+00> : vector<32x256xf32>
    %481 = tpu.matmul %3, %480, %cst_260 {dimension_numbers = #tpu.dot_dimension_numbers<[1], [0], [0], [1], [0, 0, 1, 1], [], []>} : vector<32x8xf32>, vector<8x256xf32>, vector<32x256xf32> -> vector<32x256xf32>
    %482 = vector.broadcast %6 : vector<32x1xf32> to vector<32x256xf32>
    %483 = arith.addf %481, %482 : vector<32x256xf32>
    %cst_261 = arith.constant 0.000000e+00 : f32
    %484 = vector.broadcast %cst_261 : f32 to vector<32x256xf32>
    %485 = arith.maximumf %483, %484 : vector<32x256xf32>
    %486 = vector.extract_strided_slice %485 {offsets = [0, 0], sizes = [8, 256], strides = [1, 1]} : vector<32x256xf32> to vector<8x256xf32>
    %cst_262 = arith.constant 5.000000e-01 : f32
    %487 = vector.broadcast %cst_262 : f32 to vector<8x256xf32>
    %488 = arith.mulf %487, %486 : vector<8x256xf32>
    %489 = math.tanh %488 : vector<8x256xf32>
    %cst_263 = arith.constant 5.000000e-01 : f32
    %490 = vector.broadcast %cst_263 : f32 to vector<8x256xf32>
    %491 = arith.mulf %490, %489 : vector<8x256xf32>
    %cst_264 = arith.constant 5.000000e-01 : f32
    %492 = vector.broadcast %cst_264 : f32 to vector<8x256xf32>
    %493 = arith.addf %491, %492 : vector<8x256xf32>
    %494 = vector.extract_strided_slice %485 {offsets = [8, 0], sizes = [8, 256], strides = [1, 1]} : vector<32x256xf32> to vector<8x256xf32>
    %cst_265 = arith.constant 5.000000e-01 : f32
    %495 = vector.broadcast %cst_265 : f32 to vector<8x256xf32>
    %496 = arith.mulf %495, %494 : vector<8x256xf32>
    %497 = math.tanh %496 : vector<8x256xf32>
    %cst_266 = arith.constant 5.000000e-01 : f32
    %498 = vector.broadcast %cst_266 : f32 to vector<8x256xf32>
    %499 = arith.mulf %498, %497 : vector<8x256xf32>
    %cst_267 = arith.constant 5.000000e-01 : f32
    %500 = vector.broadcast %cst_267 : f32 to vector<8x256xf32>
    %501 = arith.addf %499, %500 : vector<8x256xf32>
    %502 = vector.extract_strided_slice %485 {offsets = [24, 0], sizes = [8, 256], strides = [1, 1]} : vector<32x256xf32> to vector<8x256xf32>
    %503 = math.tanh %502 : vector<8x256xf32>
    %504 = arith.mulf %501, %470 : vector<8x256xf32>
    %505 = arith.mulf %493, %503 : vector<8x256xf32>
    %506 = arith.addf %504, %505 : vector<8x256xf32>
    %507 = vector.extract_strided_slice %485 {offsets = [16, 0], sizes = [8, 256], strides = [1, 1]} : vector<32x256xf32> to vector<8x256xf32>
    %cst_268 = arith.constant 5.000000e-01 : f32
    %508 = vector.broadcast %cst_268 : f32 to vector<8x256xf32>
    %509 = arith.mulf %508, %507 : vector<8x256xf32>
    %510 = math.tanh %509 : vector<8x256xf32>
    %cst_269 = arith.constant 5.000000e-01 : f32
    %511 = vector.broadcast %cst_269 : f32 to vector<8x256xf32>
    %512 = arith.mulf %511, %510 : vector<8x256xf32>
    %cst_270 = arith.constant 5.000000e-01 : f32
    %513 = vector.broadcast %cst_270 : f32 to vector<8x256xf32>
    %514 = arith.addf %512, %513 : vector<8x256xf32>
    %515 = math.tanh %506 : vector<8x256xf32>
    %516 = arith.mulf %514, %515 : vector<8x256xf32>
    %517 = vector.broadcast %14 : vector<8x1xf32> to vector<8x256xf32>
    %518 = arith.mulf %516, %517 : vector<8x256xf32>
    %519 = vector.broadcast %15 : vector<8x1xf32> to vector<8x256xf32>
    %520 = arith.addf %518, %519 : vector<8x256xf32>
    %521 = arith.addf %520, %443 : vector<8x256xf32>
    %cst_271 = arith.constant dense<0.000000e+00> : vector<1x256xf32>
    %522 = tpu.matmul %4, %521, %cst_271 {dimension_numbers = #tpu.dot_dimension_numbers<[1], [0], [0], [1], [0, 0, 1, 1], [], []>} : vector<1x8xf32>, vector<8x256xf32>, vector<1x256xf32> -> vector<1x256xf32>
    %523 = vector.broadcast %7 : vector<1x1xf32> to vector<1x256xf32>
    %524 = arith.addf %522, %523 : vector<1x256xf32>
    %c0_272 = arith.constant 0 : index
    %c0_273 = arith.constant 0 : index
    %525 = vector.load %arg3[%c0_272, %c0_273] : memref<1x256xf32, #tpu.memory_space<vmem>>, vector<1x256xf32>
    tpu.vector_store %arg3[%c0_272, %c0_273], %524 {strides = array<i32>} : memref<1x256xf32, #tpu.memory_space<vmem>>, vector<1x256xf32>,
    return
  }
  func.func @transform_0(%arg0: i32) -> (i32, i32, i32) {
    %c0_i32 = arith.constant 0 : i32
    %c0_i32_0 = arith.constant 0 : i32
    %c0_i32_1 = arith.constant 0 : i32
    return %c0_i32, %c0_i32_0, %arg0 : i32, i32, i32
  }
  func.func @transform_1(%arg0: i32) -> (i32, i32) {
    %c0_i32 = arith.constant 0 : i32
    %c0_i32_0 = arith.constant 0 : i32
    %c0_i32_1 = arith.constant 0 : i32
    return %c0_i32, %c0_i32_0 : i32, i32
  }
  func.func @transform_2(%arg0: i32) -> (i32, i32) {
    %c0_i32 = arith.constant 0 : i32
    %c0_i32_0 = arith.constant 0 : i32
    return %c0_i32, %arg0 : i32, i32
  }
}

</mosaic_0001>

<bundles_post_ra>
// kernel: forward.1
= control target key start
LH: loop header
LB: loop body
LE: loop exit
PB: predicated region body
PF: predicated region fallthrough
CT: control target
= control target key end

     0   :  { %s3222_s9 = smov 0   ;;  %s3224_s10 = smov 0   ;;  %s3884_s0 = inlined_call_operand.vmem [shape: f32[5,1,512], index: 0, kind: input, shape index: {}]   ;;  %s3885_s1 = inlined_call_operand.vmem [shape: f32[272,32], index: 1, kind: input, shape index: {}]   ;;  %s3886_s2 = inlined_call_operand.vmem [shape: f32[1,512], index: 2, kind: output, shape index: {}]  }
   0x1   :  { %s3226_s11 = smov 0  }
   0x2 LB: > { %s2709_s12 = sadd.s32 4294967295, %s3201_s11   ;;  %s3239_s13 = sadd.s32 1, %s3201_s11   ;;  %s3201_s11 = sphi %s3226_s11, %s3891_s11   ;;  %s3197_s10 = sphi %s3224_s10, %s3890_s10   ;;  %s3193_s9 = sphi %s3222_s9, %s3889_s9  }
   0x3   : > { %s16_s14 = ssub.s32 %s3201_s11, %s3239_s13  ;;  %s19_s15 = sadd.s32 1, %s3197_s10 }
   0x4   : > { %p17_p0 = scmp.eq.s32.totalorder %s16_s14, 0  ;;  %p26_p1 = scmp.ne.s32.totalorder %s3197_s10, %s3193_s9 }
   0x5   : > { %p27_p2 = scmp.eq.s32.totalorder %s3201_s11, 0  ;;  %p2712_p4 = scmp.ge.s32.totalorder %s3201_s11, 2 }
   0x6   : > { %s3248_s16 = scalar_select %p17_p0, %s3197_s10, %s19_s15  }
   0x7   : > { %p28_p3 = por %p27_p2, %p26_p1  ;;  %102 = sbr.rel (%p2712_p4) target bundleno = 20 (0x14), region = 20 }
   0xc   : > { %105 = sbr.rel (!%p28_p3) target bundleno = 20 (0x14), region = 24  ;;  %s107_s17 = sand.u32 (%p28_p3), 1, %s3197_s10  }
   0xd   : > { %s2713_s18 = sshll.u32 (%p28_p3), %s3201_s11, 1  ;;  %s2793_s19 = smul.u32 (%p28_p3), 10, %s107_s17 }
   0xe   : > { %s111_s22 = scalar_lea.vmem (%p28_p3), %s3884_s0, %s2713_s18 }
   0xf   : > { %v128_v0 = vld [vmem:[%s111_s22] sm:$0x3] (%p28_p3)  ;;  %v130_v1 = vld [vmem:[%s111_s22 + $0x4] sm:$0x3] (%p28_p3)  ;;  %v132_v2 = vld [vmem:[%s111_s22 + $0x8] sm:$0x3] (%p28_p3) }
  0x10   : > { %v134_v3 = vld [vmem:[%s111_s22 + $0xc] sm:$0x3] (%p28_p3)  ;;  %v136_v4 = vld [vmem:[%s111_s22 + $0x10] sm:$0x3] (%p28_p3)  ;;  %s109_s23 = scalar_lea.vmem (%p28_p3), [#allocation6], %s2793_s19 }
  0x11   : > { %129 = vst [vmem:[%s109_s23] sm:$0x3] %v128_v0  ;;  %131 = vst [vmem:[%s109_s23 + $0x2] sm:$0x3] %v130_v1 }
  0x12   : > { %133 = vst [vmem:[%s109_s23 + $0x4] sm:$0x3] %v132_v2  ;;  %135 = vst [vmem:[%s109_s23 + $0x6] sm:$0x3] %v134_v3 }
  0x13   : > { %137 = vst [vmem:[%s109_s23 + $0x8] sm:$0x3] %v136_v4 }
  0x14 PF: > { %p2714_p5 = scmp.ge.s32.totalorder %s3201_s11, 1  ;;  %p170_p6 = scmp.lt.s32.totalorder %s3201_s11, 3 }
  0x16   : > { %p171_p7 = pnand %p2714_p5, %p170_p6 }
  0x17   : > { %s177_s24 = sand.u32 (!%p171_p7), 1, %s3193_s9   ;;  %s2715_s28 = sshll.u32 (!%p171_p7), %s2709_s12, 1 }
  0x18   : > { %174 = sbr.rel (%p171_p7) target bundleno = 2373 (0x945), region = 65  ;;  %p199_p8 = scmp.lt.s32.totalorder (!%p171_p7), %s2715_s28, 3 }
  0x19   : > { %s2794_s25 = smul.u32 (!%p171_p7), 10, %s177_s24 }
  0x1b   : > { %s3279_s26 = scalar_lea.vmem (!%p171_p7), [#allocation6], %s2794_s25 }
  0x1d   : > { %v253_v5 = vlaneseq  ;;  %v3203_v6 = vmov 0.0   ;;  %v3204_v8 = vmov 1.0   ;;  %v277_v9 = vld [vmem:[%s3279_s26] sm:$0x3]  ;;  %v2728_v10 = vld [vmem:[%s3279_s26 + $0x2] sm:$0x3] }
  0x1e   : > { %337 = vmatprep.subr.mxu0 %v3203_v6  ;;  %247 = vst [vmem:[#allocation2] sm:$0xff] %v3203_v6  ;;  %248 = vst [vmem:[#allocation2 + $0x8] sm:$0xff] %v3203_v6  ;;  %375 = vmatprep.mubr.f32.mxu0 %v3203_v6  ;;  %v3289_v13 = vld [vmem:[%s3885_s1] sm:$0xff]  ;;  %vm286_vm1 = vcmask 195584   ;;  %v3299_v14 = vld [vmem:[%s3885_s1 + $0x8] sm:$0xff]  ;;  %v3205_v27 = vmov 0  }
  0x1f   : > { %268 = vst [vmem:[#allocation4 + $0x20] sm:$0xff] %v3203_v6  ;;  %269 = vst [vmem:[#allocation4 + $0x28] sm:$0xff] %v3203_v6  ;;  %338 = vmatpush1.msra.mxu0 %v3203_v6  ;;  %vm3267_vm0 = vcmp.lt.s32.totalorder %v253_v5, 256  ;;  %573 = vmatprep.subr.mxu1 %v3203_v6  ;;  %v3307_v15 = vld [vmem:[%s3885_s1 + $0x10] sm:$0xff]  ;;  %v3315_v16 = vld [vmem:[%s3885_s1 + $0x18] sm:$0xff]  ;;  %vm536_vm2 = vcmask 261120  }
  0x20   : > { %339 = vmatprep.subr.mxu0 %v3203_v6  ;;  %258 = vst.msk [vmem:[#allocation2 + $0x1] ss:$8 sm:$0x3] %vm3267_vm0, %v3204_v8  ;;  %273 = vst.msk [vmem:[#allocation4 + $0x20] ss:$8 sm:$0x3] %vm3267_vm0, %v3204_v8  ;;  %574 = vmatpush1.msra.mxu1 %v3203_v6 }
  0x21   : > { %340 = vmatpush1.msra.mxu0 %v3203_v6  ;;  %613 = vmatprep.mubr.f32.mxu1 %v3203_v6  ;;  %278 = vst.msk [vmem:[#allocation2] ss:$8 sm:$0x3] %vm3267_vm0, %v277_v9  ;;  %v3323_v17 = vld [vmem:[%s3885_s1 + $0x20] sm:$0xff]  ;;  %v3331_v18 = vld [vmem:[%s3885_s1 + $0x28] sm:$0xff]  ;;  %v3339_v19 = vld [vmem:[%s3885_s1 + $0x30] sm:$0xff] }
  0x22   : > { %v3347_v20 = vld [vmem:[%s3885_s1 + $0x38] sm:$0xff]  ;;  %v233_v26 = vld [vmem:[%s3885_s1 + $0xf0] sm:$0xff]  ;;  %2823 = vset.pattern.permute.xlu0 %v3205_v27  ;;  %2824 = vset.pattern.permute.xlu1 %v3205_v27  ;;  %v227_v29 = vld [vmem:[%s3885_s1 + $0xc0] sm:$0xff]  ;;  %vm2228_vm3 = vcmask 64512   ;;  %s3893_s28 = smov (!%p199_p8, %s2715_s28), 3 }
  0x23   : > { %v2741_v25 = vld [vmem:[%s3279_s26 + $0x4] sm:$0x3]  ;;  %236 = vperm.xlu0 %2823, %v233_v26   ;;  %v228_v30 = vld [vmem:[%s3885_s1 + $0xc8] sm:$0xff]  ;;  %v231_v33 = vld [vmem:[%s3885_s1 + $0xe0] sm:$0xff]  ;;  %s201_s3 = scalar_lea.vmem %s3886_s2, %s3893_s28 }
  0x24   : > { %v239_v28 = vld [vmem:[%s3885_s1 + $0xf8] sm:$0xff]  ;;  %v245_v36 = vld [vmem:[%s3885_s1 + $0x100] sm:$0xff]  ;;  %v232_v41 = vld [vmem:[%s3885_s1 + $0xe8] sm:$0x1] }
  0x27   : > { %v3352_v21 = vld [vmem:[#allocation4 + $0x28] sm:$0xff]  ;;  %v3355_v22 = vld [vmem:[#allocation4 + $0x20] sm:$0xff]  ;;  %242 = vperm.xlu0 %2823, %v239_v28  }
  0x28   : > { %v281_v11 = vld [vmem:[#allocation2 + $0x8] sm:$0xff]  ;;  %v280_v12 = vld [vmem:[#allocation2] sm:$0xff]  ;;  %575 = vmatprep.subr.mxu1 %v3352_v21 }
  0x29   : > { %341 = vmatprep.subr.mxu0 %v281_v11  ;;  %694 = vst.msk [vmem:[#allocation2] ss:$8 sm:$0x3] %vm3267_vm0, %v2728_v10  ;;  %576 = vmatpush1.msra.mxu1 %v3355_v22 }
  0x2a   : > { %342 = vmatpush1.msra.mxu0 %v280_v12 }
  0x2b   : > { %2716 = vmatmul.mubr.msk.f32.vlgmr.msra.gmra.mxu0 %vm286_vm1, %v3289_v13  ;;  %2225 = vperm.xlu0 %2823, %v227_v29  }
  0x2c   : > { %381 = vmatprep.mubr.f32.mxu0 %v3203_v6 }
  0x2f   : > { %2717 = vmatmul.mubr.msk.f32.gmra.mxu0 %vm286_vm1, %v3299_v14  ;;  %2376 = vperm.xlu0 %2823, %v228_v30  }
  0x30   : > { %387 = vmatprep.mubr.f32.mxu0 %v3203_v6  ;;  %v3358_v23 = vld [vmem:[#allocation2 + $0x8] sm:$0xff]  ;;  %v3360_v24 = vld [vmem:[#allocation2] sm:$0xff] }
  0x31   : > { %1072 = vst.msk [vmem:[#allocation2] ss:$8 sm:$0x3] %vm3267_vm0, %v2741_v25 }
  0x33   : > { %2718 = vmatmul.mubr.msk.f32.gmra.mxu0 %vm286_vm1, %v3307_v15  ;;  %2391 = vperm.xlu0 %2823, %v231_v33  }
  0x34   : > { %393 = vmatprep.mubr.f32.mxu0 %v3203_v6 }
  0x37   : > { %2719 = vmatmul.mubr.msk.f32.gmra.mxu0 %vm286_vm1, %v3315_v16  ;;  %2541 = vperm.xlu0 %2823, %v245_v36  }
  0x38   : > { %399 = vmatprep.mubr.f32.mxu0 %v3203_v6 }
  0x3b   : > { %2720 = vmatmul.mubr.msk.f32.gmra.mxu0 %vm286_vm1, %v3323_v17  ;;  %2557 = vperm.xlu0 %2823, %v232_v41  }
  0x3c   : > { %405 = vmatprep.mubr.f32.mxu0 %v3203_v6 }
  0x3f   : > { %2721 = vmatmul.mubr.msk.f32.gmra.mxu0 %vm286_vm1, %v3331_v18 }
  0x40   : > { %411 = vmatprep.mubr.f32.mxu0 %v3203_v6 }
  0x43   : > { %2722 = vmatmul.mubr.msk.f32.gmra.mxu0 %vm286_vm1, %v3339_v19 }
  0x44   : > { %417 = vmatprep.mubr.f32.mxu0 %v3203_v6 }
  0x47   : > { %2723 = vmatmul.mubr.msk.f32.gmra.mxu0 %vm286_vm1, %v3347_v20 }
  0x48   : > { %991 = vmatprep.mubr.f32.mxu0 %v3203_v6 }
  0xeb   : > { %v377_v31 = vpop.f32.mrf.mxu0 }
  0xec   : > { %v424_v38 = vmax.f32 %v377_v31, 0.0 }
  0xed   : > { %v379_v32 = vpop.f32.mrf.mxu0 }
  0xee   : > { %v425_v40 = vmax.f32 %v379_v32, 0.0  ;;  %v444_v45 = vmul.f32 0.5, %v424_v38 }
  0xef   : > { %v383_v34 = vpop.f32.mrf.mxu0 }
  0xf0   : > { %v426_v46 = vmax.f32 %v383_v34, 0.0  ;;  %v445_v48 = vmul.f32 0.5, %v425_v40  ;;  %2825 = vtanh.f32 %v444_v45 }
  0xf1   : > { %v385_v35 = vpop.f32.mrf.mxu0 }
  0xf2   : > { %v446_v54 = vmul.f32 0.5, %v426_v46  ;;  %v427_v55 = vmax.f32 %v385_v35, 0.0  ;;  %2827 = vtanh.f32 %v445_v48 }
  0xf3   : > { %v389_v37 = vpop.f32.mrf.mxu0 }
  0xf4   : > { %v428_v49 = vmax.f32 %v389_v37, 0.0  ;;  %v447_v60 = vmul.f32 0.5, %v427_v55 }
  0xf5   : > { %v391_v39 = vpop.f32.mrf.mxu0 }
  0xf6   : > { %v429_v42 = vmax.f32 %v391_v39, 0.0  ;;  %v460_v57 = vmul.f32 0.5, %v428_v49 }
  0xf7   : > { %v395_v43 = vpop.f32.mrf.mxu0 }
  0xf8   : > { %v430_v44 = vmax.f32 %v395_v43, 0.0  ;;  %v461_v50 = vmul.f32 0.5, %v429_v42 }
  0xf9   : > { %v397_v47 = vpop.f32.mrf.mxu0 }
  0xfa   : > { %v431_v51 = vmax.f32 %v397_v47, 0.0  ;;  %v462_v53 = vmul.f32 0.5, %v430_v44  ;;  %2829 = vtanh.f32 %v461_v50 }
  0xfb   : > { %v401_v52 = vpop.f32.mrf.mxu0 }
  0xfc   : > { %v463_v58 = vmul.f32 0.5, %v431_v51  ;;  %2831 = vtanh.f32 %v462_v53  ;;  %v432_v33 = vmax.f32 %v401_v52, 0.0 }
  0xfd   : > { %v403_v56 = vpop.f32.mrf.mxu0  ;;  %2833 = vtanh.f32 %v446_v54  ;;  %v2826_v8 = vpop.eup %2825 }
  0xfe   : > { %2835 = vtanh.f32 %v460_v57  ;;  %v433_v34 = vmax.f32 %v403_v56, 0.0  ;;  %v452_v36 = vmul.f32 0.5, %v2826_v8  ;;  %v492_v48 = vmul.f32 0.5, %v432_v33 }
  0xff   : > { %v407_v59 = vpop.f32.mrf.mxu0  ;;  %2837 = vtanh.f32 %v463_v58  ;;  %v2828_v9 = vpop.eup %2827 }
 0x100   : > { %2839 = vtanh.f32 %v447_v60  ;;  %v453_v30 = vmul.f32 0.5, %v2828_v9  ;;  %v434_v32 = vmax.f32 %v407_v59, 0.0  ;;  %v493_v49 = vmul.f32 0.5, %v433_v34 }
 0x101   : > { %v409_v61 = vpop.f32.mrf.mxu0  ;;  %v456_v50 = vadd.f32 0.5, %v452_v36 }
 0x102   : > { %v435_v28 = vmax.f32 %v409_v61, 0.0  ;;  %v457_v43 = vadd.f32 0.5, %v453_v30  ;;  %v494_v45 = vmul.f32 0.5, %v434_v32 }
 0x103   : > { %v413_v62 = vpop.f32.mrf.mxu0 }
 0x104   : > { %v436_v63 = vmax.f32 %v413_v62, 0.0  ;;  %v495_v41 = vmul.f32 0.5, %v435_v28 }
 0x105   : > { %v415_v0 = vpop.f32.mrf.mxu0 }
 0x106   : > { %v437_v1 = vmax.f32 %v415_v0, 0.0  ;;  %2841 = vtanh.f32 %v436_v63 }
 0x107   : > { %v419_v2 = vpop.f32.mrf.mxu0  ;;  %v2830_v11 = vpop.eup %2829 }
 0x108   : > { %2843 = vtanh.f32 %v437_v1  ;;  %v438_v3 = vmax.f32 %v419_v2, 0.0  ;;  %v469_v27 = vmul.f32 0.5, %v2830_v11 }
 0x109   : > { %v421_v4 = vpop.f32.mrf.mxu0  ;;  %v2832_v12 = vpop.eup %2831 }
 0x10a   : > { %2845 = vtanh.f32 %v438_v3  ;;  %v439_v10 = vmax.f32 %v421_v4, 0.0  ;;  %v2834_v25 = vpop.eup %2833  ;;  %v470_v31 = vmul.f32 0.5, %v2832_v12  ;;  %v473_v39 = vadd.f32 0.5, %v469_v27 }
 0x10b   : > { %v2836_v26 = vpop.eup %2835  ;;  %v454_v37 = vmul.f32 0.5, %v2834_v25 }
 0x10c   : > { %2847 = vtanh.f32 %v439_v10  ;;  %v2838_v29 = vpop.eup %2837  ;;  %v468_v38 = vmul.f32 0.5, %v2836_v26  ;;  %v474_v44 = vadd.f32 0.5, %v470_v31  ;;  %v481_v55 = vmul.f32 0.0, %v473_v39 }
 0x10d   : > { %v2840_v35 = vpop.eup %2839  ;;  %v471_v40 = vmul.f32 0.5, %v2838_v29  ;;  %v458_v51 = vadd.f32 0.5, %v454_v37  ;;  %2849 = vtanh.f32 %v495_v41  ;;  %v3409_v41 = vld [vmem:[%s3885_s1 + $0x48] sm:$0xff] }
 0x10e   : > { %v455_v47 = vmul.f32 0.5, %v2840_v35  ;;  %v472_v53 = vadd.f32 0.5, %v468_v38  ;;  %v482_v57 = vmul.f32 0.0, %v474_v44  ;;  %2851 = vtanh.f32 %v494_v45  ;;  %v2754_v44 = vld [vmem:[%s3279_s26 + $0x6] sm:$0x3] }
 0x10f   : > { %v475_v56 = vadd.f32 0.5, %v471_v40  ;;  %2853 = vtanh.f32 %v493_v49  ;;  %v3401_v40 = vld [vmem:[%s3885_s1 + $0x40] sm:$0xff] }
 0x110   : > { %v459_v60 = vadd.f32 0.5, %v455_v47  ;;  %v480_v63 = vmul.f32 0.0, %v472_v53  ;;  %2855 = vtanh.f32 %v492_v48 }
 0x111   : > { %v483_v1 = vmul.f32 0.0, %v475_v56 }
 0x113   : > { %v2842_v42 = vpop.eup %2841 }
 0x114   : > { %v484_v58 = vmul.f32 %v2842_v42, %v456_v50  ;;  %v3418_v42 = vld [vmem:[%s3885_s1 + $0x50] sm:$0xff] }
 0x115   : > { %v2844_v46 = vpop.eup %2843 }
 0x116   : > { %v485_v52 = vmul.f32 %v2844_v46, %v457_v43  ;;  %v3390_v3 = vadd.f32 %v484_v58, %v480_v63  ;;  %v3427_v43 = vld [vmem:[%s3885_s1 + $0x58] sm:$0xff] }
 0x117   : > { %v2846_v54 = vpop.eup %2845 }
 0x118   : > { %v486_v59 = vmul.f32 %v2846_v54, %v458_v51  ;;  %v3386_v61 = vadd.f32 %v485_v52, %v481_v55 }
 0x119   : > { %v2848_v62 = vpop.eup %2847 }
 0x11a   : > { %v3388_v0 = vadd.f32 %v486_v59, %v482_v57  ;;  %v487_v2 = vmul.f32 %v2848_v62, %v459_v60  ;;  %2857 = vtanh.f32 %v3386_v61  ;;  %v2850_v8 = vpop.eup %2849 }
 0x11b   : > { %v2852_v9 = vpop.eup %2851  ;;  %v503_v12 = vmul.f32 0.5, %v2850_v8 }
 0x11c   : > { %v3393_v4 = vadd.f32 %v487_v2, %v483_v1  ;;  %2859 = vtanh.f32 %v3388_v0  ;;  %v2854_v10 = vpop.eup %2853  ;;  %v502_v25 = vmul.f32 0.5, %v2852_v9 }
 0x11d   : > { %v2856_v11 = vpop.eup %2855  ;;  %v501_v26 = vmul.f32 0.5, %v2854_v10  ;;  %v507_v30 = vadd.f32 0.5, %v503_v12 }
 0x11e   : > { %2861 = vtanh.f32 %v3393_v4  ;;  %v500_v28 = vmul.f32 0.5, %v2856_v11  ;;  %v506_v32 = vadd.f32 0.5, %v502_v25 }
 0x11f   : > { %2863 = vtanh.f32 %v3390_v3  ;;  %v505_v34 = vadd.f32 0.5, %v501_v26 }
 0x120   : > { %v504_v36 = vadd.f32 0.5, %v500_v28 }
 0x127   : > { %v2858_v27 = vpop.eup %2857 }
 0x128   : > { %v513_v38 = vmul.f32 %v2858_v27, %v505_v34 }
 0x129   : > { %v2860_v29 = vpop.eup %2859 }
 0x12a   : > { %v514_v37 = vmul.f32 %v2860_v29, %v506_v32 }
 0x12b   : > { %v2862_v31 = vpop.eup %2861 }
 0x12c   : > { %v2864_v33 = vpop.eup %2863  ;;  %v515_v35 = vmul.f32 %v2862_v31, %v507_v30 }
 0x12d   : > { %v512_v39 = vmul.f32 %v2864_v33, %v504_v36 }
 0x12e   : > { %577 = vmatprep.subr.mxu1 %v515_v35 }
 0x12f   : > { %578 = vmatpush1.msra.mxu1 %v514_v37 }
 0x130   : > { %579 = vmatprep.subr.mxu1 %v513_v38 }
 0x131   : > { %580 = vmatpush1.msra.mxu1 %v512_v39 }
 0x132   : > { %2724 = vmatmul.mubr.msk.f32.vlgmr.msra.gmra.mxu1 %vm536_vm2, %v3401_v40  ;;  %728 = vmatprep.subr.mxu1 %v515_v35 }
 0x133   : > { %729 = vmatpush1.msra.mxu1 %v514_v37  ;;  %619 = vmatprep.mubr.f32.mxu1 %v3203_v6 }
 0x134   : > { %730 = vmatprep.subr.mxu1 %v513_v38 }
 0x135   : > { %731 = vmatpush1.msra.mxu1 %v512_v39 }
 0x136   : > { %2725 = vmatmul.mubr.msk.f32.gmra.mxu1 %vm536_vm2, %v3409_v41  ;;  %732 = vmatprep.subr.mxu1 %v3358_v23  ;;  %v3456_v23 = vld [vmem:[#allocation2 + $0x8] sm:$0xff] }
 0x137   : > { %625 = vmatprep.mubr.f32.mxu1 %v3203_v6  ;;  %733 = vmatpush1.msra.mxu1 %v3360_v24  ;;  %v3458_v24 = vld [vmem:[#allocation2] sm:$0xff] }
 0x138   : > { %1450 = vst.msk [vmem:[#allocation2] ss:$8 sm:$0x3] %vm3267_vm0, %v2754_v44 }
 0x13a   : > { %2726 = vmatmul.mubr.msk.f32.gmra.mxu1 %vm536_vm2, %v3418_v42 }
 0x13b   : > { %631 = vmatprep.mubr.f32.mxu1 %v3203_v6 }
 0x13e   : > { %2727 = vmatmul.mubr.msk.f32.gmra.mxu1 %vm536_vm2, %v3427_v43 }
 0x13f   : > { %766 = vmatprep.mubr.f32.mxu1 %v3203_v6 }
 0x142   : > { %2729 = vmatmul.mubr.msk.f32.vlgmr.msra.gmra.mxu1 %vm286_vm1, %v3289_v13 }
 0x143   : > { %772 = vmatprep.mubr.f32.mxu1 %v3203_v6 }
 0x146   : > { %2730 = vmatmul.mubr.msk.f32.gmra.mxu1 %vm286_vm1, %v3299_v14 }
 0x147   : > { %778 = vmatprep.mubr.f32.mxu1 %v3203_v6 }
 0x14a   : > { %2731 = vmatmul.mubr.msk.f32.gmra.mxu1 %vm286_vm1, %v3307_v15 }
 0x14b   : > { %784 = vmatprep.mubr.f32.mxu1 %v3203_v6 }
 0x14e   : > { %2732 = vmatmul.mubr.msk.f32.gmra.mxu1 %vm286_vm1, %v3315_v16 }
 0x14f   : > { %790 = vmatprep.mubr.f32.mxu1 %v3203_v6 }
 0x152   : > { %2733 = vmatmul.mubr.msk.f32.gmra.mxu1 %vm286_vm1, %v3323_v17 }
 0x153   : > { %796 = vmatprep.mubr.f32.mxu1 %v3203_v6 }
 0x156   : > { %2734 = vmatmul.mubr.msk.f32.gmra.mxu1 %vm286_vm1, %v3331_v18 }
 0x157   : > { %802 = vmatprep.mubr.f32.mxu1 %v3203_v6 }
 0x15a   : > { %2735 = vmatmul.mubr.msk.f32.gmra.mxu1 %vm286_vm1, %v3339_v19 }
 0x15b   : > { %808 = vmatprep.mubr.f32.mxu1 %v3203_v6 }
 0x15e   : > { %2736 = vmatmul.mubr.msk.f32.gmra.mxu1 %vm286_vm1, %v3347_v20 }
 0x15f   : > { %1369 = vmatprep.mubr.f32.mxu1 %v3203_v6 }
 0x1f2   : > { %v615_v45 = vpop.f32.mrf.mxu1 }
 0x1f3   : > { %v638_v46 = vmax.f32 %v615_v45, 0.0 }
 0x1f4   : > { %v617_v47 = vpop.f32.mrf.mxu1 }
 0x1f5   : > { %v648_v48 = vmul.f32 0.5, %v638_v46  ;;  %v639_v49 = vmax.f32 %v617_v47, 0.0 }
 0x1f6   : > { %v621_v50 = vpop.f32.mrf.mxu1 }
 0x1f7   : > { %v649_v51 = vmul.f32 0.5, %v639_v49  ;;  %v640_v53 = vmax.f32 %v621_v50, 0.0  ;;  %2865 = vtanh.f32 %v648_v48 }
 0x1f8   : > { %v623_v52 = vpop.f32.mrf.mxu1 }
 0x1f9   : > { %v656_v54 = vmul.f32 0.5, %v640_v53  ;;  %v641_v55 = vmax.f32 %v623_v52, 0.0  ;;  %2867 = vtanh.f32 %v649_v51 }
 0x1fa   : > { %v627_v56 = vpop.f32.mrf.mxu1 }
 0x1fb   : > { %2869 = vtanh.f32 %v656_v54  ;;  %v657_v57 = vmul.f32 0.5, %v641_v55  ;;  %v642_v2 = vmax.f32 %v627_v56, 0.0 }
 0x1fc   : > { %v629_v58 = vpop.f32.mrf.mxu1 }
 0x1fd   : > { %2871 = vtanh.f32 %v657_v57  ;;  %v643_v9 = vmax.f32 %v629_v58, 0.0  ;;  %v672_v26 = vmul.f32 0.5, %v642_v2 }
 0x1fe   : > { %v633_v59 = vpop.f32.mrf.mxu1 }
 0x1ff   : > { %v644_v60 = vmax.f32 %v633_v59, 0.0  ;;  %v673_v29 = vmul.f32 0.5, %v643_v9 }
 0x200   : > { %v635_v62 = vpop.f32.mrf.mxu1 }
 0x201   : > { %v645_v63 = vmax.f32 %v635_v62, 0.0  ;;  %2873 = vtanh.f32 %v644_v60 }
 0x202   : > { %v768_v1 = vpop.f32.mrf.mxu1 }
 0x203   : > { %2875 = vtanh.f32 %v645_v63  ;;  %v815_v30 = vmax.f32 %v768_v1, 0.0 }
 0x204   : > { %v770_v8 = vpop.f32.mrf.mxu1  ;;  %v2866_v10 = vpop.eup %2865  ;;  %2877 = vtanh.f32 %v672_v26 }
 0x205   : > { %v652_v32 = vmul.f32 0.5, %v2866_v10  ;;  %v816_v33 = vmax.f32 %v770_v8, 0.0  ;;  %2879 = vtanh.f32 %v673_v29  ;;  %v835_v44 = vmul.f32 0.5, %v815_v30 }
 0x206   : > { %v774_v11 = vpop.f32.mrf.mxu1  ;;  %v2868_v12 = vpop.eup %2867 }
 0x207   : > { %v653_v35 = vmul.f32 0.5, %v2868_v12  ;;  %v654_v45 = vadd.f32 0.5, %v652_v32  ;;  %v836_v46 = vmul.f32 0.5, %v816_v33  ;;  %v817_v47 = vmax.f32 %v774_v11, 0.0 }
 0x208   : > { %v2870_v25 = vpop.eup %2869  ;;  %v776_v27 = vpop.f32.mrf.mxu1  ;;  %2881 = vtanh.f32 %v835_v44 }
 0x209   : > { %v660_v28 = vmul.f32 0.5, %v2870_v25  ;;  %v655_v51 = vadd.f32 0.5, %v653_v35  ;;  %2883 = vtanh.f32 %v836_v46  ;;  %v837_v1 = vmul.f32 0.5, %v817_v47 }
 0x20a   : > { %v2872_v31 = vpop.eup %2871  ;;  %v780_v34 = vpop.f32.mrf.mxu1  ;;  %v818_v9 = vmax.f32 %v776_v27, 0.0 }
 0x20b   : > { %v661_v36 = vmul.f32 0.5, %v2872_v31  ;;  %v662_v37 = vadd.f32 0.5, %v660_v28  ;;  %v819_v56 = vmax.f32 %v780_v34, 0.0 }
 0x20c   : > { %v782_v38 = vpop.f32.mrf.mxu1  ;;  %v838_v28 = vmul.f32 0.5, %v818_v9 }
 0x20d   : > { %v663_v39 = vadd.f32 0.5, %v661_v36  ;;  %v820_v48 = vmax.f32 %v782_v38, 0.0  ;;  %v666_v54 = vmul.f32 0.0, %v662_v37  ;;  %v851_v11 = vmul.f32 0.5, %v819_v56 }
 0x20e   : > { %v786_v49 = vpop.f32.mrf.mxu1  ;;  %v2874_v50 = vpop.eup %2873 }
 0x20f   : > { %v821_v53 = vmax.f32 %v786_v49, 0.0  ;;  %v668_v55 = vmul.f32 %v2874_v50, %v654_v45  ;;  %v852_v57 = vmul.f32 0.5, %v820_v48  ;;  %v667_v59 = vmul.f32 0.0, %v663_v39  ;;  %v3471_v45 = vpop.permute.xlu0 %236 }
 0x210   : > { %v2876_v52 = vpop.eup %2875  ;;  %v788_v58 = vpop.f32.mrf.mxu1 }
 0x211   : > { %v669_v60 = vmul.f32 %v2876_v52, %v655_v51  ;;  %v822_v62 = vmax.f32 %v788_v58, 0.0  ;;  %v3463_v63 = vadd.f32 %v668_v55, %v666_v54  ;;  %2885 = vtanh.f32 %v852_v57  ;;  %v2878_v30 = vpop.eup %2877 }
 0x212   : > { %v3465_v2 = vpop.f32.mrf.mxu1  ;;  %v853_v10 = vmul.f32 0.5, %v821_v53  ;;  %v2880_v31 = vpop.eup %2879  ;;  %v676_v33 = vmul.f32 0.5, %v2878_v30 }
 0x213   : > { %v3467_v8 = vadd.f32 %v669_v60, %v667_v59  ;;  %2887 = vtanh.f32 %v3463_v63  ;;  %v854_v25 = vmul.f32 0.5, %v822_v62  ;;  %v677_v35 = vmul.f32 0.5, %v2880_v31  ;;  %v3475_v9 = vpop.permute.xlu0 %242 }
 0x214   : > { %v794_v12 = vpop.f32.mrf.mxu1  ;;  %v678_v47 = vadd.f32 0.5, %v676_v33 }
 0x215   : > { %2889 = vtanh.f32 %v3467_v8  ;;  %v2882_v37 = vpop.eup %2881  ;;  %v679_v50 = vadd.f32 0.5, %v677_v35  ;;  %v824_v57 = vmax.f32 %v794_v12, 0.0 }
 0x216   : > { %2891 = vtanh.f32 %v837_v1  ;;  %v798_v26 = vpop.f32.mrf.mxu1  ;;  %v2884_v39 = vpop.eup %2883 }
 0x217   : > { %2893 = vtanh.f32 %v853_v10  ;;  %v844_v30 = vmul.f32 0.5, %v2884_v39 }
 0x218   : > { %2895 = vtanh.f32 %v851_v11  ;;  %v800_v29 = vpop.f32.mrf.mxu1  ;;  %v823_v11 = vmax.f32 %v3465_v2, 0.0 }
 0x219   : > { %2897 = vtanh.f32 %v854_v25  ;;  %v826_v62 = vmax.f32 %v800_v29, 0.0  ;;  %v825_v25 = vmax.f32 %v798_v26, 0.0  ;;  %v848_v2 = vadd.f32 0.5, %v844_v30 }
 0x21a   : > { %v804_v32 = vpop.f32.mrf.mxu1  ;;  %2899 = vtanh.f32 %v838_v28  ;;  %v843_v28 = vmul.f32 0.5, %v2882_v37  ;;  %v883_v39 = vmul.f32 0.5, %v823_v11 }
 0x21b   : > { %v827_v27 = vmax.f32 %v804_v32, 0.0 }
 0x21c   : > { %v806_v34 = vpop.f32.mrf.mxu1 }
 0x21d   : > { %v828_v36 = vmax.f32 %v806_v34, 0.0  ;;  %2901 = vtanh.f32 %v827_v27  ;;  %v884_v34 = vmul.f32 0.5, %v824_v57 }
 0x21e   : > { %v810_v38 = vpop.f32.mrf.mxu1  ;;  %v2886_v46 = vpop.eup %2885 }
 0x21f   : > { %2903 = vtanh.f32 %v828_v36  ;;  %v829_v44 = vmax.f32 %v810_v38, 0.0  ;;  %v860_v60 = vmul.f32 0.5, %v2886_v46  ;;  %v886_v38 = vmul.f32 0.5, %v826_v62 }
 0x220   : > { %v812_v48 = vpop.f32.mrf.mxu1  ;;  %v2888_v49 = vpop.eup %2887 }
 0x221   : > { %2905 = vtanh.f32 %v829_v44  ;;  %v830_v51 = vmax.f32 %v812_v48, 0.0  ;;  %v682_v52 = vmul.f32 %v2888_v49, %v678_v47  ;;  %v864_v29 = vadd.f32 0.5, %v860_v60 }
 0x222   : > { %v2890_v53 = vpop.eup %2889  ;;  %v885_v44 = vmul.f32 0.5, %v825_v25  ;;  %v847_v48 = vadd.f32 0.5, %v843_v28 }
 0x223   : > { %v2892_v54 = vpop.eup %2891  ;;  %v683_v55 = vmul.f32 %v2890_v53, %v679_v50  ;;  %2907 = vtanh.f32 %v830_v51  ;;  %v684_v58 = vmul.f32 %v682_v52, %v3471_v45  ;;  %v872_v51 = vmul.f32 %v864_v29, %v3386_v61 }
 0x224   : > { %v2894_v56 = vpop.eup %2893  ;;  %v845_v12 = vmul.f32 0.5, %v2892_v54  ;;  %2909 = vtanh.f32 %v884_v34 }
 0x225   : > { %v2896_v59 = vpop.eup %2895  ;;  %v685_v1 = vmul.f32 %v683_v55, %v3471_v45  ;;  %v861_v31 = vmul.f32 0.5, %v2894_v56  ;;  %v686_v35 = vadd.f32 %v684_v58, %v3475_v9  ;;  %2911 = vtanh.f32 %v886_v38 }
 0x226   : > { %v2898_v10 = vpop.eup %2897  ;;  %v859_v33 = vmul.f32 0.5, %v2896_v59  ;;  %v849_v49 = vadd.f32 0.5, %v845_v12  ;;  %2913 = vtanh.f32 %v885_v44 }
 0x227   : > { %v687_v32 = vadd.f32 %v685_v1, %v3475_v9  ;;  %v2900_v27 = vpop.eup %2899  ;;  %v862_v36 = vmul.f32 0.5, %v2898_v10  ;;  %v865_v37 = vadd.f32 0.5, %v861_v31  ;;  %2915 = vtanh.f32 %v883_v39 }
 0x228   : > { %v846_v26 = vmul.f32 0.5, %v2900_v27  ;;  %v863_v50 = vadd.f32 0.5, %v859_v33 }
 0x229   : > { %951 = vmatprep.subr.mxu0 %v687_v32  ;;  %v866_v53 = vadd.f32 0.5, %v862_v36  ;;  %v873_v57 = vmul.f32 %v865_v37, %v3388_v0 }
 0x22a   : > { %952 = vmatpush1.msra.mxu0 %v686_v35  ;;  %v2902_v46 = vpop.eup %2901  ;;  %v850_v56 = vadd.f32 0.5, %v846_v26  ;;  %v871_v60 = vmul.f32 %v863_v50, %v3390_v3 }
 0x22b   : > { %953 = vmatprep.subr.mxu0 %v3352_v21  ;;  %v875_v55 = vmul.f32 %v2902_v46, %v847_v48 }
 0x22c   : > { %v2904_v47 = vpop.eup %2903  ;;  %954 = vmatpush1.msra.mxu0 %v3355_v22  ;;  %v874_v22 = vmul.f32 %v866_v53, %v3393_v4 }
 0x22d   : > { %v876_v52 = vmul.f32 %v2904_v47, %v848_v2  ;;  %v3490_v1 = vadd.f32 %v875_v55, %v871_v60 }
 0x22e   : > { %v2906_v54 = vpop.eup %2905 }
 0x22f   : > { %v3484_v58 = vadd.f32 %v876_v52, %v872_v51  ;;  %v877_v21 = vmul.f32 %v2906_v54, %v849_v49 }
 0x230   : > { %v2908_v59 = vpop.eup %2907 }
 0x231   : > { %v3488_v62 = vadd.f32 %v877_v21, %v873_v57  ;;  %v878_v61 = vmul.f32 %v2908_v59, %v850_v56  ;;  %2917 = vtanh.f32 %v3484_v58  ;;  %v2910_v0 = vpop.eup %2909 }
 0x232   : > { %v2912_v3 = vpop.eup %2911  ;;  %v892_v30 = vmul.f32 0.5, %v2910_v0 }
 0x233   : > { %v3493_v10 = vadd.f32 %v878_v61, %v874_v22  ;;  %2919 = vtanh.f32 %v3488_v62  ;;  %v2914_v11 = vpop.eup %2913  ;;  %v894_v4 = vmul.f32 0.5, %v2912_v3 }
 0x234   : > { %v2916_v25 = vpop.eup %2915  ;;  %v893_v28 = vmul.f32 0.5, %v2914_v11  ;;  %v896_v29 = vadd.f32 0.5, %v892_v30 }
 0x235   : > { %2921 = vtanh.f32 %v3493_v10  ;;  %v891_v32 = vmul.f32 0.5, %v2916_v25  ;;  %v898_v12 = vadd.f32 0.5, %v894_v4 }
 0x236   : > { %2923 = vtanh.f32 %v3490_v1  ;;  %v897_v34 = vadd.f32 0.5, %v893_v28 }
 0x237   : > { %v895_v38 = vadd.f32 0.5, %v891_v32 }
 0x23e   : > { %v2918_v31 = vpop.eup %2917 }
 0x23f   : > { %v904_v46 = vmul.f32 %v2918_v31, %v896_v29 }
 0x240   : > { %v2920_v27 = vpop.eup %2919 }
 0x241   : > { %v905_v44 = vmul.f32 %v2920_v27, %v897_v34 }
 0x242   : > { %v2922_v33 = vpop.eup %2921 }
 0x243   : > { %v2924_v35 = vpop.eup %2923  ;;  %v906_v36 = vmul.f32 %v2922_v33, %v898_v12 }
 0x244   : > { %v903_v2 = vmul.f32 %v2924_v35, %v895_v38 }
 0x245   : > { %955 = vmatprep.subr.mxu0 %v906_v36 }
 0x246   : > { %956 = vmatpush1.msra.mxu0 %v905_v44 }
 0x247   : > { %957 = vmatprep.subr.mxu0 %v904_v46 }
 0x248   : > { %958 = vmatpush1.msra.mxu0 %v903_v2 }
 0x249   : > { %2737 = vmatmul.mubr.msk.f32.vlgmr.msra.gmra.mxu0 %vm536_vm2, %v3401_v40  ;;  %1106 = vmatprep.subr.mxu0 %v906_v36 }
 0x24a   : > { %1107 = vmatpush1.msra.mxu0 %v905_v44  ;;  %997 = vmatprep.mubr.f32.mxu0 %v3203_v6 }
 0x24b   : > { %1108 = vmatprep.subr.mxu0 %v904_v46 }
 0x24c   : > { %1109 = vmatpush1.msra.mxu0 %v903_v2 }
 0x24d   : > { %2738 = vmatmul.mubr.msk.f32.gmra.mxu0 %vm536_vm2, %v3409_v41  ;;  %1110 = vmatprep.subr.mxu0 %v3456_v23 }
 0x24e   : > { %1003 = vmatprep.mubr.f32.mxu0 %v3203_v6  ;;  %1111 = vmatpush1.msra.mxu0 %v3458_v24 }
 0x251   : > { %2739 = vmatmul.mubr.msk.f32.gmra.mxu0 %vm536_vm2, %v3418_v42 }
 0x252   : > { %1009 = vmatprep.mubr.f32.mxu0 %v3203_v6 }
 0x255   : > { %2740 = vmatmul.mubr.msk.f32.gmra.mxu0 %vm536_vm2, %v3427_v43 }
 0x256   : > { %1144 = vmatprep.mubr.f32.mxu0 %v3203_v6 }
 0x259   : > { %2742 = vmatmul.mubr.msk.f32.vlgmr.msra.gmra.mxu0 %vm286_vm1, %v3289_v13  ;;  %v2767_v13 = vld [vmem:[%s3279_s26 + $0x8] sm:$0x3] }
 0x25a   : > { %1150 = vmatprep.mubr.f32.mxu0 %v3203_v6 }
 0x25d   : > { %2743 = vmatmul.mubr.msk.f32.gmra.mxu0 %vm286_vm1, %v3299_v14  ;;  %v3537_v14 = vld [vmem:[#allocation2 + $0x8] sm:$0xff] }
 0x25e   : > { %1156 = vmatprep.mubr.f32.mxu0 %v3203_v6 }
 0x261   : > { %2744 = vmatmul.mubr.msk.f32.gmra.mxu0 %vm286_vm1, %v3307_v15  ;;  %v3539_v15 = vld [vmem:[#allocation2] sm:$0xff] }
 0x262   : > { %1162 = vmatprep.mubr.f32.mxu0 %v3203_v6  ;;  %1828 = vst.msk [vmem:[#allocation2] ss:$8 sm:$0x3] %vm3267_vm0, %v2767_v13 }
 0x265   : > { %2745 = vmatmul.mubr.msk.f32.gmra.mxu0 %vm286_vm1, %v3315_v16 }
 0x266   : > { %1168 = vmatprep.mubr.f32.mxu0 %v3203_v6 }
 0x269   : > { %2746 = vmatmul.mubr.msk.f32.gmra.mxu0 %vm286_vm1, %v3323_v17 }
 0x26a   : > { %1174 = vmatprep.mubr.f32.mxu0 %v3203_v6 }
 0x26d   : > { %2747 = vmatmul.mubr.msk.f32.gmra.mxu0 %vm286_vm1, %v3331_v18 }
 0x26e   : > { %1180 = vmatprep.mubr.f32.mxu0 %v3203_v6 }
 0x271   : > { %2748 = vmatmul.mubr.msk.f32.gmra.mxu0 %vm286_vm1, %v3339_v19 }
 0x272   : > { %1186 = vmatprep.mubr.f32.mxu0 %v3203_v6 }
 0x275   : > { %2749 = vmatmul.mubr.msk.f32.gmra.mxu0 %vm286_vm1, %v3347_v20 }
 0x276   : > { %1747 = vmatprep.mubr.f32.mxu0 %v3203_v6 }
 0x309   : > { %v993_v16 = vpop.f32.mrf.mxu0 }
 0x30a   : > { %v1016_v17 = vmax.f32 %v993_v16, 0.0 }
 0x30b   : > { %v995_v18 = vpop.f32.mrf.mxu0 }
 0x30c   : > { %v1026_v23 = vmul.f32 0.5, %v1016_v17  ;;  %v1017_v19 = vmax.f32 %v995_v18, 0.0 }
 0x30d   : > { %v999_v24 = vpop.f32.mrf.mxu0 }
 0x30e   : > { %v1027_v26 = vmul.f32 0.5, %v1017_v19  ;;  %v1018_v37 = vmax.f32 %v999_v24, 0.0  ;;  %2925 = vtanh.f32 %v1026_v23 }
 0x30f   : > { %v1001_v39 = vpop.f32.mrf.mxu0 }
 0x310   : > { %v1034_v20 = vmul.f32 0.5, %v1018_v37  ;;  %v1019_v47 = vmax.f32 %v1001_v39, 0.0  ;;  %2927 = vtanh.f32 %v1027_v26 }
 0x311   : > { %v1005_v48 = vpop.f32.mrf.mxu0 }
 0x312   : > { %2929 = vtanh.f32 %v1034_v20  ;;  %v1035_v49 = vmul.f32 0.5, %v1019_v47  ;;  %v1020_v56 = vmax.f32 %v1005_v48, 0.0 }
 0x313   : > { %v1007_v50 = vpop.f32.mrf.mxu0 }
 0x314   : > { %2931 = vtanh.f32 %v1035_v49  ;;  %v1021_v21 = vmax.f32 %v1007_v50, 0.0  ;;  %v1050_v0 = vmul.f32 0.5, %v1020_v56 }
 0x315   : > { %v1011_v51 = vpop.f32.mrf.mxu0 }
 0x316   : > { %v1022_v53 = vmax.f32 %v1011_v51, 0.0  ;;  %v1051_v25 = vmul.f32 0.5, %v1021_v21 }
 0x317   : > { %v1013_v52 = vpop.f32.mrf.mxu0 }
 0x318   : > { %v1023_v54 = vmax.f32 %v1013_v52, 0.0  ;;  %2933 = vtanh.f32 %v1022_v53 }
 0x319   : > { %v1146_v55 = vpop.f32.mrf.mxu0 }
 0x31a   : > { %2935 = vtanh.f32 %v1023_v54  ;;  %v1193_v4 = vmax.f32 %v1146_v55, 0.0 }
 0x31b   : > { %v1148_v57 = vpop.f32.mrf.mxu0  ;;  %v2926_v59 = vpop.eup %2925  ;;  %2937 = vtanh.f32 %v1050_v0 }
 0x31c   : > { %v1030_v30 = vmul.f32 0.5, %v2926_v59  ;;  %v1194_v31 = vmax.f32 %v1148_v57, 0.0  ;;  %2939 = vtanh.f32 %v1051_v25  ;;  %v1213_v29 = vmul.f32 0.5, %v1193_v4 }
 0x31d   : > { %v1152_v60 = vpop.f32.mrf.mxu0  ;;  %v2928_v22 = vpop.eup %2927 }
 0x31e   : > { %v1031_v27 = vmul.f32 0.5, %v2928_v22  ;;  %v1032_v36 = vadd.f32 0.5, %v1030_v30  ;;  %v1214_v38 = vmul.f32 0.5, %v1194_v31  ;;  %v1195_v44 = vmax.f32 %v1152_v60, 0.0 }
 0x31f   : > { %v2930_v61 = vpop.eup %2929  ;;  %v1154_v3 = vpop.f32.mrf.mxu0  ;;  %2941 = vtanh.f32 %v1213_v29 }
 0x320   : > { %v1038_v11 = vmul.f32 0.5, %v2930_v61  ;;  %v1033_v16 = vadd.f32 0.5, %v1031_v27  ;;  %2943 = vtanh.f32 %v1214_v38  ;;  %v1215_v49 = vmul.f32 0.5, %v1195_v44 }
 0x321   : > { %v2932_v28 = vpop.eup %2931  ;;  %v1158_v32 = vpop.f32.mrf.mxu0  ;;  %v1196_v53 = vmax.f32 %v1154_v3, 0.0 }
 0x322   : > { %v1039_v12 = vmul.f32 0.5, %v2932_v28  ;;  %v1040_v33 = vadd.f32 0.5, %v1038_v11  ;;  %v1197_v24 = vmax.f32 %v1158_v32, 0.0 }
 0x323   : > { %v1160_v34 = vpop.f32.mrf.mxu0  ;;  %v1216_v56 = vmul.f32 0.5, %v1196_v53 }
 0x324   : > { %v1041_v35 = vadd.f32 0.5, %v1039_v12  ;;  %v1198_v46 = vmax.f32 %v1160_v34, 0.0  ;;  %v1044_v23 = vmul.f32 %v1040_v33, %v3463_v63  ;;  %v1229_v52 = vmul.f32 0.5, %v1197_v24 }
 0x325   : > { %v1164_v2 = vpop.f32.mrf.mxu0  ;;  %v2934_v13 = vpop.eup %2933 }
 0x326   : > { %v1199_v17 = vmax.f32 %v1164_v2, 0.0  ;;  %v1046_v19 = vmul.f32 %v2934_v13, %v1032_v36  ;;  %v1230_v26 = vmul.f32 0.5, %v1198_v46  ;;  %v1045_v39 = vmul.f32 %v1041_v35, %v3467_v8 }
 0x327   : > { %v2936_v18 = vpop.eup %2935  ;;  %v1166_v37 = vpop.f32.mrf.mxu0 }
 0x328   : > { %v1047_v20 = vmul.f32 %v2936_v18, %v1033_v16  ;;  %v1200_v47 = vmax.f32 %v1166_v37, 0.0  ;;  %v3545_v48 = vadd.f32 %v1046_v19, %v1044_v23  ;;  %2945 = vtanh.f32 %v1230_v26  ;;  %v2938_v21 = vpop.eup %2937 }
 0x329   : > { %v3547_v50 = vpop.f32.mrf.mxu0  ;;  %v1231_v63 = vmul.f32 0.5, %v1199_v17  ;;  %v2940_v59 = vpop.eup %2939  ;;  %v1054_v61 = vmul.f32 0.5, %v2938_v21 }
 0x32a   : > { %v3549_v51 = vadd.f32 %v1047_v20, %v1045_v39  ;;  %2947 = vtanh.f32 %v3545_v48  ;;  %v1232_v8 = vmul.f32 0.5, %v1200_v47  ;;  %v1055_v3 = vmul.f32 0.5, %v2940_v59 }
 0x32b   : > { %v1172_v54 = vpop.f32.mrf.mxu0  ;;  %v1056_v32 = vadd.f32 0.5, %v1054_v61  ;;  %v1201_v19 = vmax.f32 %v3547_v50, 0.0 }
 0x32c   : > { %2949 = vtanh.f32 %v3549_v51  ;;  %v2942_v25 = vpop.eup %2941  ;;  %v1057_v33 = vadd.f32 0.5, %v1055_v3  ;;  %v1202_v2 = vmax.f32 %v1172_v54, 0.0 }
 0x32d   : > { %2951 = vtanh.f32 %v1215_v49  ;;  %v1176_v55 = vpop.f32.mrf.mxu0  ;;  %v2944_v28 = vpop.eup %2943  ;;  %v1221_v37 = vmul.f32 0.5, %v2942_v25  ;;  %v3166_v25 = vld [vmem:[#allocation4 + $0x20] sm:$0xff] }
 0x32e   : > { %2953 = vtanh.f32 %v1231_v63  ;;  %v1203_v24 = vmax.f32 %v1176_v55, 0.0  ;;  %v1222_v39 = vmul.f32 0.5, %v2944_v28 }
 0x32f   : > { %2955 = vtanh.f32 %v1229_v52  ;;  %v1178_v57 = vpop.f32.mrf.mxu0  ;;  %v1262_v52 = vmul.f32 0.5, %v1202_v2 }
 0x330   : > { %2957 = vtanh.f32 %v1232_v8  ;;  %v1204_v18 = vmax.f32 %v1178_v57, 0.0  ;;  %v1263_v57 = vmul.f32 0.5, %v1203_v24  ;;  %v1226_v50 = vadd.f32 0.5, %v1222_v39 }
 0x331   : > { %v1182_v60 = vpop.f32.mrf.mxu0  ;;  %2959 = vtanh.f32 %v1216_v56 }
 0x332   : > { %v1205_v22 = vmax.f32 %v1182_v60, 0.0  ;;  %v1264_v56 = vmul.f32 0.5, %v1204_v18  ;;  %v1261_v60 = vmul.f32 0.5, %v1201_v19 }
 0x333   : > { %v1184_v0 = vpop.f32.mrf.mxu0 }
 0x334   : > { %v1206_v11 = vmax.f32 %v1184_v0, 0.0  ;;  %2961 = vtanh.f32 %v1205_v22  ;;  %v3165_v22 = vld [vmem:[#allocation4 + $0x28] sm:$0xff]  ;;  %v1225_v0 = vadd.f32 0.5, %v1221_v37 }
 0x335   : > { %v1188_v4 = vpop.f32.mrf.mxu0  ;;  %v2946_v31 = vpop.eup %2945 }
 0x336   : > { %2963 = vtanh.f32 %v1206_v11  ;;  %v1207_v30 = vmax.f32 %v1188_v4, 0.0  ;;  %v1238_v17 = vmul.f32 0.5, %v2946_v31 }
 0x337   : > { %v1190_v27 = vpop.f32.mrf.mxu0  ;;  %v2948_v12 = vpop.eup %2947 }
 0x338   : > { %2965 = vtanh.f32 %v1207_v30  ;;  %v1208_v34 = vmax.f32 %v1190_v27, 0.0  ;;  %v1060_v29 = vmul.f32 %v2948_v12, %v1056_v32  ;;  %v1242_v54 = vadd.f32 0.5, %v1238_v17 }
 0x339   : > { %v2950_v35 = vpop.eup %2949 }
 0x33a   : > { %v2952_v36 = vpop.eup %2951  ;;  %v1061_v38 = vmul.f32 %v2950_v35, %v1057_v33  ;;  %2967 = vtanh.f32 %v1208_v34  ;;  %v1062_v46 = vmul.f32 %v1060_v29, %v3471_v45  ;;  %v1250_v4 = vmul.f32 %v1242_v54, %v3484_v58  ;;  %v3639_v54 = vld [vmem:[%s3885_s1 + $0x30] sm:$0xff] }
 0x33b   : > { %v2954_v44 = vpop.eup %2953  ;;  %v1223_v53 = vmul.f32 0.5, %v2952_v36  ;;  %2969 = vtanh.f32 %v1262_v52 }
 0x33c   : > { %v2956_v13 = vpop.eup %2955  ;;  %v1063_v16 = vmul.f32 %v1061_v38, %v3471_v45  ;;  %v1239_v20 = vmul.f32 0.5, %v2954_v44  ;;  %v1064_v49 = vadd.f32 %v1062_v46, %v3475_v9  ;;  %2971 = vtanh.f32 %v1264_v56 }
 0x33d   : > { %v2958_v23 = vpop.eup %2957  ;;  %v1237_v63 = vmul.f32 0.5, %v2956_v13  ;;  %v1227_v3 = vadd.f32 0.5, %v1223_v53  ;;  %2973 = vtanh.f32 %v1263_v57 }
 0x33e   : > { %v1065_v26 = vadd.f32 %v1063_v16, %v3475_v9  ;;  %v2960_v47 = vpop.eup %2959  ;;  %v1240_v8 = vmul.f32 0.5, %v2958_v23  ;;  %v1243_v59 = vadd.f32 0.5, %v1239_v20  ;;  %2975 = vtanh.f32 %v1261_v60 }
 0x33f   : > { %v1224_v55 = vmul.f32 0.5, %v2960_v47  ;;  %v1241_v11 = vadd.f32 0.5, %v1237_v63 }
 0x340   : > { %1329 = vmatprep.subr.mxu1 %v1065_v26  ;;  %v1244_v28 = vadd.f32 0.5, %v1240_v8  ;;  %v1251_v12 = vmul.f32 %v1243_v59, %v3488_v62  ;;  %v3647_v8 = vld [vmem:[%s3885_s1 + $0x38] sm:$0xff] }
 0x341   : > { %1330 = vmatpush1.msra.mxu1 %v1064_v49  ;;  %v2962_v21 = vpop.eup %2961  ;;  %v1228_v27 = vadd.f32 0.5, %v1224_v55  ;;  %v1249_v29 = vmul.f32 %v1241_v11, %v3490_v1 }
 0x342   : > { %1331 = vmatprep.subr.mxu1 %v3165_v22  ;;  %v1253_v32 = vmul.f32 %v2962_v21, %v1225_v0  ;;  %v1252_v36 = vmul.f32 %v1244_v28, %v3493_v10 }
 0x343   : > { %v2964_v61 = vpop.eup %2963  ;;  %1332 = vmatpush1.msra.mxu1 %v3166_v25 }
 0x344   : > { %v1254_v30 = vmul.f32 %v2964_v61, %v1226_v50  ;;  %v3566_v44 = vadd.f32 %v1253_v32, %v1249_v29 }
 0x345   : > { %v2966_v31 = vpop.eup %2965 }
 0x346   : > { %v3560_v33 = vadd.f32 %v1254_v30, %v1250_v4  ;;  %v1255_v34 = vmul.f32 %v2966_v31, %v1227_v3 }
 0x347   : > { %v2968_v35 = vpop.eup %2967 }
 0x348   : > { %v3564_v38 = vadd.f32 %v1255_v34, %v1251_v12  ;;  %v1256_v58 = vmul.f32 %v2968_v35, %v1228_v27  ;;  %2977 = vtanh.f32 %v3560_v33  ;;  %v2970_v62 = vpop.eup %2969 }
 0x349   : > { %v2972_v1 = vpop.eup %2971  ;;  %v1270_v17 = vmul.f32 0.5, %v2970_v62 }
 0x34a   : > { %v3569_v46 = vadd.f32 %v1256_v58, %v1252_v36  ;;  %2979 = vtanh.f32 %v3564_v38  ;;  %v2974_v2 = vpop.eup %2973  ;;  %v1272_v10 = vmul.f32 0.5, %v2972_v1 }
 0x34b   : > { %v2976_v13 = vpop.eup %2975  ;;  %v1271_v16 = vmul.f32 0.5, %v2974_v2  ;;  %v1274_v20 = vadd.f32 0.5, %v1270_v17 }
 0x34c   : > { %2981 = vtanh.f32 %v3569_v46  ;;  %v1269_v23 = vmul.f32 0.5, %v2976_v13  ;;  %v1276_v24 = vadd.f32 0.5, %v1272_v10 }
 0x34d   : > { %2983 = vtanh.f32 %v3566_v44  ;;  %v1275_v37 = vadd.f32 0.5, %v1271_v16 }
 0x34e   : > { %v1273_v49 = vadd.f32 0.5, %v1269_v23 }
 0x355   : > { %v2978_v18 = vpop.eup %2977 }
 0x356   : > { %v1282_v63 = vmul.f32 %v2978_v18, %v1274_v20 }
 0x357   : > { %v2980_v19 = vpop.eup %2979 }
 0x358   : > { %v1283_v53 = vmul.f32 %v2980_v19, %v1275_v37 }
 0x359   : > { %v2982_v26 = vpop.eup %2981 }
 0x35a   : > { %v2984_v39 = vpop.eup %2983  ;;  %v1284_v47 = vmul.f32 %v2982_v26, %v1276_v24 }
 0x35b   : > { %v1281_v52 = vmul.f32 %v2984_v39, %v1273_v49 }
 0x35c   : > { %1333 = vmatprep.subr.mxu1 %v1284_v47 }
 0x35d   : > { %1334 = vmatpush1.msra.mxu1 %v1283_v53 }
 0x35e   : > { %1335 = vmatprep.subr.mxu1 %v1282_v63 }
 0x35f   : > { %1336 = vmatpush1.msra.mxu1 %v1281_v52 }
 0x360   : > { %2750 = vmatmul.mubr.msk.f32.vlgmr.msra.gmra.mxu1 %vm536_vm2, %v3401_v40  ;;  %1484 = vmatprep.subr.mxu1 %v1284_v47  ;;  %v3591_v40 = vld [vmem:[%s3885_s1] sm:$0xff] }
 0x361   : > { %1485 = vmatpush1.msra.mxu1 %v1283_v53  ;;  %1375 = vmatprep.mubr.f32.mxu1 %v3203_v6 }
 0x362   : > { %1486 = vmatprep.subr.mxu1 %v1282_v63 }
 0x363   : > { %1487 = vmatpush1.msra.mxu1 %v1281_v52 }
 0x364   : > { %2751 = vmatmul.mubr.msk.f32.gmra.mxu1 %vm536_vm2, %v3409_v41  ;;  %1488 = vmatprep.subr.mxu1 %v3537_v14  ;;  %v3599_v41 = vld [vmem:[%s3885_s1 + $0x8] sm:$0xff]  ;;  %v3623_v14 = vld [vmem:[%s3885_s1 + $0x20] sm:$0xff] }
 0x365   : > { %1381 = vmatprep.mubr.f32.mxu1 %v3203_v6  ;;  %1489 = vmatpush1.msra.mxu1 %v3539_v15  ;;  %v3631_v15 = vld [vmem:[%s3885_s1 + $0x28] sm:$0xff] }
 0x368   : > { %2752 = vmatmul.mubr.msk.f32.gmra.mxu1 %vm536_vm2, %v3418_v42  ;;  %v3607_v42 = vld [vmem:[%s3885_s1 + $0x10] sm:$0xff] }
 0x369   : > { %1387 = vmatprep.mubr.f32.mxu1 %v3203_v6 }
 0x36c   : > { %2753 = vmatmul.mubr.msk.f32.gmra.mxu1 %vm536_vm2, %v3427_v43  ;;  %v3615_v43 = vld [vmem:[%s3885_s1 + $0x18] sm:$0xff] }
 0x36d   : > { %1522 = vmatprep.mubr.f32.mxu1 %v3203_v6 }
 0x370   : > { %2755 = vmatmul.mubr.msk.f32.vlgmr.msra.gmra.mxu1 %vm286_vm1, %v3591_v40 }
 0x371   : > { %1528 = vmatprep.mubr.f32.mxu1 %v3203_v6 }
 0x374   : > { %2756 = vmatmul.mubr.msk.f32.gmra.mxu1 %vm286_vm1, %v3599_v41 }
 0x375   : > { %1534 = vmatprep.mubr.f32.mxu1 %v3203_v6 }
 0x378   : > { %2757 = vmatmul.mubr.msk.f32.gmra.mxu1 %vm286_vm1, %v3607_v42 }
 0x379   : > { %1540 = vmatprep.mubr.f32.mxu1 %v3203_v6 }
 0x37c   : > { %2758 = vmatmul.mubr.msk.f32.gmra.mxu1 %vm286_vm1, %v3615_v43 }
 0x37d   : > { %1546 = vmatprep.mubr.f32.mxu1 %v3203_v6 }
 0x380   : > { %2759 = vmatmul.mubr.msk.f32.gmra.mxu1 %vm286_vm1, %v3623_v14 }
 0x381   : > { %1552 = vmatprep.mubr.f32.mxu1 %v3203_v6 }
 0x384   : > { %2760 = vmatmul.mubr.msk.f32.gmra.mxu1 %vm286_vm1, %v3631_v15 }
 0x385   : > { %1558 = vmatprep.mubr.f32.mxu1 %v3203_v6 }
 0x388   : > { %2761 = vmatmul.mubr.msk.f32.gmra.mxu1 %vm286_vm1, %v3639_v54 }
 0x389   : > { %1564 = vmatprep.mubr.f32.mxu1 %v3203_v6 }
 0x38c   : > { %2762 = vmatmul.mubr.msk.f32.gmra.mxu1 %vm286_vm1, %v3647_v8 }
 0x38d   : > { %2125 = vmatprep.mubr.f32.mxu1 %v3203_v6 }
 0x420   : > { %v1371_v56 = vpop.f32.mrf.mxu1 }
 0x421   : > { %v1394_v57 = vmax.f32 %v1371_v56, 0.0 }
 0x422   : > { %v1373_v21 = vpop.f32.mrf.mxu1 }
 0x423   : > { %v1404_v50 = vmul.f32 0.5, %v1394_v57  ;;  %v1395_v55 = vmax.f32 %v1373_v21, 0.0 }
 0x424   : > { %v1377_v59 = vpop.f32.mrf.mxu1 }
 0x425   : > { %v1405_v60 = vmul.f32 0.5, %v1395_v55  ;;  %v1396_v22 = vmax.f32 %v1377_v59, 0.0  ;;  %2985 = vtanh.f32 %v1404_v50 }
 0x426   : > { %v1379_v61 = vpop.f32.mrf.mxu1 }
 0x427   : > { %v1412_v0 = vmul.f32 0.5, %v1396_v22  ;;  %v1397_v3 = vmax.f32 %v1379_v61, 0.0  ;;  %2987 = vtanh.f32 %v1405_v60 }
 0x428   : > { %v1383_v11 = vpop.f32.mrf.mxu1 }
 0x429   : > { %2989 = vtanh.f32 %v1412_v0  ;;  %v1413_v25 = vmul.f32 0.5, %v1397_v3  ;;  %v1398_v12 = vmax.f32 %v1383_v11, 0.0 }
 0x42a   : > { %v1385_v4 = vpop.f32.mrf.mxu1 }
 0x42b   : > { %2991 = vtanh.f32 %v1413_v25  ;;  %v1399_v35 = vmax.f32 %v1385_v4, 0.0  ;;  %v1428_v1 = vmul.f32 0.5, %v1398_v12 }
 0x42c   : > { %v1389_v28 = vpop.f32.mrf.mxu1 }
 0x42d   : > { %v1400_v30 = vmax.f32 %v1389_v28, 0.0  ;;  %v1429_v10 = vmul.f32 0.5, %v1399_v35 }
 0x42e   : > { %v1391_v31 = vpop.f32.mrf.mxu1 }
 0x42f   : > { %v1401_v32 = vmax.f32 %v1391_v31, 0.0  ;;  %2993 = vtanh.f32 %v1400_v30 }
 0x430   : > { %v1524_v27 = vpop.f32.mrf.mxu1 }
 0x431   : > { %2995 = vtanh.f32 %v1401_v32  ;;  %v1571_v16 = vmax.f32 %v1524_v27, 0.0 }
 0x432   : > { %v1526_v34 = vpop.f32.mrf.mxu1  ;;  %v2986_v29 = vpop.eup %2985  ;;  %2997 = vtanh.f32 %v1428_v1 }
 0x433   : > { %v1408_v18 = vmul.f32 0.5, %v2986_v29  ;;  %v1572_v23 = vmax.f32 %v1526_v34, 0.0  ;;  %2999 = vtanh.f32 %v1429_v10  ;;  %v1591_v47 = vmul.f32 0.5, %v1571_v16 }
 0x434   : > { %v1530_v36 = vpop.f32.mrf.mxu1  ;;  %v2988_v58 = vpop.eup %2987 }
 0x435   : > { %v1409_v24 = vmul.f32 0.5, %v2988_v58  ;;  %v1410_v49 = vadd.f32 0.5, %v1408_v18  ;;  %v1592_v53 = vmul.f32 0.5, %v1572_v23  ;;  %v1573_v63 = vmax.f32 %v1530_v36, 0.0 }
 0x436   : > { %v2990_v62 = vpop.eup %2989  ;;  %v1532_v2 = vpop.f32.mrf.mxu1  ;;  %3001 = vtanh.f32 %v1591_v47 }
 0x437   : > { %v1416_v13 = vmul.f32 0.5, %v2990_v62  ;;  %v1411_v21 = vadd.f32 0.5, %v1409_v24  ;;  %3003 = vtanh.f32 %v1592_v53  ;;  %v1593_v28 = vmul.f32 0.5, %v1573_v63 }
 0x438   : > { %v2992_v17 = vpop.eup %2991  ;;  %v1536_v19 = vpop.f32.mrf.mxu1  ;;  %v1574_v32 = vmax.f32 %v1532_v2, 0.0 }
 0x439   : > { %v1417_v26 = vmul.f32 0.5, %v2992_v17  ;;  %v1418_v37 = vadd.f32 0.5, %v1416_v13  ;;  %v1575_v22 = vmax.f32 %v1536_v19, 0.0 }
 0x43a   : > { %v1538_v39 = vpop.f32.mrf.mxu1  ;;  %v1594_v35 = vmul.f32 0.5, %v1574_v32 }
 0x43b   : > { %v1419_v20 = vadd.f32 0.5, %v1417_v26  ;;  %v1576_v52 = vmax.f32 %v1538_v39, 0.0  ;;  %v1422_v59 = vmul.f32 %v1418_v37, %v3545_v48  ;;  %v1607_v27 = vmul.f32 0.5, %v1575_v22 }
 0x43c   : > { %v1542_v56 = vpop.f32.mrf.mxu1  ;;  %v2994_v57 = vpop.eup %2993 }
 0x43d   : > { %v1577_v50 = vmax.f32 %v1542_v56, 0.0  ;;  %v1424_v60 = vmul.f32 %v2994_v57, %v1410_v49  ;;  %v1608_v61 = vmul.f32 0.5, %v1576_v52  ;;  %v1423_v3 = vmul.f32 %v1419_v20, %v3549_v51 }
 0x43e   : > { %v2996_v55 = vpop.eup %2995  ;;  %v1544_v0 = vpop.f32.mrf.mxu1 }
 0x43f   : > { %v1425_v11 = vmul.f32 %v2996_v55, %v1411_v21  ;;  %v1578_v25 = vmax.f32 %v1544_v0, 0.0  ;;  %v3654_v4 = vadd.f32 %v1424_v60, %v1422_v59  ;;  %3005 = vtanh.f32 %v1608_v61  ;;  %v2998_v36 = vpop.eup %2997 }
 0x440   : > { %v3656_v30 = vpop.f32.mrf.mxu1  ;;  %v1609_v48 = vmul.f32 0.5, %v1577_v50  ;;  %v3000_v58 = vpop.eup %2999  ;;  %v1432_v2 = vmul.f32 0.5, %v2998_v36 }
 0x441   : > { %v3658_v31 = vadd.f32 %v1425_v11, %v1423_v3  ;;  %3007 = vtanh.f32 %v3654_v4  ;;  %v1610_v51 = vmul.f32 0.5, %v1578_v25  ;;  %v1433_v10 = vmul.f32 0.5, %v3000_v58 }
 0x442   : > { %v1550_v12 = vpop.f32.mrf.mxu1  ;;  %v1434_v26 = vadd.f32 0.5, %v1432_v2  ;;  %v1579_v61 = vmax.f32 %v3656_v30, 0.0 }
 0x443   : > { %3009 = vtanh.f32 %v3658_v31  ;;  %v3002_v17 = vpop.eup %3001  ;;  %v1435_v20 = vadd.f32 0.5, %v1433_v10  ;;  %v1580_v21 = vmax.f32 %v1550_v12, 0.0 }
 0x444   : > { %3011 = vtanh.f32 %v1593_v28  ;;  %v1554_v34 = vpop.f32.mrf.mxu1  ;;  %v3004_v23 = vpop.eup %3003  ;;  %v1599_v11 = vmul.f32 0.5, %v3002_v17  ;;  %v1639_v10 = vmul.f32 0.5, %v1579_v61 }
 0x445   : > { %3013 = vtanh.f32 %v1609_v48  ;;  %v1581_v0 = vmax.f32 %v1554_v34, 0.0  ;;  %v1600_v25 = vmul.f32 0.5, %v3004_v23  ;;  %v1640_v12 = vmul.f32 0.5, %v1580_v21 }
 0x446   : > { %3015 = vtanh.f32 %v1607_v27  ;;  %v1556_v29 = vpop.f32.mrf.mxu1  ;;  %v1603_v17 = vadd.f32 0.5, %v1599_v11 }
 0x447   : > { %3017 = vtanh.f32 %v1610_v51  ;;  %v1582_v60 = vmax.f32 %v1556_v29, 0.0  ;;  %v1641_v30 = vmul.f32 0.5, %v1581_v0 }
 0x448   : > { %v1560_v62 = vpop.f32.mrf.mxu1  ;;  %3019 = vtanh.f32 %v1594_v35  ;;  %v3667_v35 = vld [vmem:[#allocation4 + $0x28] sm:$0xff] }
 0x449   : > { %v1583_v1 = vmax.f32 %v1560_v62, 0.0  ;;  %v1642_v29 = vmul.f32 0.5, %v1582_v60  ;;  %v3669_v62 = vld [vmem:[#allocation4 + $0x20] sm:$0xff] }
 0x44a   : > { %v1562_v13 = vpop.f32.mrf.mxu1 }
 0x44b   : > { %v1584_v16 = vmax.f32 %v1562_v13, 0.0  ;;  %3021 = vtanh.f32 %v1583_v1  ;;  %v1604_v1 = vadd.f32 0.5, %v1600_v25 }
 0x44c   : > { %v1566_v18 = vpop.f32.mrf.mxu1  ;;  %v3006_v24 = vpop.eup %3005 }
 0x44d   : > { %3023 = vtanh.f32 %v1584_v16  ;;  %v1585_v19 = vmax.f32 %v1566_v18, 0.0  ;;  %v1616_v59 = vmul.f32 0.5, %v3006_v24 }
 0x44e   : > { %v1568_v37 = vpop.f32.mrf.mxu1  ;;  %v3008_v39 = vpop.eup %3007 }
 0x44f   : > { %3025 = vtanh.f32 %v1585_v19  ;;  %v1586_v47 = vmax.f32 %v1568_v37, 0.0  ;;  %v1438_v53 = vmul.f32 %v3008_v39, %v1434_v26  ;;  %v1620_v36 = vadd.f32 0.5, %v1616_v59 }
 0x450   : > { %v3010_v49 = vpop.eup %3009 }
 0x451   : > { %v3012_v63 = vpop.eup %3011  ;;  %v1439_v52 = vmul.f32 %v3010_v49, %v1435_v20  ;;  %3027 = vtanh.f32 %v1586_v47  ;;  %v1440_v57 = vmul.f32 %v1438_v53, %v3471_v45  ;;  %v1628_v19 = vmul.f32 %v1620_v36, %v3560_v33 }
 0x452   : > { %v3014_v56 = vpop.eup %3013  ;;  %v1601_v27 = vmul.f32 0.5, %v3012_v63  ;;  %3029 = vtanh.f32 %v1640_v12 }
 0x453   : > { %v3016_v50 = vpop.eup %3015  ;;  %v1441_v55 = vmul.f32 %v1439_v52, %v3471_v45  ;;  %v1617_v28 = vmul.f32 0.5, %v3014_v56  ;;  %v1442_v48 = vadd.f32 %v1440_v57, %v3475_v9  ;;  %3031 = vtanh.f32 %v1642_v29  ;;  %v3692_v29 = vld [vmem:[%s3885_s1 + $0x40] sm:$0xff] }
 0x454   : > { %v3018_v22 = vpop.eup %3017  ;;  %v1615_v51 = vmul.f32 0.5, %v3016_v50  ;;  %v1605_v18 = vadd.f32 0.5, %v1601_v27  ;;  %3033 = vtanh.f32 %v1641_v30  ;;  %v1831_v30 = vld [vmem:[#allocation2 + $0x8] sm:$0xff] }
 0x455   : > { %v1443_v3 = vadd.f32 %v1441_v55, %v3475_v9  ;;  %v3020_v32 = vpop.eup %3019  ;;  %v1618_v58 = vmul.f32 0.5, %v3018_v22  ;;  %v1621_v13 = vadd.f32 0.5, %v1617_v28  ;;  %3035 = vtanh.f32 %v1639_v10 }
 0x456   : > { %v1602_v2 = vmul.f32 0.5, %v3020_v32  ;;  %v1619_v23 = vadd.f32 0.5, %v1615_v51 }
 0x457   : > { %1707 = vmatprep.subr.mxu0 %v1443_v3  ;;  %v1622_v24 = vadd.f32 0.5, %v1618_v58  ;;  %v1629_v47 = vmul.f32 %v1621_v13, %v3564_v38  ;;  %v3716_v13 = vld [vmem:[%s3885_s1 + $0x58] sm:$0xff] }
 0x458   : > { %1708 = vmatpush1.msra.mxu0 %v1442_v48  ;;  %v3022_v34 = vpop.eup %3021  ;;  %v1606_v20 = vadd.f32 0.5, %v1602_v2  ;;  %v1627_v52 = vmul.f32 %v1619_v23, %v3566_v44  ;;  %v3708_v2 = vld [vmem:[%s3885_s1 + $0x50] sm:$0xff] }
 0x459   : > { %1709 = vmatprep.subr.mxu0 %v3667_v35  ;;  %v1631_v39 = vmul.f32 %v3022_v34, %v1603_v17  ;;  %v1630_v56 = vmul.f32 %v1622_v24, %v3569_v46  ;;  %v1830_v34 = vld [vmem:[#allocation2] sm:$0xff] }
 0x45a   : > { %v3024_v16 = vpop.eup %3023  ;;  %1710 = vmatpush1.msra.mxu0 %v3669_v62 }
 0x45b   : > { %v1632_v26 = vmul.f32 %v3024_v16, %v1604_v1  ;;  %v3681_v21 = vadd.f32 %v1631_v39, %v1627_v52  ;;  %v3700_v1 = vld [vmem:[%s3885_s1 + $0x48] sm:$0xff] }
 0x45c   : > { %v3026_v37 = vpop.eup %3025 }
 0x45d   : > { %v3675_v49 = vadd.f32 %v1632_v26, %v1628_v19  ;;  %v1633_v53 = vmul.f32 %v3026_v37, %v1605_v18 }
 0x45e   : > { %v3028_v63 = vpop.eup %3027 }
 0x45f   : > { %v3679_v57 = vadd.f32 %v1633_v53, %v1629_v47  ;;  %v1634_v33 = vmul.f32 %v3028_v63, %v1606_v20  ;;  %3037 = vtanh.f32 %v3675_v49  ;;  %v3030_v38 = vpop.eup %3029 }
 0x460   : > { %v3032_v44 = vpop.eup %3031  ;;  %v1648_v22 = vmul.f32 0.5, %v3030_v38 }
 0x461   : > { %v3684_v50 = vadd.f32 %v1634_v33, %v1630_v56  ;;  %3039 = vtanh.f32 %v3679_v57  ;;  %v3034_v55 = vpop.eup %3033  ;;  %v1650_v46 = vmul.f32 0.5, %v3032_v44 }
 0x462   : > { %v3036_v59 = vpop.eup %3035  ;;  %v1649_v60 = vmul.f32 0.5, %v3034_v55  ;;  %v1652_v48 = vadd.f32 0.5, %v1648_v22 }
 0x463   : > { %3041 = vtanh.f32 %v3684_v50  ;;  %v1647_v0 = vmul.f32 0.5, %v3036_v59  ;;  %v1654_v11 = vadd.f32 0.5, %v1650_v46 }
 0x464   : > { %3043 = vtanh.f32 %v3681_v21  ;;  %v1653_v28 = vadd.f32 0.5, %v1649_v60 }
 0x465   : > { %v1651_v51 = vadd.f32 0.5, %v1647_v0 }
 0x46c   : > { %v3038_v61 = vpop.eup %3037 }
 0x46d   : > { %v1660_v36 = vmul.f32 %v3038_v61, %v1652_v48 }
 0x46e   : > { %v3040_v3 = vpop.eup %3039 }
 0x46f   : > { %v1661_v12 = vmul.f32 %v3040_v3, %v1653_v28 }
 0x470   : > { %v3042_v25 = vpop.eup %3041 }
 0x471   : > { %v3044_v32 = vpop.eup %3043  ;;  %v1662_v27 = vmul.f32 %v3042_v25, %v1654_v11 }
 0x472   : > { %v1659_v58 = vmul.f32 %v3044_v32, %v1651_v51 }
 0x473   : > { %1711 = vmatprep.subr.mxu0 %v1662_v27 }
 0x474   : > { %1712 = vmatpush1.msra.mxu0 %v1661_v12 }
 0x475   : > { %1713 = vmatprep.subr.mxu0 %v1660_v36 }
 0x476   : > { %1714 = vmatpush1.msra.mxu0 %v1659_v58 }
 0x477   : > { %2763 = vmatmul.mubr.msk.f32.vlgmr.msra.gmra.mxu0 %vm536_vm2, %v3692_v29  ;;  %1862 = vmatprep.subr.mxu0 %v1662_v27 }
 0x478   : > { %1863 = vmatpush1.msra.mxu0 %v1661_v12  ;;  %1753 = vmatprep.mubr.f32.mxu0 %v3203_v6 }
 0x479   : > { %1864 = vmatprep.subr.mxu0 %v1660_v36 }
 0x47a   : > { %1865 = vmatpush1.msra.mxu0 %v1659_v58 }
 0x47b   : > { %2764 = vmatmul.mubr.msk.f32.gmra.mxu0 %vm536_vm2, %v3700_v1  ;;  %1866 = vmatprep.subr.mxu0 %v1831_v30 }
 0x47c   : > { %1759 = vmatprep.mubr.f32.mxu0 %v3203_v6  ;;  %1867 = vmatpush1.msra.mxu0 %v1830_v34 }
 0x47f   : > { %2765 = vmatmul.mubr.msk.f32.gmra.mxu0 %vm536_vm2, %v3708_v2 }
 0x480   : > { %1765 = vmatprep.mubr.f32.mxu0 %v3203_v6 }
 0x483   : > { %2766 = vmatmul.mubr.msk.f32.gmra.mxu0 %vm536_vm2, %v3716_v13 }
 0x484   : > { %1900 = vmatprep.mubr.f32.mxu0 %v3203_v6 }
 0x487   : > { %2768 = vmatmul.mubr.msk.f32.vlgmr.msra.gmra.mxu0 %vm286_vm1, %v3591_v40 }
 0x488   : > { %1906 = vmatprep.mubr.f32.mxu0 %v3203_v6 }
 0x48b   : > { %2769 = vmatmul.mubr.msk.f32.gmra.mxu0 %vm286_vm1, %v3599_v41 }
 0x48c   : > { %1912 = vmatprep.mubr.f32.mxu0 %v3203_v6 }
 0x48f   : > { %2770 = vmatmul.mubr.msk.f32.gmra.mxu0 %vm286_vm1, %v3607_v42 }
 0x490   : > { %1918 = vmatprep.mubr.f32.mxu0 %v3203_v6 }
 0x493   : > { %2771 = vmatmul.mubr.msk.f32.gmra.mxu0 %vm286_vm1, %v3615_v43 }
 0x494   : > { %1924 = vmatprep.mubr.f32.mxu0 %v3203_v6 }
 0x497   : > { %2772 = vmatmul.mubr.msk.f32.gmra.mxu0 %vm286_vm1, %v3623_v14 }
 0x498   : > { %1930 = vmatprep.mubr.f32.mxu0 %v3203_v6 }
 0x49b   : > { %2773 = vmatmul.mubr.msk.f32.gmra.mxu0 %vm286_vm1, %v3631_v15 }
 0x49c   : > { %1936 = vmatprep.mubr.f32.mxu0 %v3203_v6 }
 0x49f   : > { %2774 = vmatmul.mubr.msk.f32.gmra.mxu0 %vm286_vm1, %v3639_v54 }
 0x4a0   : > { %1942 = vmatprep.mubr.f32.mxu0 %v3203_v6 }
 0x4a3   : > { %2775 = vmatmul.mubr.msk.f32.gmra.mxu0 %vm286_vm1, %v3647_v8 }
 0x4a4   : > { %2470 = vmatprep.mubr.f32.mxu0 %v3203_v6 }
 0x537   : > { %v1749_v40 = vpop.f32.mrf.mxu0 }
 0x538   : > { %v1772_v41 = vmax.f32 %v1749_v40, 0.0 }
 0x539   : > { %v1751_v42 = vpop.f32.mrf.mxu0 }
 0x53a   : > { %v1782_v43 = vmul.f32 0.5, %v1772_v41  ;;  %v1773_v14 = vmax.f32 %v1751_v42, 0.0 }
 0x53b   : > { %v1755_v10 = vpop.f32.mrf.mxu0 }
 0x53c   : > { %v1783_v16 = vmul.f32 0.5, %v1773_v14  ;;  %v1774_v15 = vmax.f32 %v1755_v10, 0.0  ;;  %3045 = vtanh.f32 %v1782_v43 }
 0x53d   : > { %v1757_v17 = vpop.f32.mrf.mxu0 }
 0x53e   : > { %v1790_v18 = vmul.f32 0.5, %v1774_v15  ;;  %v1775_v23 = vmax.f32 %v1757_v17, 0.0  ;;  %3047 = vtanh.f32 %v1783_v16 }
 0x53f   : > { %v1761_v54 = vpop.f32.mrf.mxu0 }
 0x540   : > { %3049 = vtanh.f32 %v1790_v18  ;;  %v1791_v19 = vmul.f32 0.5, %v1775_v23  ;;  %v1776_v47 = vmax.f32 %v1761_v54, 0.0 }
 0x541   : > { %v1763_v24 = vpop.f32.mrf.mxu0 }
 0x542   : > { %3051 = vtanh.f32 %v1791_v19  ;;  %v1777_v63 = vmax.f32 %v1763_v24, 0.0  ;;  %v1806_v44 = vmul.f32 0.5, %v1776_v47 }
 0x543   : > { %v1767_v8 = vpop.f32.mrf.mxu0 }
 0x544   : > { %v1778_v26 = vmax.f32 %v1767_v8, 0.0  ;;  %v1807_v46 = vmul.f32 0.5, %v1777_v63 }
 0x545   : > { %v1769_v37 = vpop.f32.mrf.mxu0 }
 0x546   : > { %v1779_v39 = vmax.f32 %v1769_v37, 0.0  ;;  %3053 = vtanh.f32 %v1778_v26 }
 0x547   : > { %v1902_v20 = vpop.f32.mrf.mxu0 }
 0x548   : > { %3055 = vtanh.f32 %v1779_v39  ;;  %v1949_v60 = vmax.f32 %v1902_v20, 0.0 }
 0x549   : > { %v1904_v53 = vpop.f32.mrf.mxu0  ;;  %v3046_v52 = vpop.eup %3045  ;;  %3057 = vtanh.f32 %v1806_v44 }
 0x54a   : > { %v1786_v61 = vmul.f32 0.5, %v3046_v52  ;;  %3059 = vtanh.f32 %v1807_v46  ;;  %v1969_v27 = vmul.f32 0.5, %v1949_v60  ;;  %v1950_v12 = vmax.f32 %v1904_v53, 0.0 }
 0x54b   : > { %v1908_v56 = vpop.f32.mrf.mxu0  ;;  %v3048_v33 = vpop.eup %3047 }
 0x54c   : > { %v1787_v3 = vmul.f32 0.5, %v3048_v33  ;;  %v1788_v51 = vadd.f32 0.5, %v1786_v61  ;;  %v1951_v10 = vmax.f32 %v1908_v56, 0.0  ;;  %3061 = vtanh.f32 %v1969_v27 }
 0x54d   : > { %v3050_v38 = vpop.eup %3049  ;;  %v1910_v55 = vpop.f32.mrf.mxu0  ;;  %v1970_v19 = vmul.f32 0.5, %v1950_v12 }
 0x54e   : > { %v1794_v59 = vmul.f32 0.5, %v3050_v38  ;;  %v1789_v40 = vadd.f32 0.5, %v1787_v3  ;;  %v1952_v26 = vmax.f32 %v1910_v55, 0.0 }
 0x54f   : > { %v3052_v22 = vpop.eup %3051  ;;  %v1914_v0 = vpop.f32.mrf.mxu0 }
 0x550   : > { %v1795_v11 = vmul.f32 0.5, %v3052_v22  ;;  %v1953_v25 = vmax.f32 %v1914_v0, 0.0  ;;  %v1796_v28 = vadd.f32 0.5, %v1794_v59  ;;  %v1972_v47 = vmul.f32 0.5, %v1952_v26 }
 0x551   : > { %v1916_v32 = vpop.f32.mrf.mxu0 }
 0x552   : > { %v1797_v48 = vadd.f32 0.5, %v1795_v11  ;;  %v1985_v36 = vmul.f32 0.5, %v1953_v25  ;;  %v1954_v58 = vmax.f32 %v1916_v32, 0.0  ;;  %v1800_v43 = vmul.f32 %v1796_v28, %v3654_v4 }
 0x553   : > { %v1920_v30 = vpop.f32.mrf.mxu0  ;;  %v3054_v34 = vpop.eup %3053  ;;  %v1971_v4 = vmul.f32 0.5, %v1951_v10 }
 0x554   : > { %v1955_v41 = vmax.f32 %v1920_v30, 0.0  ;;  %v1802_v14 = vmul.f32 %v3054_v34, %v1788_v51  ;;  %v1986_v16 = vmul.f32 0.5, %v1954_v58  ;;  %v1801_v17 = vmul.f32 %v1797_v48, %v3658_v31 }
 0x555   : > { %v3056_v42 = vpop.eup %3055  ;;  %v1922_v15 = vpop.f32.mrf.mxu0  ;;  %3063 = vtanh.f32 %v1985_v36 }
 0x556   : > { %v1803_v18 = vmul.f32 %v3056_v42, %v1789_v40  ;;  %v1956_v23 = vmax.f32 %v1922_v15, 0.0  ;;  %v3747_v54 = vadd.f32 %v1802_v14, %v1800_v43  ;;  %3065 = vtanh.f32 %v1986_v16  ;;  %v3058_v63 = vpop.eup %3057 }
 0x557   : > { %v1926_v24 = vpop.f32.mrf.mxu0  ;;  %v1987_v37 = vmul.f32 0.5, %v1955_v41  ;;  %v3060_v52 = vpop.eup %3059  ;;  %v1810_v38 = vmul.f32 0.5, %v3058_v63 }
 0x558   : > { %v3749_v8 = vadd.f32 %v1803_v18, %v1801_v17  ;;  %3067 = vtanh.f32 %v3747_v54  ;;  %v1988_v31 = vmul.f32 0.5, %v1956_v23  ;;  %v1811_v55 = vmul.f32 0.5, %v3060_v52 }
 0x559   : > { %v1928_v39 = vpop.f32.mrf.mxu0  ;;  %v3062_v46 = vpop.eup %3061  ;;  %v1812_v3 = vadd.f32 0.5, %v1810_v38  ;;  %v1957_v11 = vmax.f32 %v1926_v24, 0.0 }
 0x55a   : > { %3069 = vtanh.f32 %v3749_v8  ;;  %v1813_v32 = vadd.f32 0.5, %v1811_v55  ;;  %v1958_v48 = vmax.f32 %v1928_v39, 0.0  ;;  %v1977_v18 = vmul.f32 0.5, %v3062_v46 }
 0x55b   : > { %3071 = vtanh.f32 %v1970_v19  ;;  %v1932_v20 = vpop.f32.mrf.mxu0  ;;  %v2017_v42 = vmul.f32 0.5, %v1957_v11 }
 0x55c   : > { %3073 = vtanh.f32 %v1987_v37  ;;  %v1959_v30 = vmax.f32 %v1932_v20, 0.0  ;;  %v2018_v16 = vmul.f32 0.5, %v1958_v48  ;;  %v1981_v52 = vadd.f32 0.5, %v1977_v18 }
 0x55d   : > { %3075 = vtanh.f32 %v1971_v4  ;;  %v1934_v53 = vpop.f32.mrf.mxu0 }
 0x55e   : > { %3077 = vtanh.f32 %v1988_v31  ;;  %v1960_v15 = vmax.f32 %v1934_v53, 0.0  ;;  %v2019_v26 = vmul.f32 0.5, %v1959_v30 }
 0x55f   : > { %v1938_v56 = vpop.f32.mrf.mxu0  ;;  %3079 = vtanh.f32 %v1972_v47 }
 0x560   : > { %v1961_v33 = vmax.f32 %v1938_v56, 0.0  ;;  %v2020_v63 = vmul.f32 0.5, %v1960_v15 }
 0x561   : > { %v1940_v44 = vpop.f32.mrf.mxu0 }
 0x562   : > { %v1962_v59 = vmax.f32 %v1940_v44, 0.0  ;;  %3081 = vtanh.f32 %v1961_v33  ;;  %v3064_v22 = vpop.eup %3063 }
 0x563   : > { %v1944_v60 = vpop.f32.mrf.mxu0  ;;  %v3066_v0 = vpop.eup %3065  ;;  %v1993_v41 = vmul.f32 0.5, %v3064_v22 }
 0x564   : > { %3083 = vtanh.f32 %v1962_v59  ;;  %v1963_v61 = vmax.f32 %v1944_v60, 0.0  ;;  %v1994_v10 = vmul.f32 0.5, %v3066_v0 }
 0x565   : > { %v1946_v25 = vpop.f32.mrf.mxu0  ;;  %v3068_v28 = vpop.eup %3067  ;;  %v1997_v31 = vadd.f32 0.5, %v1993_v41 }
 0x566   : > { %3085 = vtanh.f32 %v1963_v61  ;;  %v1964_v27 = vmax.f32 %v1946_v25, 0.0  ;;  %v1816_v12 = vmul.f32 %v3068_v28, %v1812_v3  ;;  %v1998_v20 = vadd.f32 0.5, %v1994_v10 }
 0x567   : > { %v3070_v51 = vpop.eup %3069  ;;  %v2005_v59 = vmul.f32 %v1997_v31, %v3681_v21 }
 0x568   : > { %v3072_v36 = vpop.eup %3071  ;;  %v1817_v58 = vmul.f32 %v3070_v51, %v1813_v32  ;;  %3087 = vtanh.f32 %v1964_v27  ;;  %v1818_v40 = vmul.f32 %v1816_v12, %v3471_v45  ;;  %v2006_v60 = vmul.f32 %v1998_v20, %v3675_v49 }
 0x569   : > { %v3074_v34 = vpop.eup %3073  ;;  %v1978_v19 = vmul.f32 0.5, %v3072_v36  ;;  %3089 = vtanh.f32 %v2017_v42 }
 0x56a   : > { %v3076_v43 = vpop.eup %3075  ;;  %v1819_v14 = vmul.f32 %v1817_v58, %v3471_v45  ;;  %v1995_v24 = vmul.f32 0.5, %v3074_v34  ;;  %v1820_v4 = vadd.f32 %v1818_v40, %v3475_v9  ;;  %3091 = vtanh.f32 %v2018_v16 }
 0x56b   : > { %v3078_v17 = vpop.eup %3077  ;;  %v1979_v39 = vmul.f32 0.5, %v3076_v43  ;;  %v1982_v56 = vadd.f32 0.5, %v1978_v19  ;;  %3093 = vtanh.f32 %v2019_v26  ;;  %v230_v19 = vld [vmem:[%s3885_s1 + $0xd8] sm:$0xff] }
 0x56c   : > { %v1821_v23 = vadd.f32 %v1819_v14, %v3475_v9  ;;  %v3080_v37 = vpop.eup %3079  ;;  %v1996_v47 = vmul.f32 0.5, %v3078_v17  ;;  %v1999_v38 = vadd.f32 0.5, %v1995_v24  ;;  %3095 = vtanh.f32 %v2020_v63  ;;  %v246_v24 = vld [vmem:[%s3885_s1 + $0x108] sm:$0xff] }
 0x56d   : > { %v1980_v33 = vmul.f32 0.5, %v3080_v37  ;;  %v1983_v55 = vadd.f32 0.5, %v1979_v39 }
 0x56e   : > { %2085 = vmatprep.subr.mxu1 %v1821_v23  ;;  %v2000_v22 = vadd.f32 0.5, %v1996_v47  ;;  %v2007_v25 = vmul.f32 %v1999_v38, %v3679_v57 }
 0x56f   : > { %2086 = vmatpush1.msra.mxu1 %v1820_v4  ;;  %v3082_v53 = vpop.eup %3081  ;;  %v1984_v11 = vadd.f32 0.5, %v1980_v33 }
 0x570   : > { %2087 = vmatprep.subr.mxu1 %v3667_v35  ;;  %v2009_v46 = vmul.f32 %v3082_v53, %v1981_v52  ;;  %v2008_v48 = vmul.f32 %v2000_v22, %v3684_v50 }
 0x571   : > { %v3084_v44 = vpop.eup %3083  ;;  %2088 = vmatpush1.msra.mxu1 %v3669_v62 }
 0x572   : > { %v2010_v61 = vmul.f32 %v3084_v44, %v1982_v56  ;;  %v2013_v3 = vadd.f32 %v2009_v46, %v2005_v59 }
 0x573   : > { %v3086_v0 = vpop.eup %3085 }
 0x574   : > { %v2014_v28 = vadd.f32 %v2010_v61, %v2006_v60  ;;  %v2011_v32 = vmul.f32 %v3086_v0, %v1983_v55  ;;  %3097 = vtanh.f32 %v2013_v3 }
 0x575   : > { %v3088_v35 = vpop.eup %3087 }
 0x576   : > { %3099 = vtanh.f32 %v2014_v28  ;;  %v2015_v21 = vadd.f32 %v2011_v32, %v2007_v25  ;;  %v2012_v27 = vmul.f32 %v3088_v35, %v1984_v11  ;;  %v3090_v49 = vpop.eup %3089 }
 0x577   : > { %v3092_v51 = vpop.eup %3091  ;;  %v2025_v36 = vmul.f32 0.5, %v3090_v49 }
 0x578   : > { %3101 = vtanh.f32 %v2015_v21  ;;  %v2016_v62 = vadd.f32 %v2012_v27, %v2008_v48  ;;  %v3094_v12 = vpop.eup %3093  ;;  %v2026_v58 = vmul.f32 0.5, %v3092_v51 }
 0x579   : > { %v3096_v30 = vpop.eup %3095  ;;  %v2027_v34 = vmul.f32 0.5, %v3094_v12  ;;  %v2029_v57 = vadd.f32 0.5, %v2025_v36 }
 0x57a   : > { %3103 = vtanh.f32 %v2016_v62  ;;  %v2030_v41 = vadd.f32 0.5, %v2026_v58  ;;  %v2028_v42 = vmul.f32 0.5, %v3096_v30 }
 0x57b   : > { %v2031_v50 = vadd.f32 0.5, %v2027_v34 }
 0x57c   : > { %v2032_v15 = vadd.f32 0.5, %v2028_v42 }
 0x581   : > { %v3098_v40 = vpop.eup %3097 }
 0x582   : > { %v2037_v14 = vmul.f32 %v3098_v40, %v2029_v57 }
 0x583   : > { %v3100_v43 = vpop.eup %3099 }
 0x584   : > { %v2038_v10 = vmul.f32 %v3100_v43, %v2030_v41 }
 0x585   : > { %v3102_v16 = vpop.eup %3101 }
 0x586   : > { %v2039_v17 = vmul.f32 %v3102_v16, %v2031_v50 }
 0x587   : > { %v3104_v18 = vpop.eup %3103 }
 0x588   : > { %v2040_v23 = vmul.f32 %v3104_v18, %v2032_v15 }
 0x58a   : > { %2089 = vmatprep.subr.mxu1 %v2040_v23 }
 0x58b   : > { %2090 = vmatpush1.msra.mxu1 %v2039_v17 }
 0x58c   : > { %2091 = vmatprep.subr.mxu1 %v2038_v10 }
 0x58d   : > { %2092 = vmatpush1.msra.mxu1 %v2037_v14 }
 0x58e   : > { %2776 = vmatmul.mubr.msk.f32.vlgmr.msra.gmra.mxu1 %vm536_vm2, %v3692_v29  ;;  %v224_v29 = vld [vmem:[%s3885_s1 + $0xa8] sm:$0xff] }
 0x58f   : > { %2131 = vmatprep.mubr.f32.mxu1 %v3203_v6  ;;  %2210 = vperm.xlu1 %2824, %v224_v29  }
 0x592   : > { %2777 = vmatmul.mubr.msk.f32.gmra.mxu1 %vm536_vm2, %v3700_v1  ;;  %v225_v1 = vld [vmem:[%s3885_s1 + $0xb0] sm:$0xff] }
 0x593   : > { %2137 = vmatprep.mubr.f32.mxu1 %v3203_v6  ;;  %2215 = vperm.xlu1 %2824, %v225_v1  }
 0x596   : > { %2778 = vmatmul.mubr.msk.f32.gmra.mxu1 %vm536_vm2, %v3708_v2  ;;  %v226_v2 = vld [vmem:[%s3885_s1 + $0xb8] sm:$0xff] }
 0x597   : > { %2143 = vmatprep.mubr.f32.mxu1 %v3203_v6  ;;  %2220 = vperm.xlu1 %2824, %v226_v2  }
 0x59a   : > { %2779 = vmatmul.mubr.msk.f32.gmra.mxu1 %vm536_vm2, %v3716_v13  ;;  %v229_v13 = vld [vmem:[%s3885_s1 + $0xd0] sm:$0xff] }
 0x59b   : > { %2305 = vmatprep.mubr.f32.mxu1 %v3203_v6  ;;  %2381 = vperm.xlu1 %2824, %v229_v13   ;;  %v215_v13 = vld [vmem:[%s3885_s1 + $0x60] sm:$0xff] }
 0x59f   : > { %2386 = vperm.xlu1 %2824, %v230_v19   ;;  %v218_v19 = vld [vmem:[%s3885_s1 + $0x78] sm:$0xff] }
 0x5a3   : > { %2548 = vperm.xlu1 %2824, %v246_v24  }
 0x60a   : > { %v2211_v24 = vpop.permute.xlu1 %2210 }
 0x64e   : > { %v2127_v26 = vpop.f32.mrf.mxu1 }
 0x64f   : > { %v2150_v37 = vmax.f32 %v2127_v26, 0.0 }
 0x650   : > { %v2129_v4 = vpop.f32.mrf.mxu1 }
 0x651   : > { %v2160_v39 = vmul.f32 0.5, %v2150_v37  ;;  %v2151_v31 = vmax.f32 %v2129_v4, 0.0 }
 0x652   : > { %v2133_v20 = vpop.f32.mrf.mxu1 }
 0x653   : > { %v2161_v47 = vmul.f32 0.5, %v2151_v31  ;;  %v2152_v63 = vmax.f32 %v2133_v20, 0.0  ;;  %3105 = vtanh.f32 %v2160_v39  ;;  %v2216_v20 = vpop.permute.xlu1 %2215 }
 0x654   : > { %v2135_v52 = vpop.f32.mrf.mxu1 }
 0x655   : > { %v2168_v53 = vmul.f32 0.5, %v2152_v63  ;;  %v2153_v56 = vmax.f32 %v2135_v52, 0.0  ;;  %3107 = vtanh.f32 %v2161_v47 }
 0x656   : > { %v2139_v33 = vpop.f32.mrf.mxu1 }
 0x657   : > { %3109 = vtanh.f32 %v2168_v53  ;;  %v2169_v38 = vmul.f32 0.5, %v2153_v56  ;;  %v2154_v22 = vmax.f32 %v2139_v33, 0.0 }
 0x658   : > { %v2141_v44 = vpop.f32.mrf.mxu1 }
 0x659   : > { %3111 = vtanh.f32 %v2169_v38  ;;  %v2155_v61 = vmax.f32 %v2141_v44, 0.0  ;;  %v2184_v25 = vmul.f32 0.5, %v2154_v22 }
 0x65a   : > { %v2145_v55 = vpop.f32.mrf.mxu1 }
 0x65b   : > { %v2156_v59 = vmax.f32 %v2145_v55, 0.0  ;;  %v2185_v32 = vmul.f32 0.5, %v2155_v61  ;;  %v2226_v61 = vpop.permute.xlu0 %2225 }
 0x65c   : > { %v2147_v46 = vpop.f32.mrf.mxu1 }
 0x65d   : > { %v2157_v60 = vmax.f32 %v2147_v46, 0.0  ;;  %3113 = vtanh.f32 %v2156_v59 }
 0x65f   : > { %3115 = vtanh.f32 %v2157_v60 }
 0x660   : > { %v3106_v0 = vpop.eup %3105  ;;  %3117 = vtanh.f32 %v2184_v25 }
 0x661   : > { %v2164_v48 = vmul.f32 0.5, %v3106_v0  ;;  %3119 = vtanh.f32 %v2185_v32  ;;  %v2221_v32 = vpop.permute.xlu1 %2220 }
 0x662   : > { %v3108_v3 = vpop.eup %3107 }
 0x663   : > { %v2165_v21 = vmul.f32 0.5, %v3108_v3  ;;  %v2166_v51 = vadd.f32 0.5, %v2164_v48 }
 0x664   : > { %v3110_v11 = vpop.eup %3109 }
 0x665   : > { %v2172_v28 = vmul.f32 0.5, %v3110_v11  ;;  %v2167_v36 = vadd.f32 0.5, %v2165_v21 }
 0x666   : > { %v3112_v35 = vpop.eup %3111 }
 0x667   : > { %v2173_v27 = vmul.f32 0.5, %v3112_v35  ;;  %v2174_v62 = vadd.f32 0.5, %v2172_v28 }
 0x669   : > { %v2175_v49 = vadd.f32 0.5, %v2173_v27  ;;  %v2178_v30 = vmul.f32 %v2174_v62, %v3747_v54 }
 0x66a   : > { %v3114_v12 = vpop.eup %3113 }
 0x66b   : > { %v2180_v34 = vmul.f32 %v3114_v12, %v2166_v51  ;;  %v2179_v57 = vmul.f32 %v2175_v49, %v3749_v8 }
 0x66c   : > { %v3116_v58 = vpop.eup %3115 }
 0x66d   : > { %v2181_v40 = vmul.f32 %v3116_v58, %v2167_v36  ;;  %v3795_v41 = vadd.f32 %v2180_v34, %v2178_v30  ;;  %v3118_v43 = vpop.eup %3117 }
 0x66e   : > { %v3120_v14 = vpop.eup %3119  ;;  %v2188_v50 = vmul.f32 0.5, %v3118_v43 }
 0x66f   : > { %v3797_v42 = vadd.f32 %v2181_v40, %v2179_v57  ;;  %3121 = vtanh.f32 %v3795_v41  ;;  %v2189_v10 = vmul.f32 0.5, %v3120_v14 }
 0x670   : > { %v2190_v16 = vadd.f32 0.5, %v2188_v50 }
 0x671   : > { %3123 = vtanh.f32 %v3797_v42  ;;  %v2191_v17 = vadd.f32 0.5, %v2189_v10 }
 0x67c   : > { %v3122_v15 = vpop.eup %3121 }
 0x67d   : > { %v2194_v18 = vmul.f32 %v3122_v15, %v2190_v16 }
 0x67e   : > { %v3124_v54 = vpop.eup %3123 }
 0x67f   : > { %v2195_v23 = vmul.f32 %v3124_v54, %v2191_v17  ;;  %v2196_v8 = vmul.f32 %v2194_v18, %v3471_v45 }
 0x681   : > { %v2197_v29 = vmul.f32 %v2195_v23, %v3471_v45  ;;  %v3804_v1 = vadd.f32 %v2196_v8, %v3475_v9  ;;  %v216_v45 = vld [vmem:[%s3885_s1 + $0x68] sm:$0xff] }
 0x683   : > { %v3807_v2 = vadd.f32 %v2197_v29, %v3475_v9  ;;  %v217_v9 = vld [vmem:[%s3885_s1 + $0x70] sm:$0xff] }
 0x685   : > { %2271 = vmatprep.subr.mxu1 %v3807_v2 }
 0x686   : > { %2272 = vmatpush1.msra.mxu1 %v3804_v1 }
 0x687   : > { %2780 = vmatmul.mubr.msk.f32.vlgmr.msra.gmra.mxu1 %vm2228_vm3, %v215_v13 }
 0x688   : > { %2311 = vmatprep.mubr.f32.mxu1 %v3203_v6 }
 0x68b   : > { %2781 = vmatmul.mubr.msk.f32.gmra.mxu1 %vm2228_vm3, %v216_v45 }
 0x68c   : > { %2317 = vmatprep.mubr.f32.mxu1 %v3203_v6 }
 0x68f   : > { %2782 = vmatmul.mubr.msk.f32.gmra.mxu1 %vm2228_vm3, %v217_v9 }
 0x690   : > { %2323 = vmatprep.mubr.f32.mxu1 %v3203_v6 }
 0x693   : > { %2783 = vmatmul.mubr.msk.f32.gmra.mxu1 %vm2228_vm3, %v218_v19 }
 0x694   : > { %2488 = vmatprep.mubr.f32.mxu1 %v3203_v6 }
 0x747   : > { %v2307_v26 = vpop.f32.mrf.mxu1 }
 0x748   : > { %v2308_v37 = vadd.f32 %v2307_v26, %v2211_v24 }
 0x749   : > { %v2309_v4 = vpop.f32.mrf.mxu1 }
 0x74a   : > { %v2330_v39 = vmax.f32 %v2308_v37, 0.0  ;;  %v2310_v31 = vadd.f32 %v2309_v4, %v2211_v24 }
 0x74b   : > { %v2313_v47 = vpop.f32.mrf.mxu1 }
 0x74c   : > { %v2338_v63 = vmul.f32 0.5, %v2330_v39  ;;  %v2331_v52 = vmax.f32 %v2310_v31, 0.0  ;;  %v2314_v53 = vadd.f32 %v2313_v47, %v2216_v20  ;;  %v220_v47 = vld [vmem:[%s3885_s1 + $0x88] sm:$0xff] }
 0x74d   : > { %v2315_v56 = vpop.f32.mrf.mxu1 }
 0x74e   : > { %v2339_v33 = vmul.f32 0.5, %v2331_v52  ;;  %v2332_v38 = vmax.f32 %v2314_v53, 0.0  ;;  %v2316_v44 = vadd.f32 %v2315_v56, %v2216_v20  ;;  %3125 = vtanh.f32 %v2338_v63  ;;  %v222_v20 = vld [vmem:[%s3885_s1 + $0x98] sm:$0xff]  ;;  %v221_v63 = vld [vmem:[%s3885_s1 + $0x90] sm:$0xff]  ;;  %v2377_v52 = vpop.permute.xlu0 %2376 }
 0x74f   : > { %v2319_v55 = vpop.f32.mrf.mxu1 }
 0x750   : > { %v2346_v59 = vmul.f32 0.5, %v2332_v38  ;;  %v2333_v46 = vmax.f32 %v2316_v44, 0.0  ;;  %3127 = vtanh.f32 %v2339_v33  ;;  %v2320_v21 = vadd.f32 %v2319_v55, %v2221_v32 }
 0x751   : > { %v2321_v60 = vpop.f32.mrf.mxu1 }
 0x752   : > { %3129 = vtanh.f32 %v2346_v59  ;;  %v2347_v22 = vmul.f32 0.5, %v2333_v46  ;;  %v2322_v35 = vadd.f32 %v2321_v60, %v2221_v32  ;;  %v2334_v49 = vmax.f32 %v2320_v21, 0.0  ;;  %v2382_v46 = vpop.permute.xlu1 %2381 }
 0x753   : > { %v2325_v0 = vpop.f32.mrf.mxu1 }
 0x754   : > { %3131 = vtanh.f32 %v2347_v22  ;;  %v2326_v3 = vadd.f32 %v2325_v0, %v2226_v61  ;;  %v2335_v27 = vmax.f32 %v2322_v35, 0.0  ;;  %v2362_v57 = vmul.f32 0.5, %v2334_v49 }
 0x755   : > { %v2327_v11 = vpop.f32.mrf.mxu1 }
 0x756   : > { %v2336_v25 = vmax.f32 %v2326_v3, 0.0  ;;  %v2328_v28 = vadd.f32 %v2327_v11, %v2226_v61  ;;  %v2363_v58 = vmul.f32 0.5, %v2335_v27  ;;  %v2392_v3 = vpop.permute.xlu0 %2391 }
 0x758   : > { %v2337_v48 = vmax.f32 %v2328_v28, 0.0  ;;  %3133 = vtanh.f32 %v2336_v25 }
 0x75a   : > { %3135 = vtanh.f32 %v2337_v48 }
 0x75b   : > { %v3126_v62 = vpop.eup %3125  ;;  %3137 = vtanh.f32 %v2363_v58 }
 0x75c   : > { %v2342_v34 = vmul.f32 0.5, %v3126_v62  ;;  %3139 = vtanh.f32 %v2362_v57 }
 0x75d   : > { %v3128_v51 = vpop.eup %3127 }
 0x75e   : > { %v2343_v40 = vmul.f32 0.5, %v3128_v51  ;;  %v2344_v10 = vadd.f32 0.5, %v2342_v34 }
 0x75f   : > { %v3130_v12 = vpop.eup %3129 }
 0x760   : > { %v2350_v36 = vmul.f32 0.5, %v3130_v12  ;;  %v2345_v15 = vadd.f32 0.5, %v2343_v40  ;;  %v2387_v12 = vpop.permute.xlu1 %2386 }
 0x761   : > { %v3132_v30 = vpop.eup %3131 }
 0x762   : > { %v2351_v43 = vmul.f32 0.5, %v3132_v30  ;;  %v2352_v14 = vadd.f32 0.5, %v2350_v36 }
 0x764   : > { %v2353_v50 = vadd.f32 0.5, %v2351_v43  ;;  %v2356_v54 = vmul.f32 %v2352_v14, %v3795_v41 }
 0x765   : > { %v3134_v16 = vpop.eup %3133 }
 0x766   : > { %v2358_v18 = vmul.f32 %v3134_v16, %v2344_v10  ;;  %v2357_v23 = vmul.f32 %v2353_v50, %v3797_v42  ;;  %v219_v42 = vld [vmem:[%s3885_s1 + $0x80] sm:$0xff] }
 0x767   : > { %v3136_v17 = vpop.eup %3135 }
 0x768   : > { %v2359_v8 = vmul.f32 %v3136_v17, %v2345_v15  ;;  %v3833_v29 = vadd.f32 %v2358_v18, %v2356_v54  ;;  %v3138_v45 = vpop.eup %3137 }
 0x769   : > { %v3140_v9 = vpop.eup %3139  ;;  %v2367_v19 = vmul.f32 0.5, %v3138_v45 }
 0x76a   : > { %v3835_v13 = vadd.f32 %v2359_v8, %v2357_v23  ;;  %3141 = vtanh.f32 %v3833_v29  ;;  %v2366_v24 = vmul.f32 0.5, %v3140_v9 }
 0x76b   : > { %v2369_v37 = vadd.f32 0.5, %v2367_v19 }
 0x76c   : > { %3143 = vtanh.f32 %v3835_v13  ;;  %v2368_v41 = vadd.f32 0.5, %v2366_v24 }
 0x777   : > { %v3142_v26 = vpop.eup %3141 }
 0x778   : > { %v2372_v31 = vmul.f32 %v3142_v26, %v2368_v41 }
 0x779   : > { %v3144_v4 = vpop.eup %3143 }
 0x77a   : > { %v2373_v39 = vmul.f32 %v3144_v4, %v2369_v37 }
 0x77c   : > { %2436 = vmatprep.subr.mxu0 %v2373_v39  ;;  %2791 = vmatprep.subr.mxu1 %v2373_v39 }
 0x77d   : > { %2437 = vmatpush1.msra.mxu0 %v2372_v31  ;;  %2792 = vmatpush1.msra.mxu1 %v2372_v31 }
 0x77e   : > { %2784 = vmatmul.mubr.msk.f32.vlgmr.msra.gmra.mxu0 %vm2228_vm3, %v219_v42  ;;  %2787 = vmatmul.mubr.msk.f32.vlgmr.msra.gmra.mxu1 %vm2228_vm3, %v222_v20 }
 0x77f   : > { %2476 = vmatprep.mubr.f32.mxu0 %v3203_v6  ;;  %2627 = vmatprep.mubr.f32.mxu1 %v3203_v6 }
 0x782   : > { %2785 = vmatmul.mubr.msk.f32.gmra.mxu0 %vm2228_vm3, %v220_v47 }
 0x783   : > { %2482 = vmatprep.mubr.f32.mxu0 %v3203_v6 }
 0x786   : > { %2786 = vmatmul.mubr.msk.f32.gmra.mxu0 %vm2228_vm3, %v221_v63 }
 0x83e   : > { %v2472_v53 = vpop.f32.mrf.mxu0  ;;  %v2490_v33 = vpop.f32.mrf.mxu1 }
 0x83f   : > { %v2473_v56 = vadd.f32 %v2472_v53, %v2377_v52  ;;  %v2491_v28 = vadd.f32 %v2490_v33, %v2392_v3 }
 0x840   : > { %v2474_v38 = vpop.f32.mrf.mxu0  ;;  %v2492_v61 = vpop.f32.mrf.mxu1 }
 0x841   : > { %v2495_v44 = vmax.f32 %v2473_v56, 0.0  ;;  %v2475_v55 = vadd.f32 %v2474_v38, %v2377_v52  ;;  %v2493_v48 = vadd.f32 %v2492_v61, %v2392_v3  ;;  %v2501_v49 = vmax.f32 %v2491_v28, 0.0 }
 0x842   : > { %v2478_v59 = vpop.f32.mrf.mxu0 }
 0x843   : > { %v2503_v60 = vmul.f32 0.5, %v2495_v44  ;;  %v2496_v22 = vmax.f32 %v2475_v55, 0.0  ;;  %v2479_v0 = vadd.f32 %v2478_v59, %v2382_v46  ;;  %v2502_v36 = vmax.f32 %v2493_v48, 0.0  ;;  %v2542_v44 = vpop.permute.xlu0 %2541  ;;  %v2549_v59 = vpop.permute.xlu1 %2548 }
 0x844   : > { %v2480_v6 = vpop.f32.mrf.mxu0 }
 0x845   : > { %3145 = vtanh.f32 %v2503_v60  ;;  %v2504_v11 = vmul.f32 0.5, %v2496_v22  ;;  %v2481_v25 = vadd.f32 %v2480_v6, %v2382_v46  ;;  %v2497_v32 = vmax.f32 %v2479_v0, 0.0  ;;  %v223_v0 = vld [vmem:[%s3885_s1 + $0xa0] sm:$0x1] }
 0x846   : > { %v2484_v35 = vpop.f32.mrf.mxu0  ;;  %v3206_v6 = vmov 1966171168  }
 0x847   : > { %3147 = vtanh.f32 %v2504_v11  ;;  %v2498_v21 = vmax.f32 %v2481_v25, 0.0  ;;  %v2511_v27 = vmul.f32 0.5, %v2497_v32  ;;  %v2485_v58 = vadd.f32 %v2484_v35, %v2387_v12 }
 0x848   : > { %v2486_v51 = vpop.f32.mrf.mxu0  ;;  %v2638_v3 = vunpack.c.l.s4 %v3206_v6  ;;  %v2641_v25 = vshrl.u32 %v253_v5, 7 }
 0x849   : > { %v2512_v62 = vmul.f32 0.5, %v2498_v21  ;;  %3149 = vtanh.f32 %v2511_v27  ;;  %v2487_v30 = vadd.f32 %v2486_v51, %v2387_v12  ;;  %v2499_v34 = vmax.f32 %v2485_v58, 0.0 }
 0x84a   : > { %v2639_v11 = vunpack.c.0.s8 %v2638_v3 }
 0x84b   : > { %3151 = vtanh.f32 %v2512_v62  ;;  %v2500_v57 = vmax.f32 %v2487_v30, 0.0  ;;  %v2527_v50 = vmul.f32 0.5, %v2499_v34 }
 0x84c   : > { %3153 = vtanh.f32 %v2501_v49  ;;  %v2642_v48 = vsub.s32 %v2639_v11, %v2641_v25 }
 0x84d   : > { %3155 = vtanh.f32 %v2502_v36  ;;  %v2528_v16 = vmul.f32 0.5, %v2500_v57 }
 0x84e   : > { %3157 = vtanh.f32 %v2527_v50 }
 0x84f   : > { %3159 = vtanh.f32 %v2528_v16 }
 0x852   : > { %v3146_v40 = vpop.eup %3145 }
 0x853   : > { %v2507_v14 = vmul.f32 0.5, %v3146_v40 }
 0x854   : > { %v3148_v43 = vpop.eup %3147 }
 0x855   : > { %v2508_v10 = vmul.f32 0.5, %v3148_v43  ;;  %v2509_v54 = vadd.f32 0.5, %v2507_v14 }
 0x856   : > { %v3150_v15 = vpop.eup %3149 }
 0x857   : > { %v2515_v18 = vmul.f32 0.5, %v3150_v15  ;;  %v2510_v23 = vadd.f32 0.5, %v2508_v10 }
 0x858   : > { %v3152_v17 = vpop.eup %3151 }
 0x859   : > { %v2516_v8 = vmul.f32 0.5, %v3152_v17  ;;  %v2517_v45 = vadd.f32 0.5, %v2515_v18  ;;  %v3154_v9 = vpop.eup %3153 }
 0x85a   : > { %v3156_v24 = vpop.eup %3155  ;;  %v2523_v37 = vmul.f32 %v3154_v9, %v2509_v54 }
 0x85b   : > { %v2518_v19 = vadd.f32 0.5, %v2516_v8  ;;  %v2521_v26 = vmul.f32 %v2517_v45, %v3833_v29  ;;  %v2524_v41 = vmul.f32 %v3156_v24, %v2510_v23  ;;  %v3158_v42 = vpop.eup %3157 }
 0x85c   : > { %v3160_v20 = vpop.eup %3159  ;;  %v2531_v47 = vmul.f32 0.5, %v3158_v42 }
 0x85d   : > { %v2522_v4 = vmul.f32 %v2518_v19, %v3835_v13  ;;  %v2525_v39 = vadd.f32 %v2523_v37, %v2521_v26  ;;  %v2532_v63 = vmul.f32 0.5, %v3160_v20 }
 0x85e   : > { %v2533_v52 = vadd.f32 0.5, %v2531_v47 }
 0x85f   : > { %v2526_v31 = vadd.f32 %v2524_v41, %v2522_v4  ;;  %3161 = vtanh.f32 %v2525_v39  ;;  %v2534_v56 = vadd.f32 0.5, %v2532_v63 }
 0x861   : > { %3163 = vtanh.f32 %v2526_v31 }
 0x86c   : > { %v3162_v53 = vpop.eup %3161 }
 0x86d   : > { %v2537_v38 = vmul.f32 %v3162_v53, %v2533_v52 }
 0x86e   : > { %v3164_v33 = vpop.eup %3163 }
 0x86f   : > { %v2538_v29 = vmul.f32 %v3164_v33, %v2534_v56  ;;  %v2544_v55 = vmul.f32 %v2542_v44, %v2537_v38 }
 0x871   : > { %v2545_v13 = vmul.f32 %v2542_v44, %v2538_v29  ;;  %v2551_v46 = vadd.f32 %v2549_v59, %v2544_v55 }
 0x873   : > { %v2552_v60 = vadd.f32 %v2549_v59, %v2545_v13  ;;  %v2553_v61 = vadd.f32 %v2551_v46, %v3804_v1 }
 0x875   : > { %v2554_v22 = vadd.f32 %v2552_v60, %v3807_v2  ;;  %v2558_v2 = vpop.permute.xlu0 %2557 }
 0x877   : > { %2593 = vmatprep.subr.mxu1 %v2554_v22 }
 0x878   : > { %2594 = vmatpush1.msra.mxu1 %v2553_v61 }
 0x879   : > { %2788 = vmatmul.mubr.msk.f32.vlgmr.msra.gmra.mxu1 %vm2228_vm3, %v223_v0 }
 0x939   : > { %v2629_v28 = vpop.f32.mrf.mxu1 }
 0x93a   : > { %v2630_v1 = vadd.f32 %v2629_v28, %v2558_v2 }
 0x93b   : > { %v2631_v32 = vpop.f32.mrf.mxu1 }
 0x93c   : > { %v2632_v35 = vadd.f32 %v2631_v32, %v2558_v2 }
 0x93e   : > { %v2636_v21 = vcombine.low %v2630_v1, %v2632_v35 }
 0x940   : > { %v2643_v27 = vrot.slane %v2636_v21, %v2642_v48 }
 0x942   : > { %v2650_v62 = vrot.slane %v2643_v27, %v2642_v48 }
 0x944   : > { %2652 = vst.msk [vmem:[%s201_s3] sm:$0x3] %vm3267_vm0, %v2650_v62 }
 0x945 PF: > { %p9_p9 = scmp.ge.s32.totalorder %s3239_s13, 4   ;;  %s3889_s9 = smov %s3197_s10 }
 0x946   : > { %s3890_s10 = smov %s3248_s16  ;;  %s3891_s11 = smov %s3239_s13 }
 0x947   :  { %11 = sbr.rel (!%p9_p9) target bundleno = 2 (0x2), region = 110 }

</bundles_post_ra>
